<compile_context>
chip_gen: v7x
topology: tpu7x:2x2x1
jax: 0.10.0
libtpu: 0.0.40
codegen_flags: <defaults>
</compile_context>

<pallas_src>
import functools

import jax
import jax.numpy as jnp
from jax.experimental import pallas as pl
from jax.experimental.pallas import tpu as pltpu


_LANE = 128          # lane width: pad Cout to a multiple of this
_TILE_M_MAX = 1024   # biggest M tile (fits comfortably in scoped VMEM on all chips)


def _round_up(x, m):
    return ((x + m - 1) // m) * m


# ----------------------------------------------------------------------------
# Pallas kernel: fused matmul + bias + LeakyReLU  (the conv hot path)
# ----------------------------------------------------------------------------
def _conv_mm_kernel(x_ref, w_ref, b_ref, o_ref, *, negative_slope, apply_act):
    # x_ref: (TILE_M, K) bf16 im2col patches (tiled over M)
    # w_ref: (K, Cout_pad) bf16  (resident across the grid)
    # b_ref: (1, Cout_pad) f32   (resident across the grid)
    y = jnp.dot(x_ref[...], w_ref[...], preferred_element_type=jnp.float32)
    y = y + b_ref[...]
    if apply_act:  # static flag: final outconv has no activation
        y = jnp.where(y >= 0.0, y, negative_slope * y)
    o_ref[...] = y.astype(o_ref.dtype)


# ----------------------------------------------------------------------------
# im2col glue (plain JAX, fused by XLA): 3x3 patches, padding=1, given stride
# ----------------------------------------------------------------------------
def _im2col(x_nhwc, stride):
    """Extract 3x3 patches -> (N*Ho*Wo, 9*C), (dy,dx)-major / c-minor."""
    N, H, W, C = x_nhwc.shape
    xp = jnp.pad(x_nhwc, ((0, 0), (1, 1), (1, 1), (0, 0)))
    Ho = (H + 2 - 3) // stride + 1
    Wo = (W + 2 - 3) // stride + 1
    cols = []
    for dy in range(3):
        for dx in range(3):
            cols.append(
                xp[:, dy:dy + stride * (Ho - 1) + 1:stride,
                      dx:dx + stride * (Wo - 1) + 1:stride, :]
            )
    cols = jnp.concatenate(cols, axis=-1)  # (N, Ho, Wo, 9*C)
    return cols.reshape(N * Ho * Wo, 9 * C), (N, Ho, Wo)


def conv3x3(x_nhwc, w, b, *, stride=1, negative_slope=0.2, apply_act=True,
            out_dtype=jnp.bfloat16):
    """3x3 conv, padding=1, bias (+ LeakyReLU), via a tiled Pallas MXU matmul.

    w: (Cout, Cin, 3, 3) PyTorch layout; b: (Cout,)
    """
    Cout, Cin, _, _ = w.shape
    # bf16 before im2col: halves the HBM traffic of the 9x patch matrix.
    cols, (N, Ho, Wo) = _im2col(x_nhwc.astype(jnp.bfloat16), stride)
    M, K = cols.shape

    # Lane-dense output: zero-pad Cout to a multiple of 128 (zero weight
    # columns + zero bias -> padded outputs are exactly 0 and sliced off).
    Cout_p = _round_up(Cout, _LANE)
    w2 = jnp.transpose(w, (2, 3, 1, 0)).reshape(9 * Cin, Cout)   # (dy,dx,cin)-major
    w2 = jnp.pad(w2, ((0, 0), (0, Cout_p - Cout))).astype(jnp.bfloat16)
    b2 = jnp.pad(b.reshape(1, Cout).astype(jnp.float32),
                 ((0, 0), (0, Cout_p - Cout)))

    # Tile over M; weights/bias stay resident in VMEM across the grid.
    tile_m = min(_TILE_M_MAX, _round_up(M, 16))
    M_p = _round_up(M, tile_m)
    cols = jnp.pad(cols, ((0, M_p - M), (0, 0)))
    grid = (M_p // tile_m,)

    out_bytes = jnp.dtype(out_dtype).itemsize
    flops = 2 * M_p * K * Cout_p
    bytes_accessed = (M_p * K * 2                  # bf16 patches in
                      + K * Cout_p * 2             # bf16 weights in
                      + Cout_p * 4                 # f32 bias in
                      + M_p * Cout_p * out_bytes)  # result out

    out = pl.pallas_call(
        functools.partial(_conv_mm_kernel,
                          negative_slope=negative_slope,
                          apply_act=apply_act),
        out_shape=jax.ShapeDtypeStruct((M_p, Cout_p), out_dtype),
        grid=grid,
        in_specs=[
            pl.BlockSpec((tile_m, K), lambda i: (i, 0)),     # patches: tiled over M
            pl.BlockSpec((K, Cout_p), lambda i: (0, 0)),     # weights: resident
            pl.BlockSpec((1, Cout_p), lambda i: (0, 0)),     # bias:    resident
        ],
        out_specs=pl.BlockSpec((tile_m, Cout_p), lambda i: (i, 0)),
        compiler_params=pltpu.CompilerParams(
            dimension_semantics=("parallel",),
            vmem_limit_bytes=32 * 1024 * 1024,
        ),
        cost_estimate=pl.CostEstimate(
            flops=flops, transcendentals=0, bytes_accessed=bytes_accessed),
    )(cols, w2, b2)

    out = out[:M, :Cout]                    # drop M padding + lane padding
    return out.reshape(N, Ho, Wo, Cout)


# ----------------------------------------------------------------------------
# Glue ops (plain JAX)
# ----------------------------------------------------------------------------
def upsample2x_nearest(x_nhwc):
    # F.interpolate(scale_factor=2, mode='nearest') on NHWC
    return jnp.repeat(jnp.repeat(x_nhwc, 2, axis=1), 2, axis=2)


# ----------------------------------------------------------------------------
# Deterministic parameter initialization (matches the PyTorch __init__)
# ----------------------------------------------------------------------------
def _kaiming_normal(key, cout, cin, a=0.2):
    # nn.init.kaiming_normal_(weight, a=0.2): fan_in mode, leaky_relu gain
    fan_in = cin * 3 * 3
    gain = (2.0 / (1.0 + a * a)) ** 0.5
    std = gain / (fan_in ** 0.5)
    return jax.random.normal(key, (cout, cin, 3, 3), jnp.float32) * std


# Static per-layer (cin, cout, stride); strides stay OUTSIDE the param pytree
# so they remain Python ints under jit.
def _layer_specs(enc_nf, dec_nf):
    return [
        ("inconv",    enc_nf[0],              enc_nf[1], 1),
        ("down1",     enc_nf[1],              enc_nf[2], 2),
        ("down2",     enc_nf[2],              enc_nf[3], 2),
        ("down3",     enc_nf[3],              enc_nf[4], 2),
        ("down4",     enc_nf[4],              enc_nf[5], 2),
        ("up1",       enc_nf[-1],             dec_nf[0], 1),
        ("up2",       dec_nf[0] + enc_nf[4],  dec_nf[1], 1),
        ("up3",       dec_nf[1] + enc_nf[3],  dec_nf[2], 1),
        ("up4",       dec_nf[2] + enc_nf[2],  dec_nf[3], 1),
        ("same_conv", dec_nf[3] + enc_nf[1],  dec_nf[4], 1),
    ]


def init_unet_params(key, enc_nf=(2, 16, 32, 32, 64, 64),
                     dec_nf=(64, 32, 32, 32, 16, 2)):
    specs = _layer_specs(enc_nf, dec_nf)
    keys = jax.random.split(key, len(specs) + 1)
    params = {}
    for k, (name, cin, cout, _stride) in zip(keys[:-1], specs):
        params[name] = {
            "w": _kaiming_normal(k, cout, cin, a=0.2),
            "b": jnp.zeros((cout,), jnp.float32),
        }
    # outconv: weight ~ N(0, 1e-5), bias = 0, no activation
    params["outconv"] = {
        "w": jax.random.normal(keys[-1], (dec_nf[5], dec_nf[4], 3, 3),
                               jnp.float32) * 1e-5,
        "b": jnp.zeros((dec_nf[5],), jnp.float32),
    }
    return params


# ----------------------------------------------------------------------------
# U-Net forward pass (mirrors Unet.forward exactly)
# ----------------------------------------------------------------------------
@jax.jit
def unet_forward(params, x_nchw):
    x = jnp.transpose(x_nchw.astype(jnp.float32), (0, 2, 3, 1))  # NCHW -> NHWC

    def block(name, t, stride=1):
        p = params[name]
        return conv3x3(t, p["w"], p["b"], stride=stride, negative_slope=0.2)

    skip1 = block("inconv", x)
    skip2 = block("down1", skip1, stride=2)
    skip3 = block("down2", skip2, stride=2)
    skip4 = block("down3", skip3, stride=2)
    y = block("down4", skip4, stride=2)

    y = block("up1", y)
    y = jnp.concatenate([upsample2x_nearest(y), skip4], axis=-1)
    y = block("up2", y)
    y = jnp.concatenate([upsample2x_nearest(y), skip3], axis=-1)
    y = block("up3", y)
    y = jnp.concatenate([upsample2x_nearest(y), skip2], axis=-1)
    y = block("up4", y)
    y = jnp.concatenate([upsample2x_nearest(y), skip1], axis=-1)
    y = block("same_conv", y)

    # Final plain conv: no activation, f32 output.
    p = params["outconv"]
    y = conv3x3(y, p["w"], p["b"], stride=1, apply_act=False,
                out_dtype=jnp.float32)

    return jnp.transpose(y, (0, 3, 1, 2))  # NHWC -> NCHW


# ----------------------------------------------------------------------------
if __name__ == "__main__":
    key = jax.random.PRNGKey(0)
    pkey, xkey = jax.random.split(key)

    enc_nf = (2, 16, 32, 32, 64, 64)
    dec_nf = (64, 32, 32, 32, 16, 2)
    params = init_unet_params(pkey, enc_nf, dec_nf)

    # Small deterministic input: batch=2, channels=enc_nf[0]=2, spatial=16x16
    x = jax.random.normal(xkey, (2, 2, 16, 16), jnp.float32)

    out = unet_forward(params, x)
    out = jax.block_until_ready(out)
    assert out.shape == (2, 2, 16, 16), out.shape
    assert out.dtype == jnp.float32
    print("KERNEL_OK")
</pallas_src>

<mosaic_0001>
module attributes {stable_mosaic.version = 11 : i64} {
  func.func @_conv_mm_kernel(%arg0: i32, %arg1: memref<512x18xbf16, #tpu.memory_space<vmem>>, %arg2: memref<18x128xbf16, #tpu.memory_space<vmem>>, %arg3: memref<1x128xf32, #tpu.memory_space<vmem>>, %arg4: memref<512x128xbf16, #tpu.memory_space<vmem>>) attributes {dimension_semantics = [#tpu.dimension_semantics<parallel>], iteration_bounds = array<i64: 1>, scalar_prefetch = 0 : i64, scratch_operands = 0 : i64, tpu.core_type = #tpu.core_type<tc>, window_params = [{transform_indices = @transform_0, window_bounds = array<i64: 512, 18>}, {pipeline_mode = #tpu.pipeline_mode<synchronous>, transform_indices = @transform_1, window_bounds = array<i64: 18, 128>}, {pipeline_mode = #tpu.pipeline_mode<synchronous>, transform_indices = @transform_2, window_bounds = array<i64: 1, 128>}, {transform_indices = @transform_3, window_bounds = array<i64: 512, 128>}]} {
    %c0 = arith.constant 0 : index
    %c0_0 = arith.constant 0 : index
    %0 = vector.load %arg1[%c0, %c0_0] : memref<512x18xbf16, #tpu.memory_space<vmem>>, vector<512x18xbf16>
    %c0_1 = arith.constant 0 : index
    %c0_2 = arith.constant 0 : index
    %1 = vector.load %arg2[%c0_1, %c0_2] : memref<18x128xbf16, #tpu.memory_space<vmem>>, vector<18x128xbf16>
    %cst = arith.constant dense<0.000000e+00> : vector<512x128xf32>
    %2 = tpu.matmul %0, %1, %cst {dimension_numbers = #tpu.dot_dimension_numbers<[1], [0], [0], [1], [0, 0, 1, 1], [], []>} : vector<512x18xbf16>, vector<18x128xbf16>, vector<512x128xf32> -> vector<512x128xf32>
    %c0_3 = arith.constant 0 : index
    %c0_4 = arith.constant 0 : index
    %3 = vector.load %arg3[%c0_3, %c0_4] : memref<1x128xf32, #tpu.memory_space<vmem>>, vector<1x128xf32>
    %4 = vector.broadcast %3 : vector<1x128xf32> to vector<512x128xf32>
    %5 = arith.addf %2, %4 : vector<512x128xf32>
    %cst_5 = arith.constant 0.000000e+00 : f32
    %6 = vector.broadcast %cst_5 : f32 to vector<512x128xf32>
    %7 = arith.cmpf oge, %5, %6 : vector<512x128xf32>
    %cst_6 = arith.constant 2.000000e-01 : f32
    %8 = vector.broadcast %cst_6 : f32 to vector<512x128xf32>
    %9 = arith.mulf %8, %5 : vector<512x128xf32>
    %10 = arith.select %7, %5, %9 : vector<512x128xi1>, vector<512x128xf32>
    %11 = arith.truncf %10 : vector<512x128xf32> to vector<512x128xbf16>
    %c0_7 = arith.constant 0 : index
    %c0_8 = arith.constant 0 : index
    %12 = vector.load %arg4[%c0_7, %c0_8] : memref<512x128xbf16, #tpu.memory_space<vmem>>, vector<512x128xbf16>
    tpu.vector_store %arg4[%c0_7, %c0_8], %11 {strides = array<i32>} : memref<512x128xbf16, #tpu.memory_space<vmem>>, vector<512x128xbf16>,
    return
  }
  func.func @transform_0(%arg0: i32) -> (i32, i32) {
    %c0_i32 = arith.constant 0 : i32
    %c0_i32_0 = arith.constant 0 : i32
    return %arg0, %c0_i32 : i32, i32
  }
  func.func @transform_1(%arg0: i32) -> (i32, i32) {
    %c0_i32 = arith.constant 0 : i32
    %c0_i32_0 = arith.constant 0 : i32
    %c0_i32_1 = arith.constant 0 : i32
    return %c0_i32, %c0_i32_0 : i32, i32
  }
  func.func @transform_2(%arg0: i32) -> (i32, i32) {
    %c0_i32 = arith.constant 0 : i32
    %c0_i32_0 = arith.constant 0 : i32
    %c0_i32_1 = arith.constant 0 : i32
    return %c0_i32, %c0_i32_0 : i32, i32
  }
  func.func @transform_3(%arg0: i32) -> (i32, i32) {
    %c0_i32 = arith.constant 0 : i32
    %c0_i32_0 = arith.constant 0 : i32
    return %arg0, %c0_i32 : i32, i32
  }
}

module attributes {stable_mosaic.version = 11 : i64} {
  func.func @_conv_mm_kernel(%arg0: i32, %arg1: memref<128x144xbf16, #tpu.memory_space<vmem>>, %arg2: memref<144x128xbf16, #tpu.memory_space<vmem>>, %arg3: memref<1x128xf32, #tpu.memory_space<vmem>>, %arg4: memref<128x128xbf16, #tpu.memory_space<vmem>>) attributes {dimension_semantics = [#tpu.dimension_semantics<parallel>], iteration_bounds = array<i64: 1>, scalar_prefetch = 0 : i64, scratch_operands = 0 : i64, tpu.core_type = #tpu.core_type<tc>, window_params = [{transform_indices = @transform_0, window_bounds = array<i64: 128, 144>}, {pipeline_mode = #tpu.pipeline_mode<synchronous>, transform_indices = @transform_1, window_bounds = array<i64: 144, 128>}, {pipeline_mode = #tpu.pipeline_mode<synchronous>, transform_indices = @transform_2, window_bounds = array<i64: 1, 128>}, {transform_indices = @transform_3, window_bounds = array<i64: 128, 128>}]} {
    %c0 = arith.constant 0 : index
    %c0_0 = arith.constant 0 : index
    %0 = vector.load %arg1[%c0, %c0_0] : memref<128x144xbf16, #tpu.memory_space<vmem>>, vector<128x144xbf16>
    %c0_1 = arith.constant 0 : index
    %c0_2 = arith.constant 0 : index
    %1 = vector.load %arg2[%c0_1, %c0_2] : memref<144x128xbf16, #tpu.memory_space<vmem>>, vector<144x128xbf16>
    %cst = arith.constant dense<0.000000e+00> : vector<128x128xf32>
    %2 = tpu.matmul %0, %1, %cst {dimension_numbers = #tpu.dot_dimension_numbers<[1], [0], [0], [1], [0, 0, 1, 1], [], []>} : vector<128x144xbf16>, vector<144x128xbf16>, vector<128x128xf32> -> vector<128x128xf32>
    %c0_3 = arith.constant 0 : index
    %c0_4 = arith.constant 0 : index
    %3 = vector.load %arg3[%c0_3, %c0_4] : memref<1x128xf32, #tpu.memory_space<vmem>>, vector<1x128xf32>
    %4 = vector.broadcast %3 : vector<1x128xf32> to vector<128x128xf32>
    %5 = arith.addf %2, %4 : vector<128x128xf32>
    %cst_5 = arith.constant 0.000000e+00 : f32
    %6 = vector.broadcast %cst_5 : f32 to vector<128x128xf32>
    %7 = arith.cmpf oge, %5, %6 : vector<128x128xf32>
    %cst_6 = arith.constant 2.000000e-01 : f32
    %8 = vector.broadcast %cst_6 : f32 to vector<128x128xf32>
    %9 = arith.mulf %8, %5 : vector<128x128xf32>
    %10 = arith.select %7, %5, %9 : vector<128x128xi1>, vector<128x128xf32>
    %11 = arith.truncf %10 : vector<128x128xf32> to vector<128x128xbf16>
    %c0_7 = arith.constant 0 : index
    %c0_8 = arith.constant 0 : index
    %12 = vector.load %arg4[%c0_7, %c0_8] : memref<128x128xbf16, #tpu.memory_space<vmem>>, vector<128x128xbf16>
    tpu.vector_store %arg4[%c0_7, %c0_8], %11 {strides = array<i32>} : memref<128x128xbf16, #tpu.memory_space<vmem>>, vector<128x128xbf16>,
    return
  }
  func.func @transform_0(%arg0: i32) -> (i32, i32) {
    %c0_i32 = arith.constant 0 : i32
    %c0_i32_0 = arith.constant 0 : i32
    return %arg0, %c0_i32 : i32, i32
  }
  func.func @transform_1(%arg0: i32) -> (i32, i32) {
    %c0_i32 = arith.constant 0 : i32
    %c0_i32_0 = arith.constant 0 : i32
    %c0_i32_1 = arith.constant 0 : i32
    return %c0_i32, %c0_i32_0 : i32, i32
  }
  func.func @transform_2(%arg0: i32) -> (i32, i32) {
    %c0_i32 = arith.constant 0 : i32
    %c0_i32_0 = arith.constant 0 : i32
    %c0_i32_1 = arith.constant 0 : i32
    return %c0_i32, %c0_i32_0 : i32, i32
  }
  func.func @transform_3(%arg0: i32) -> (i32, i32) {
    %c0_i32 = arith.constant 0 : i32
    %c0_i32_0 = arith.constant 0 : i32
    return %arg0, %c0_i32 : i32, i32
  }
}

module attributes {stable_mosaic.version = 11 : i64} {
  func.func @_conv_mm_kernel(%arg0: i32, %arg1: memref<32x288xbf16, #tpu.memory_space<vmem>>, %arg2: memref<288x128xbf16, #tpu.memory_space<vmem>>, %arg3: memref<1x128xf32, #tpu.memory_space<vmem>>, %arg4: memref<32x128xbf16, #tpu.memory_space<vmem>>) attributes {dimension_semantics = [#tpu.dimension_semantics<parallel>], iteration_bounds = array<i64: 1>, scalar_prefetch = 0 : i64, scratch_operands = 0 : i64, tpu.core_type = #tpu.core_type<tc>, window_params = [{transform_indices = @transform_0, window_bounds = array<i64: 32, 288>}, {pipeline_mode = #tpu.pipeline_mode<synchronous>, transform_indices = @transform_1, window_bounds = array<i64: 288, 128>}, {pipeline_mode = #tpu.pipeline_mode<synchronous>, transform_indices = @transform_2, window_bounds = array<i64: 1, 128>}, {transform_indices = @transform_3, window_bounds = array<i64: 32, 128>}]} {
    %c0 = arith.constant 0 : index
    %c0_0 = arith.constant 0 : index
    %0 = vector.load %arg1[%c0, %c0_0] : memref<32x288xbf16, #tpu.memory_space<vmem>>, vector<32x288xbf16>
    %c0_1 = arith.constant 0 : index
    %c0_2 = arith.constant 0 : index
    %1 = vector.load %arg2[%c0_1, %c0_2] : memref<288x128xbf16, #tpu.memory_space<vmem>>, vector<288x128xbf16>
    %cst = arith.constant dense<0.000000e+00> : vector<32x128xf32>
    %2 = tpu.matmul %0, %1, %cst {dimension_numbers = #tpu.dot_dimension_numbers<[1], [0], [0], [1], [0, 0, 1, 1], [], []>} : vector<32x288xbf16>, vector<288x128xbf16>, vector<32x128xf32> -> vector<32x128xf32>
    %c0_3 = arith.constant 0 : index
    %c0_4 = arith.constant 0 : index
    %3 = vector.load %arg3[%c0_3, %c0_4] : memref<1x128xf32, #tpu.memory_space<vmem>>, vector<1x128xf32>
    %4 = vector.broadcast %3 : vector<1x128xf32> to vector<32x128xf32>
    %5 = arith.addf %2, %4 : vector<32x128xf32>
    %cst_5 = arith.constant 0.000000e+00 : f32
    %6 = vector.broadcast %cst_5 : f32 to vector<32x128xf32>
    %7 = arith.cmpf oge, %5, %6 : vector<32x128xf32>
    %cst_6 = arith.constant 2.000000e-01 : f32
    %8 = vector.broadcast %cst_6 : f32 to vector<32x128xf32>
    %9 = arith.mulf %8, %5 : vector<32x128xf32>
    %10 = arith.select %7, %5, %9 : vector<32x128xi1>, vector<32x128xf32>
    %11 = arith.truncf %10 : vector<32x128xf32> to vector<32x128xbf16>
    %c0_7 = arith.constant 0 : index
    %c0_8 = arith.constant 0 : index
    %12 = vector.load %arg4[%c0_7, %c0_8] : memref<32x128xbf16, #tpu.memory_space<vmem>>, vector<32x128xbf16>
    tpu.vector_store %arg4[%c0_7, %c0_8], %11 {strides = array<i32>} : memref<32x128xbf16, #tpu.memory_space<vmem>>, vector<32x128xbf16>,
    return
  }
  func.func @transform_0(%arg0: i32) -> (i32, i32) {
    %c0_i32 = arith.constant 0 : i32
    %c0_i32_0 = arith.constant 0 : i32
    return %arg0, %c0_i32 : i32, i32
  }
  func.func @transform_1(%arg0: i32) -> (i32, i32) {
    %c0_i32 = arith.constant 0 : i32
    %c0_i32_0 = arith.constant 0 : i32
    %c0_i32_1 = arith.constant 0 : i32
    return %c0_i32, %c0_i32_0 : i32, i32
  }
  func.func @transform_2(%arg0: i32) -> (i32, i32) {
    %c0_i32 = arith.constant 0 : i32
    %c0_i32_0 = arith.constant 0 : i32
    %c0_i32_1 = arith.constant 0 : i32
    return %c0_i32, %c0_i32_0 : i32, i32
  }
  func.func @transform_3(%arg0: i32) -> (i32, i32) {
    %c0_i32 = arith.constant 0 : i32
    %c0_i32_0 = arith.constant 0 : i32
    return %arg0, %c0_i32 : i32, i32
  }
}

module attributes {stable_mosaic.version = 11 : i64} {
  func.func @_conv_mm_kernel(%arg0: i32, %arg1: memref<16x288xbf16, #tpu.memory_space<vmem>>, %arg2: memref<288x128xbf16, #tpu.memory_space<vmem>>, %arg3: memref<1x128xf32, #tpu.memory_space<vmem>>, %arg4: memref<16x128xbf16, #tpu.memory_space<vmem>>) attributes {dimension_semantics = [#tpu.dimension_semantics<parallel>], iteration_bounds = array<i64: 1>, scalar_prefetch = 0 : i64, scratch_operands = 0 : i64, tpu.core_type = #tpu.core_type<tc>, window_params = [{transform_indices = @transform_0, window_bounds = array<i64: 16, 288>}, {pipeline_mode = #tpu.pipeline_mode<synchronous>, transform_indices = @transform_1, window_bounds = array<i64: 288, 128>}, {pipeline_mode = #tpu.pipeline_mode<synchronous>, transform_indices = @transform_2, window_bounds = array<i64: 1, 128>}, {transform_indices = @transform_3, window_bounds = array<i64: 16, 128>}]} {
    %c0 = arith.constant 0 : index
    %c0_0 = arith.constant 0 : index
    %0 = vector.load %arg1[%c0, %c0_0] : memref<16x288xbf16, #tpu.memory_space<vmem>>, vector<16x288xbf16>
    %c0_1 = arith.constant 0 : index
    %c0_2 = arith.constant 0 : index
    %1 = vector.load %arg2[%c0_1, %c0_2] : memref<288x128xbf16, #tpu.memory_space<vmem>>, vector<288x128xbf16>
    %cst = arith.constant dense<0.000000e+00> : vector<16x128xf32>
    %2 = tpu.matmul %0, %1, %cst {dimension_numbers = #tpu.dot_dimension_numbers<[1], [0], [0], [1], [0, 0, 1, 1], [], []>} : vector<16x288xbf16>, vector<288x128xbf16>, vector<16x128xf32> -> vector<16x128xf32>
    %c0_3 = arith.constant 0 : index
    %c0_4 = arith.constant 0 : index
    %3 = vector.load %arg3[%c0_3, %c0_4] : memref<1x128xf32, #tpu.memory_space<vmem>>, vector<1x128xf32>
    %4 = vector.broadcast %3 : vector<1x128xf32> to vector<16x128xf32>
    %5 = arith.addf %2, %4 : vector<16x128xf32>
    %cst_5 = arith.constant 0.000000e+00 : f32
    %6 = vector.broadcast %cst_5 : f32 to vector<16x128xf32>
    %7 = arith.cmpf oge, %5, %6 : vector<16x128xf32>
    %cst_6 = arith.constant 2.000000e-01 : f32
    %8 = vector.broadcast %cst_6 : f32 to vector<16x128xf32>
    %9 = arith.mulf %8, %5 : vector<16x128xf32>
    %10 = arith.select %7, %5, %9 : vector<16x128xi1>, vector<16x128xf32>
    %11 = arith.truncf %10 : vector<16x128xf32> to vector<16x128xbf16>
    %c0_7 = arith.constant 0 : index
    %c0_8 = arith.constant 0 : index
    %12 = vector.load %arg4[%c0_7, %c0_8] : memref<16x128xbf16, #tpu.memory_space<vmem>>, vector<16x128xbf16>
    tpu.vector_store %arg4[%c0_7, %c0_8], %11 {strides = array<i32>} : memref<16x128xbf16, #tpu.memory_space<vmem>>, vector<16x128xbf16>,
    return
  }
  func.func @transform_0(%arg0: i32) -> (i32, i32) {
    %c0_i32 = arith.constant 0 : i32
    %c0_i32_0 = arith.constant 0 : i32
    return %arg0, %c0_i32 : i32, i32
  }
  func.func @transform_1(%arg0: i32) -> (i32, i32) {
    %c0_i32 = arith.constant 0 : i32
    %c0_i32_0 = arith.constant 0 : i32
    %c0_i32_1 = arith.constant 0 : i32
    return %c0_i32, %c0_i32_0 : i32, i32
  }
  func.func @transform_2(%arg0: i32) -> (i32, i32) {
    %c0_i32 = arith.constant 0 : i32
    %c0_i32_0 = arith.constant 0 : i32
    %c0_i32_1 = arith.constant 0 : i32
    return %c0_i32, %c0_i32_0 : i32, i32
  }
  func.func @transform_3(%arg0: i32) -> (i32, i32) {
    %c0_i32 = arith.constant 0 : i32
    %c0_i32_0 = arith.constant 0 : i32
    return %arg0, %c0_i32 : i32, i32
  }
}

module attributes {stable_mosaic.version = 11 : i64} {
  func.func @_conv_mm_kernel(%arg0: i32, %arg1: memref<16x576xbf16, #tpu.memory_space<vmem>>, %arg2: memref<576x128xbf16, #tpu.memory_space<vmem>>, %arg3: memref<1x128xf32, #tpu.memory_space<vmem>>, %arg4: memref<16x128xbf16, #tpu.memory_space<vmem>>) attributes {dimension_semantics = [#tpu.dimension_semantics<parallel>], iteration_bounds = array<i64: 1>, scalar_prefetch = 0 : i64, scratch_operands = 0 : i64, tpu.core_type = #tpu.core_type<tc>, window_params = [{transform_indices = @transform_0, window_bounds = array<i64: 16, 576>}, {pipeline_mode = #tpu.pipeline_mode<synchronous>, transform_indices = @transform_1, window_bounds = array<i64: 576, 128>}, {pipeline_mode = #tpu.pipeline_mode<synchronous>, transform_indices = @transform_2, window_bounds = array<i64: 1, 128>}, {transform_indices = @transform_3, window_bounds = array<i64: 16, 128>}]} {
    %c0 = arith.constant 0 : index
    %c0_0 = arith.constant 0 : index
    %0 = vector.load %arg1[%c0, %c0_0] : memref<16x576xbf16, #tpu.memory_space<vmem>>, vector<16x576xbf16>
    %c0_1 = arith.constant 0 : index
    %c0_2 = arith.constant 0 : index
    %1 = vector.load %arg2[%c0_1, %c0_2] : memref<576x128xbf16, #tpu.memory_space<vmem>>, vector<576x128xbf16>
    %cst = arith.constant dense<0.000000e+00> : vector<16x128xf32>
    %2 = tpu.matmul %0, %1, %cst {dimension_numbers = #tpu.dot_dimension_numbers<[1], [0], [0], [1], [0, 0, 1, 1], [], []>} : vector<16x576xbf16>, vector<576x128xbf16>, vector<16x128xf32> -> vector<16x128xf32>
    %c0_3 = arith.constant 0 : index
    %c0_4 = arith.constant 0 : index
    %3 = vector.load %arg3[%c0_3, %c0_4] : memref<1x128xf32, #tpu.memory_space<vmem>>, vector<1x128xf32>
    %4 = vector.broadcast %3 : vector<1x128xf32> to vector<16x128xf32>
    %5 = arith.addf %2, %4 : vector<16x128xf32>
    %cst_5 = arith.constant 0.000000e+00 : f32
    %6 = vector.broadcast %cst_5 : f32 to vector<16x128xf32>
    %7 = arith.cmpf oge, %5, %6 : vector<16x128xf32>
    %cst_6 = arith.constant 2.000000e-01 : f32
    %8 = vector.broadcast %cst_6 : f32 to vector<16x128xf32>
    %9 = arith.mulf %8, %5 : vector<16x128xf32>
    %10 = arith.select %7, %5, %9 : vector<16x128xi1>, vector<16x128xf32>
    %11 = arith.truncf %10 : vector<16x128xf32> to vector<16x128xbf16>
    %c0_7 = arith.constant 0 : index
    %c0_8 = arith.constant 0 : index
    %12 = vector.load %arg4[%c0_7, %c0_8] : memref<16x128xbf16, #tpu.memory_space<vmem>>, vector<16x128xbf16>
    tpu.vector_store %arg4[%c0_7, %c0_8], %11 {strides = array<i32>} : memref<16x128xbf16, #tpu.memory_space<vmem>>, vector<16x128xbf16>,
    return
  }
  func.func @transform_0(%arg0: i32) -> (i32, i32) {
    %c0_i32 = arith.constant 0 : i32
    %c0_i32_0 = arith.constant 0 : i32
    return %arg0, %c0_i32 : i32, i32
  }
  func.func @transform_1(%arg0: i32) -> (i32, i32) {
    %c0_i32 = arith.constant 0 : i32
    %c0_i32_0 = arith.constant 0 : i32
    %c0_i32_1 = arith.constant 0 : i32
    return %c0_i32, %c0_i32_0 : i32, i32
  }
  func.func @transform_2(%arg0: i32) -> (i32, i32) {
    %c0_i32 = arith.constant 0 : i32
    %c0_i32_0 = arith.constant 0 : i32
    %c0_i32_1 = arith.constant 0 : i32
    return %c0_i32, %c0_i32_0 : i32, i32
  }
  func.func @transform_3(%arg0: i32) -> (i32, i32) {
    %c0_i32 = arith.constant 0 : i32
    %c0_i32_0 = arith.constant 0 : i32
    return %arg0, %c0_i32 : i32, i32
  }
}

module attributes {stable_mosaic.version = 11 : i64} {
  func.func @_conv_mm_kernel(%arg0: i32, %arg1: memref<16x1152xbf16, #tpu.memory_space<vmem>>, %arg2: memref<1152x128xbf16, #tpu.memory_space<vmem>>, %arg3: memref<1x128xf32, #tpu.memory_space<vmem>>, %arg4: memref<16x128xbf16, #tpu.memory_space<vmem>>) attributes {dimension_semantics = [#tpu.dimension_semantics<parallel>], iteration_bounds = array<i64: 1>, scalar_prefetch = 0 : i64, scratch_operands = 0 : i64, tpu.core_type = #tpu.core_type<tc>, window_params = [{transform_indices = @transform_0, window_bounds = array<i64: 16, 1152>}, {pipeline_mode = #tpu.pipeline_mode<synchronous>, transform_indices = @transform_1, window_bounds = array<i64: 1152, 128>}, {pipeline_mode = #tpu.pipeline_mode<synchronous>, transform_indices = @transform_2, window_bounds = array<i64: 1, 128>}, {transform_indices = @transform_3, window_bounds = array<i64: 16, 128>}]} {
    %c0 = arith.constant 0 : index
    %c0_0 = arith.constant 0 : index
    %0 = vector.load %arg1[%c0, %c0_0] : memref<16x1152xbf16, #tpu.memory_space<vmem>>, vector<16x1152xbf16>
    %c0_1 = arith.constant 0 : index
    %c0_2 = arith.constant 0 : index
    %1 = vector.load %arg2[%c0_1, %c0_2] : memref<1152x128xbf16, #tpu.memory_space<vmem>>, vector<1152x128xbf16>
    %cst = arith.constant dense<0.000000e+00> : vector<16x128xf32>
    %2 = tpu.matmul %0, %1, %cst {dimension_numbers = #tpu.dot_dimension_numbers<[1], [0], [0], [1], [0, 0, 1, 1], [], []>} : vector<16x1152xbf16>, vector<1152x128xbf16>, vector<16x128xf32> -> vector<16x128xf32>
    %c0_3 = arith.constant 0 : index
    %c0_4 = arith.constant 0 : index
    %3 = vector.load %arg3[%c0_3, %c0_4] : memref<1x128xf32, #tpu.memory_space<vmem>>, vector<1x128xf32>
    %4 = vector.broadcast %3 : vector<1x128xf32> to vector<16x128xf32>
    %5 = arith.addf %2, %4 : vector<16x128xf32>
    %cst_5 = arith.constant 0.000000e+00 : f32
    %6 = vector.broadcast %cst_5 : f32 to vector<16x128xf32>
    %7 = arith.cmpf oge, %5, %6 : vector<16x128xf32>
    %cst_6 = arith.constant 2.000000e-01 : f32
    %8 = vector.broadcast %cst_6 : f32 to vector<16x128xf32>
    %9 = arith.mulf %8, %5 : vector<16x128xf32>
    %10 = arith.select %7, %5, %9 : vector<16x128xi1>, vector<16x128xf32>
    %11 = arith.truncf %10 : vector<16x128xf32> to vector<16x128xbf16>
    %c0_7 = arith.constant 0 : index
    %c0_8 = arith.constant 0 : index
    %12 = vector.load %arg4[%c0_7, %c0_8] : memref<16x128xbf16, #tpu.memory_space<vmem>>, vector<16x128xbf16>
    tpu.vector_store %arg4[%c0_7, %c0_8], %11 {strides = array<i32>} : memref<16x128xbf16, #tpu.memory_space<vmem>>, vector<16x128xbf16>,
    return
  }
  func.func @transform_0(%arg0: i32) -> (i32, i32) {
    %c0_i32 = arith.constant 0 : i32
    %c0_i32_0 = arith.constant 0 : i32
    return %arg0, %c0_i32 : i32, i32
  }
  func.func @transform_1(%arg0: i32) -> (i32, i32) {
    %c0_i32 = arith.constant 0 : i32
    %c0_i32_0 = arith.constant 0 : i32
    %c0_i32_1 = arith.constant 0 : i32
    return %c0_i32, %c0_i32_0 : i32, i32
  }
  func.func @transform_2(%arg0: i32) -> (i32, i32) {
    %c0_i32 = arith.constant 0 : i32
    %c0_i32_0 = arith.constant 0 : i32
    %c0_i32_1 = arith.constant 0 : i32
    return %c0_i32, %c0_i32_0 : i32, i32
  }
  func.func @transform_3(%arg0: i32) -> (i32, i32) {
    %c0_i32 = arith.constant 0 : i32
    %c0_i32_0 = arith.constant 0 : i32
    return %arg0, %c0_i32 : i32, i32
  }
}

module attributes {stable_mosaic.version = 11 : i64} {
  func.func @_conv_mm_kernel(%arg0: i32, %arg1: memref<32x576xbf16, #tpu.memory_space<vmem>>, %arg2: memref<576x128xbf16, #tpu.memory_space<vmem>>, %arg3: memref<1x128xf32, #tpu.memory_space<vmem>>, %arg4: memref<32x128xbf16, #tpu.memory_space<vmem>>) attributes {dimension_semantics = [#tpu.dimension_semantics<parallel>], iteration_bounds = array<i64: 1>, scalar_prefetch = 0 : i64, scratch_operands = 0 : i64, tpu.core_type = #tpu.core_type<tc>, window_params = [{transform_indices = @transform_0, window_bounds = array<i64: 32, 576>}, {pipeline_mode = #tpu.pipeline_mode<synchronous>, transform_indices = @transform_1, window_bounds = array<i64: 576, 128>}, {pipeline_mode = #tpu.pipeline_mode<synchronous>, transform_indices = @transform_2, window_bounds = array<i64: 1, 128>}, {transform_indices = @transform_3, window_bounds = array<i64: 32, 128>}]} {
    %c0 = arith.constant 0 : index
    %c0_0 = arith.constant 0 : index
    %0 = vector.load %arg1[%c0, %c0_0] : memref<32x576xbf16, #tpu.memory_space<vmem>>, vector<32x576xbf16>
    %c0_1 = arith.constant 0 : index
    %c0_2 = arith.constant 0 : index
    %1 = vector.load %arg2[%c0_1, %c0_2] : memref<576x128xbf16, #tpu.memory_space<vmem>>, vector<576x128xbf16>
    %cst = arith.constant dense<0.000000e+00> : vector<32x128xf32>
    %2 = tpu.matmul %0, %1, %cst {dimension_numbers = #tpu.dot_dimension_numbers<[1], [0], [0], [1], [0, 0, 1, 1], [], []>} : vector<32x576xbf16>, vector<576x128xbf16>, vector<32x128xf32> -> vector<32x128xf32>
    %c0_3 = arith.constant 0 : index
    %c0_4 = arith.constant 0 : index
    %3 = vector.load %arg3[%c0_3, %c0_4] : memref<1x128xf32, #tpu.memory_space<vmem>>, vector<1x128xf32>
    %4 = vector.broadcast %3 : vector<1x128xf32> to vector<32x128xf32>
    %5 = arith.addf %2, %4 : vector<32x128xf32>
    %cst_5 = arith.constant 0.000000e+00 : f32
    %6 = vector.broadcast %cst_5 : f32 to vector<32x128xf32>
    %7 = arith.cmpf oge, %5, %6 : vector<32x128xf32>
    %cst_6 = arith.constant 2.000000e-01 : f32
    %8 = vector.broadcast %cst_6 : f32 to vector<32x128xf32>
    %9 = arith.mulf %8, %5 : vector<32x128xf32>
    %10 = arith.select %7, %5, %9 : vector<32x128xi1>, vector<32x128xf32>
    %11 = arith.truncf %10 : vector<32x128xf32> to vector<32x128xbf16>
    %c0_7 = arith.constant 0 : index
    %c0_8 = arith.constant 0 : index
    %12 = vector.load %arg4[%c0_7, %c0_8] : memref<32x128xbf16, #tpu.memory_space<vmem>>, vector<32x128xbf16>
    tpu.vector_store %arg4[%c0_7, %c0_8], %11 {strides = array<i32>} : memref<32x128xbf16, #tpu.memory_space<vmem>>, vector<32x128xbf16>,
    return
  }
  func.func @transform_0(%arg0: i32) -> (i32, i32) {
    %c0_i32 = arith.constant 0 : i32
    %c0_i32_0 = arith.constant 0 : i32
    return %arg0, %c0_i32 : i32, i32
  }
  func.func @transform_1(%arg0: i32) -> (i32, i32) {
    %c0_i32 = arith.constant 0 : i32
    %c0_i32_0 = arith.constant 0 : i32
    %c0_i32_1 = arith.constant 0 : i32
    return %c0_i32, %c0_i32_0 : i32, i32
  }
  func.func @transform_2(%arg0: i32) -> (i32, i32) {
    %c0_i32 = arith.constant 0 : i32
    %c0_i32_0 = arith.constant 0 : i32
    %c0_i32_1 = arith.constant 0 : i32
    return %c0_i32, %c0_i32_0 : i32, i32
  }
  func.func @transform_3(%arg0: i32) -> (i32, i32) {
    %c0_i32 = arith.constant 0 : i32
    %c0_i32_0 = arith.constant 0 : i32
    return %arg0, %c0_i32 : i32, i32
  }
}

module attributes {stable_mosaic.version = 11 : i64} {
  func.func @_conv_mm_kernel(%arg0: i32, %arg1: memref<128x576xbf16, #tpu.memory_space<vmem>>, %arg2: memref<576x128xbf16, #tpu.memory_space<vmem>>, %arg3: memref<1x128xf32, #tpu.memory_space<vmem>>, %arg4: memref<128x128xbf16, #tpu.memory_space<vmem>>) attributes {dimension_semantics = [#tpu.dimension_semantics<parallel>], iteration_bounds = array<i64: 1>, scalar_prefetch = 0 : i64, scratch_operands = 0 : i64, tpu.core_type = #tpu.core_type<tc>, window_params = [{transform_indices = @transform_0, window_bounds = array<i64: 128, 576>}, {pipeline_mode = #tpu.pipeline_mode<synchronous>, transform_indices = @transform_1, window_bounds = array<i64: 576, 128>}, {pipeline_mode = #tpu.pipeline_mode<synchronous>, transform_indices = @transform_2, window_bounds = array<i64: 1, 128>}, {transform_indices = @transform_3, window_bounds = array<i64: 128, 128>}]} {
    %c0 = arith.constant 0 : index
    %c0_0 = arith.constant 0 : index
    %0 = vector.load %arg1[%c0, %c0_0] : memref<128x576xbf16, #tpu.memory_space<vmem>>, vector<128x576xbf16>
    %c0_1 = arith.constant 0 : index
    %c0_2 = arith.constant 0 : index
    %1 = vector.load %arg2[%c0_1, %c0_2] : memref<576x128xbf16, #tpu.memory_space<vmem>>, vector<576x128xbf16>
    %cst = arith.constant dense<0.000000e+00> : vector<128x128xf32>
    %2 = tpu.matmul %0, %1, %cst {dimension_numbers = #tpu.dot_dimension_numbers<[1], [0], [0], [1], [0, 0, 1, 1], [], []>} : vector<128x576xbf16>, vector<576x128xbf16>, vector<128x128xf32> -> vector<128x128xf32>
    %c0_3 = arith.constant 0 : index
    %c0_4 = arith.constant 0 : index
    %3 = vector.load %arg3[%c0_3, %c0_4] : memref<1x128xf32, #tpu.memory_space<vmem>>, vector<1x128xf32>
    %4 = vector.broadcast %3 : vector<1x128xf32> to vector<128x128xf32>
    %5 = arith.addf %2, %4 : vector<128x128xf32>
    %cst_5 = arith.constant 0.000000e+00 : f32
    %6 = vector.broadcast %cst_5 : f32 to vector<128x128xf32>
    %7 = arith.cmpf oge, %5, %6 : vector<128x128xf32>
    %cst_6 = arith.constant 2.000000e-01 : f32
    %8 = vector.broadcast %cst_6 : f32 to vector<128x128xf32>
    %9 = arith.mulf %8, %5 : vector<128x128xf32>
    %10 = arith.select %7, %5, %9 : vector<128x128xi1>, vector<128x128xf32>
    %11 = arith.truncf %10 : vector<128x128xf32> to vector<128x128xbf16>
    %c0_7 = arith.constant 0 : index
    %c0_8 = arith.constant 0 : index
    %12 = vector.load %arg4[%c0_7, %c0_8] : memref<128x128xbf16, #tpu.memory_space<vmem>>, vector<128x128xbf16>
    tpu.vector_store %arg4[%c0_7, %c0_8], %11 {strides = array<i32>} : memref<128x128xbf16, #tpu.memory_space<vmem>>, vector<128x128xbf16>,
    return
  }
  func.func @transform_0(%arg0: i32) -> (i32, i32) {
    %c0_i32 = arith.constant 0 : i32
    %c0_i32_0 = arith.constant 0 : i32
    return %arg0, %c0_i32 : i32, i32
  }
  func.func @transform_1(%arg0: i32) -> (i32, i32) {
    %c0_i32 = arith.constant 0 : i32
    %c0_i32_0 = arith.constant 0 : i32
    %c0_i32_1 = arith.constant 0 : i32
    return %c0_i32, %c0_i32_0 : i32, i32
  }
  func.func @transform_2(%arg0: i32) -> (i32, i32) {
    %c0_i32 = arith.constant 0 : i32
    %c0_i32_0 = arith.constant 0 : i32
    %c0_i32_1 = arith.constant 0 : i32
    return %c0_i32, %c0_i32_0 : i32, i32
  }
  func.func @transform_3(%arg0: i32) -> (i32, i32) {
    %c0_i32 = arith.constant 0 : i32
    %c0_i32_0 = arith.constant 0 : i32
    return %arg0, %c0_i32 : i32, i32
  }
}

module attributes {stable_mosaic.version = 11 : i64} {
  func.func @_conv_mm_kernel(%arg0: i32, %arg1: memref<512x432xbf16, #tpu.memory_space<vmem>>, %arg2: memref<432x128xbf16, #tpu.memory_space<vmem>>, %arg3: memref<1x128xf32, #tpu.memory_space<vmem>>, %arg4: memref<512x128xbf16, #tpu.memory_space<vmem>>) attributes {dimension_semantics = [#tpu.dimension_semantics<parallel>], iteration_bounds = array<i64: 1>, scalar_prefetch = 0 : i64, scratch_operands = 0 : i64, tpu.core_type = #tpu.core_type<tc>, window_params = [{transform_indices = @transform_0, window_bounds = array<i64: 512, 432>}, {pipeline_mode = #tpu.pipeline_mode<synchronous>, transform_indices = @transform_1, window_bounds = array<i64: 432, 128>}, {pipeline_mode = #tpu.pipeline_mode<synchronous>, transform_indices = @transform_2, window_bounds = array<i64: 1, 128>}, {transform_indices = @transform_3, window_bounds = array<i64: 512, 128>}]} {
    %c0 = arith.constant 0 : index
    %c0_0 = arith.constant 0 : index
    %0 = vector.load %arg1[%c0, %c0_0] : memref<512x432xbf16, #tpu.memory_space<vmem>>, vector<512x432xbf16>
    %c0_1 = arith.constant 0 : index
    %c0_2 = arith.constant 0 : index
    %1 = vector.load %arg2[%c0_1, %c0_2] : memref<432x128xbf16, #tpu.memory_space<vmem>>, vector<432x128xbf16>
    %cst = arith.constant dense<0.000000e+00> : vector<512x128xf32>
    %2 = tpu.matmul %0, %1, %cst {dimension_numbers = #tpu.dot_dimension_numbers<[1], [0], [0], [1], [0, 0, 1, 1], [], []>} : vector<512x432xbf16>, vector<432x128xbf16>, vector<512x128xf32> -> vector<512x128xf32>
    %c0_3 = arith.constant 0 : index
    %c0_4 = arith.constant 0 : index
    %3 = vector.load %arg3[%c0_3, %c0_4] : memref<1x128xf32, #tpu.memory_space<vmem>>, vector<1x128xf32>
    %4 = vector.broadcast %3 : vector<1x128xf32> to vector<512x128xf32>
    %5 = arith.addf %2, %4 : vector<512x128xf32>
    %cst_5 = arith.constant 0.000000e+00 : f32
    %6 = vector.broadcast %cst_5 : f32 to vector<512x128xf32>
    %7 = arith.cmpf oge, %5, %6 : vector<512x128xf32>
    %cst_6 = arith.constant 2.000000e-01 : f32
    %8 = vector.broadcast %cst_6 : f32 to vector<512x128xf32>
    %9 = arith.mulf %8, %5 : vector<512x128xf32>
    %10 = arith.select %7, %5, %9 : vector<512x128xi1>, vector<512x128xf32>
    %11 = arith.truncf %10 : vector<512x128xf32> to vector<512x128xbf16>
    %c0_7 = arith.constant 0 : index
    %c0_8 = arith.constant 0 : index
    %12 = vector.load %arg4[%c0_7, %c0_8] : memref<512x128xbf16, #tpu.memory_space<vmem>>, vector<512x128xbf16>
    tpu.vector_store %arg4[%c0_7, %c0_8], %11 {strides = array<i32>} : memref<512x128xbf16, #tpu.memory_space<vmem>>, vector<512x128xbf16>,
    return
  }
  func.func @transform_0(%arg0: i32) -> (i32, i32) {
    %c0_i32 = arith.constant 0 : i32
    %c0_i32_0 = arith.constant 0 : i32
    return %arg0, %c0_i32 : i32, i32
  }
  func.func @transform_1(%arg0: i32) -> (i32, i32) {
    %c0_i32 = arith.constant 0 : i32
    %c0_i32_0 = arith.constant 0 : i32
    %c0_i32_1 = arith.constant 0 : i32
    return %c0_i32, %c0_i32_0 : i32, i32
  }
  func.func @transform_2(%arg0: i32) -> (i32, i32) {
    %c0_i32 = arith.constant 0 : i32
    %c0_i32_0 = arith.constant 0 : i32
    %c0_i32_1 = arith.constant 0 : i32
    return %c0_i32, %c0_i32_0 : i32, i32
  }
  func.func @transform_3(%arg0: i32) -> (i32, i32) {
    %c0_i32 = arith.constant 0 : i32
    %c0_i32_0 = arith.constant 0 : i32
    return %arg0, %c0_i32 : i32, i32
  }
}

module attributes {stable_mosaic.version = 11 : i64} {
  func.func @_conv_mm_kernel(%arg0: i32, %arg1: memref<512x144xbf16, #tpu.memory_space<vmem>>, %arg2: memref<144x128xbf16, #tpu.memory_space<vmem>>, %arg3: memref<1x128xf32, #tpu.memory_space<vmem>>, %arg4: memref<512x128xf32, #tpu.memory_space<vmem>>) attributes {dimension_semantics = [#tpu.dimension_semantics<parallel>], iteration_bounds = array<i64: 1>, scalar_prefetch = 0 : i64, scratch_operands = 0 : i64, tpu.core_type = #tpu.core_type<tc>, window_params = [{transform_indices = @transform_0, window_bounds = array<i64: 512, 144>}, {pipeline_mode = #tpu.pipeline_mode<synchronous>, transform_indices = @transform_1, window_bounds = array<i64: 144, 128>}, {pipeline_mode = #tpu.pipeline_mode<synchronous>, transform_indices = @transform_2, window_bounds = array<i64: 1, 128>}, {transform_indices = @transform_3, window_bounds = array<i64: 512, 128>}]} {
    %c0 = arith.constant 0 : index
    %c0_0 = arith.constant 0 : index
    %0 = vector.load %arg1[%c0, %c0_0] : memref<512x144xbf16, #tpu.memory_space<vmem>>, vector<512x144xbf16>
    %c0_1 = arith.constant 0 : index
    %c0_2 = arith.constant 0 : index
    %1 = vector.load %arg2[%c0_1, %c0_2] : memref<144x128xbf16, #tpu.memory_space<vmem>>, vector<144x128xbf16>
    %cst = arith.constant dense<0.000000e+00> : vector<512x128xf32>
    %2 = tpu.matmul %0, %1, %cst {dimension_numbers = #tpu.dot_dimension_numbers<[1], [0], [0], [1], [0, 0, 1, 1], [], []>} : vector<512x144xbf16>, vector<144x128xbf16>, vector<512x128xf32> -> vector<512x128xf32>
    %c0_3 = arith.constant 0 : index
    %c0_4 = arith.constant 0 : index
    %3 = vector.load %arg3[%c0_3, %c0_4] : memref<1x128xf32, #tpu.memory_space<vmem>>, vector<1x128xf32>
    %4 = vector.broadcast %3 : vector<1x128xf32> to vector<512x128xf32>
    %5 = arith.addf %2, %4 : vector<512x128xf32>
    %c0_5 = arith.constant 0 : index
    %c0_6 = arith.constant 0 : index
    %6 = vector.load %arg4[%c0_5, %c0_6] : memref<512x128xf32, #tpu.memory_space<vmem>>, vector<512x128xf32>
    tpu.vector_store %arg4[%c0_5, %c0_6], %5 {strides = array<i32>} : memref<512x128xf32, #tpu.memory_space<vmem>>, vector<512x128xf32>,
    return
  }
  func.func @transform_0(%arg0: i32) -> (i32, i32) {
    %c0_i32 = arith.constant 0 : i32
    %c0_i32_0 = arith.constant 0 : i32
    return %arg0, %c0_i32 : i32, i32
  }
  func.func @transform_1(%arg0: i32) -> (i32, i32) {
    %c0_i32 = arith.constant 0 : i32
    %c0_i32_0 = arith.constant 0 : i32
    %c0_i32_1 = arith.constant 0 : i32
    return %c0_i32, %c0_i32_0 : i32, i32
  }
  func.func @transform_2(%arg0: i32) -> (i32, i32) {
    %c0_i32 = arith.constant 0 : i32
    %c0_i32_0 = arith.constant 0 : i32
    %c0_i32_1 = arith.constant 0 : i32
    return %c0_i32, %c0_i32_0 : i32, i32
  }
  func.func @transform_3(%arg0: i32) -> (i32, i32) {
    %c0_i32 = arith.constant 0 : i32
    %c0_i32_0 = arith.constant 0 : i32
    return %arg0, %c0_i32 : i32, i32
  }
}

</mosaic_0001>

<bundles_post_ra>
// kernel: unet_forward.11
= control target key start
LH: loop header
LB: loop body
LE: loop exit
PB: predicated region body
PF: predicated region fallthrough
CT: control target
= control target key end

     0   :  { %vm355_vm0 = vcmask 1040384   ;;  %vm258_vm1 = vcmask 146432   ;;  %s2020_s1 = inlined_call_operand.vmem [shape: bf16[18,128], index: 1, kind: input, shape index: {}]   ;;  %s2021_s0 = inlined_call_operand.vmem [shape: bf16[512,18], index: 0, kind: input, shape index: {}]   ;;  %s2022_s2 = inlined_call_operand.vmem [shape: f32[1,128], index: 2, kind: input, shape index: {}]   ;;  %s2023_s3 = inlined_call_operand.vmem [shape: bf16[512,128], index: 3, kind: output, shape index: {}]  }
   0x1   :  { %v1658_v0 = vld [vmem:[%s2020_s1] sm:$0xff]   ;;  %v1659_v1 = vld [vmem:[%s2020_s1 + $0x8] ss:$0 sps:$4 sm:$0x11]   ;;  %v1664_v7 = vld [vmem:[%s2021_s0 + $0x10] sm:$0xff]  }
   0x2   :  { %v1660_v2 = vld [vmem:[%s2021_s0] sm:$0xff]   ;;  %1584 = vmatprep.subr.bf16.mxu0 %v1658_v0  ;;  %1652 = vmatprep.subr.bf16.mxu1 %v1658_v0  ;;  %v357_v4 = vsel %vm355_vm0, %v1659_v1, 0  ;;  %v1662_v5 = vld [vmem:[%s2021_s0 + $0x8] sm:$0xff]   ;;  %v1665_v8 = vld [vmem:[%s2021_s0 + $0x90] sm:$0xff]  }
   0x3   :  { %1585 = vmatpush3.bf16.msra.mxu0 %v1658_v0  ;;  %1654 = vmatpush3.bf16.msra.mxu1 %v1658_v0  ;;  %v1661_v3 = vld [vmem:[%s2021_s0 + $0x80] sm:$0xff]   ;;  %v1663_v6 = vld [vmem:[%s2021_s0 + $0x88] sm:$0xff]   ;;  %v1666_v9 = vld [vmem:[%s2021_s0 + $0x18] sm:$0xff]  }
   0x4   :  { %1656 = vmatprep.subr.msk.bf16.mxu0 %vm355_vm0, %v1659_v1  ;;  %1657 = vmatprep.subr.msk.bf16.mxu1 %vm355_vm0, %v1659_v1  ;;  %v1667_v10 = vld [vmem:[%s2021_s0 + $0x98] sm:$0xff]   ;;  %v1668_v11 = vld [vmem:[%s2021_s0 + $0x20] sm:$0xff]   ;;  %v1670_v13 = vld [vmem:[%s2021_s0 + $0x28] sm:$0xff]  }
   0x5   :  { %1588 = vmatprep.mubr.msk.bf16.mxu0 %vm258_vm1, %v1660_v2  ;;  %1620 = vmatprep.mubr.msk.bf16.mxu1 %vm258_vm1, %v1661_v3  ;;  %v1669_v12 = vld [vmem:[%s2021_s0 + $0xa0] sm:$0xff]   ;;  %v1671_v14 = vld [vmem:[%s2021_s0 + $0xa8] sm:$0xff]   ;;  %v1672_v15 = vld [vmem:[%s2021_s0 + $0x30] sm:$0xff]  }
   0x6   :  { %v1673_v16 = vld [vmem:[%s2021_s0 + $0xb0] sm:$0xff]   ;;  %v1674_v17 = vld [vmem:[%s2021_s0 + $0x38] sm:$0xff]   ;;  %v1676_v19 = vld [vmem:[%s2021_s0 + $0x40] sm:$0xff]  }
   0x7   :  { %1587 = vmatpush3.bf16.msra.mxu0 %v357_v4  ;;  %1655 = vmatpush3.bf16.msra.mxu1 %v357_v4  ;;  %v1675_v18 = vld [vmem:[%s2021_s0 + $0xb8] sm:$0xff]   ;;  %v1677_v20 = vld [vmem:[%s2021_s0 + $0xc0] sm:$0xff]   ;;  %v1678_v21 = vld [vmem:[%s2021_s0 + $0x48] sm:$0xff]  }
   0x8   :  { %v1679_v22 = vld [vmem:[%s2021_s0 + $0xc8] sm:$0xff]   ;;  %v1680_v23 = vld [vmem:[%s2021_s0 + $0x50] sm:$0xff]   ;;  %v1682_v25 = vld [vmem:[%s2021_s0 + $0x58] sm:$0xff]  }
   0x9   :  { %v1681_v24 = vld [vmem:[%s2021_s0 + $0xd0] sm:$0xff]   ;;  %v1683_v26 = vld [vmem:[%s2021_s0 + $0xd8] sm:$0xff]   ;;  %v1684_v27 = vld [vmem:[%s2021_s0 + $0x60] sm:$0xff]  }
   0xa   :  { %1589 = vmatmul.mubr.msk.bf16.vlgmr.msra.gmra.mrb[0].mxu0 %vm258_vm1, %v1662_v5  ;;  %1621 = vmatmul.mubr.msk.bf16.vlgmr.msra.gmra.mrb[0].mxu1 %vm258_vm1, %v1663_v6  ;;  %v1685_v28 = vld [vmem:[%s2021_s0 + $0xe0] sm:$0xff]   ;;  %v1686_v29 = vld [vmem:[%s2021_s0 + $0x68] sm:$0xff]   ;;  %v1688_v31 = vld [vmem:[%s2021_s0 + $0x70] sm:$0xff]  }
   0xb   :  { %1592 = vmatprep.mubr.msk.bf16.mxu0 %vm258_vm1, %v1664_v7  ;;  %1624 = vmatprep.mubr.msk.bf16.mxu1 %vm258_vm1, %v1665_v8  ;;  %v1687_v30 = vld [vmem:[%s2021_s0 + $0xe8] sm:$0xff]   ;;  %v1689_v32 = vld [vmem:[%s2021_s0 + $0xf0] sm:$0xff]   ;;  %v1690_v33 = vld [vmem:[%s2021_s0 + $0x78] sm:$0xff]  }
   0xc   :  { %v1691_v34 = vld [vmem:[%s2021_s0 + $0xf8] sm:$0xff]   ;;  %v1849_v35 = vld [vmem:[%s2022_s2] ss:$0 sm:$0xff] }
  0x12   :  { %1593 = vmatmul.mubr.msk.bf16.gmra.mrb[4].mxu0 %vm258_vm1, %v1666_v9  ;;  %1625 = vmatmul.mubr.msk.bf16.gmra.mrb[4].mxu1 %vm258_vm1, %v1667_v10 }
  0x13   :  { %1596 = vmatprep.mubr.msk.bf16.mxu0 %vm258_vm1, %v1668_v11  ;;  %1628 = vmatprep.mubr.msk.bf16.mxu1 %vm258_vm1, %v1669_v12 }
  0x1a   :  { %1597 = vmatmul.mubr.msk.bf16.gmra.mrb[8].mxu0 %vm258_vm1, %v1670_v13  ;;  %1629 = vmatmul.mubr.msk.bf16.gmra.mrb[8].mxu1 %vm258_vm1, %v1671_v14 }
  0x1b   :  { %1600 = vmatprep.mubr.msk.bf16.mxu0 %vm258_vm1, %v1672_v15  ;;  %1632 = vmatprep.mubr.msk.bf16.mxu1 %vm258_vm1, %v1673_v16 }
  0x22   :  { %1601 = vmatmul.mubr.msk.bf16.gmra.mrb[12].mxu0 %vm258_vm1, %v1674_v17  ;;  %1633 = vmatmul.mubr.msk.bf16.gmra.mrb[12].mxu1 %vm258_vm1, %v1675_v18 }
  0x23   :  { %1604 = vmatprep.mubr.msk.bf16.mxu0 %vm258_vm1, %v1676_v19  ;;  %1636 = vmatprep.mubr.msk.bf16.mxu1 %vm258_vm1, %v1677_v20 }
  0x2a   :  { %1605 = vmatmul.mubr.msk.bf16.gmra.mrb[16].mxu0 %vm258_vm1, %v1678_v21  ;;  %1637 = vmatmul.mubr.msk.bf16.gmra.mrb[16].mxu1 %vm258_vm1, %v1679_v22 }
  0x2b   :  { %1608 = vmatprep.mubr.msk.bf16.mxu0 %vm258_vm1, %v1680_v23  ;;  %1640 = vmatprep.mubr.msk.bf16.mxu1 %vm258_vm1, %v1681_v24 }
  0x32   :  { %1609 = vmatmul.mubr.msk.bf16.gmra.mrb[20].mxu0 %vm258_vm1, %v1682_v25  ;;  %1641 = vmatmul.mubr.msk.bf16.gmra.mrb[20].mxu1 %vm258_vm1, %v1683_v26 }
  0x33   :  { %1612 = vmatprep.mubr.msk.bf16.mxu0 %vm258_vm1, %v1684_v27  ;;  %1644 = vmatprep.mubr.msk.bf16.mxu1 %vm258_vm1, %v1685_v28 }
  0x3a   :  { %1613 = vmatmul.mubr.msk.bf16.gmra.mrb[24].mxu0 %vm258_vm1, %v1686_v29  ;;  %1645 = vmatmul.mubr.msk.bf16.gmra.mrb[24].mxu1 %vm258_vm1, %v1687_v30 }
  0x3b   :  { %1616 = vmatprep.mubr.msk.bf16.mxu0 %vm258_vm1, %v1688_v31  ;;  %1648 = vmatprep.mubr.msk.bf16.mxu1 %vm258_vm1, %v1689_v32 }
  0x42   :  { %1617 = vmatmul.mubr.msk.bf16.gmra.mrb[28].mxu0 %vm258_vm1, %v1690_v33  ;;  %1649 = vmatmul.mubr.msk.bf16.gmra.mrb[28].mxu1 %vm258_vm1, %v1691_v34 }
  0xdd   :  { %v1590_v36 = vpop.f32.mrb[0].mxu0  ;;  %v1622_v37 = vpop.f32.mrb[0].mxu1 }
  0xde   :  { %v402_v38 = vadd.f32 %v1590_v36, %v1849_v35  ;;  %v530_v39 = vadd.f32 %v1622_v37, %v1849_v35  ;;  %v393_v40 = vpop.f32.mrb[1].mxu0  ;;  %v521_v41 = vpop.f32.mrb[1].mxu1 }
  0xdf   :  { %v394_v42 = vadd.f32 %v1849_v35, %v393_v40  ;;  %v522_v43 = vadd.f32 %v1849_v35, %v521_v41  ;;  %v1591_v44 = vpop.f32.mrb[2].mxu0  ;;  %v1623_v45 = vpop.f32.mrb[2].mxu1 }
  0xe0   :  { %vm650_vm2 = vcmp.ge.f32.partialorder %v402_v38, 0.0  ;;  %v714_v46 = vmul.f32 0.2, %v402_v38  ;;  %vm682_vm3 = vcmp.ge.f32.partialorder %v530_v39, 0.0  ;;  %v746_v47 = vmul.f32 0.2, %v530_v39 }
  0xe1   :  { %vm648_vm4 = vcmp.ge.f32.partialorder %v394_v42, 0.0  ;;  %v712_v48 = vmul.f32 0.2, %v394_v42  ;;  %vm680_vm5 = vcmp.ge.f32.partialorder %v522_v43, 0.0  ;;  %v744_v49 = vmul.f32 0.2, %v522_v43 }
  0xe2   :  { %v405_v50 = vadd.f32 %v1591_v44, %v1849_v35  ;;  %v533_v51 = vadd.f32 %v1623_v45, %v1849_v35  ;;  %v396_v52 = vpop.f32.mrb[3].mxu0  ;;  %v524_v53 = vpop.f32.mrb[3].mxu1  ;;  %v778_v54 = vsel %vm650_vm2, %v402_v38, %v714_v46  ;;  %v810_v55 = vsel %vm682_vm3, %v530_v39, %v746_v47 }
  0xe3   :  { %v397_v56 = vadd.f32 %v1849_v35, %v396_v52  ;;  %v525_v57 = vadd.f32 %v1849_v35, %v524_v53  ;;  %v776_v62 = vsel %vm648_vm4, %v394_v42, %v712_v48  ;;  %v808_v63 = vsel %vm680_vm5, %v522_v43, %v744_v49 }
  0xe4   :  { %vm651_vm6 = vcmp.ge.f32.partialorder %v405_v50, 0.0  ;;  %v715_v58 = vmul.f32 0.2, %v405_v50  ;;  %vm683_vm7 = vcmp.ge.f32.partialorder %v533_v51, 0.0  ;;  %v747_v59 = vmul.f32 0.2, %v533_v51 }
  0xe5   :  { %vm649_vm8 = vcmp.ge.f32.partialorder %v397_v56, 0.0  ;;  %v713_v60 = vmul.f32 0.2, %v397_v56  ;;  %vm681_vm9 = vcmp.ge.f32.partialorder %v525_v57, 0.0  ;;  %v745_v61 = vmul.f32 0.2, %v525_v57 }
  0xe6   :  { %v779_v0 = vsel %vm651_vm6, %v405_v50, %v715_v58  ;;  %v811_v1 = vsel %vm683_vm7, %v533_v51, %v747_v59  ;;  %v1594_v2 = vpop.f32.mrb[4].mxu0  ;;  %v1626_v3 = vpop.f32.mrb[4].mxu1 }
  0xe7   :  { %v1367_v4 = vpack.c.bf16 %v779_v0, %v778_v54  ;;  %v1447_v5 = vpack.c.bf16 %v811_v1, %v810_v55  ;;  %v777_v6 = vsel %vm649_vm8, %v397_v56, %v713_v60  ;;  %v809_v7 = vsel %vm681_vm9, %v525_v57, %v745_v61  ;;  %v409_v8 = vpop.f32.mrb[5].mxu0  ;;  %v537_v9 = vpop.f32.mrb[5].mxu1 }
  0xe8   :  { %v1362_v10 = vpack.c.bf16 %v777_v6, %v776_v62  ;;  %v1442_v11 = vpack.c.bf16 %v809_v7, %v808_v63  ;;  %v418_v12 = vadd.f32 %v1594_v2, %v1849_v35  ;;  %v546_v13 = vadd.f32 %v1626_v3, %v1849_v35  ;;  %v1595_v14 = vpop.f32.mrb[6].mxu0  ;;  %v1627_v15 = vpop.f32.mrb[6].mxu1 }
  0xe9   :  { %1519 = vst [vmem:[%s2023_s3 + $0x8] sm:$0xff] %v1367_v4   ;;  %1535 = vst [vmem:[%s2023_s3 + $0x88] sm:$0xff] %v1447_v5   ;;  %v410_v16 = vadd.f32 %v1849_v35, %v409_v8  ;;  %v538_v17 = vadd.f32 %v1849_v35, %v537_v9  ;;  %v421_v18 = vadd.f32 %v1595_v14, %v1849_v35  ;;  %v412_v20 = vpop.f32.mrb[7].mxu0  ;;  %v540_v21 = vpop.f32.mrb[7].mxu1 }
  0xea   :  { %v549_v19 = vadd.f32 %v1627_v15, %v1849_v35  ;;  %1363 = vst [vmem:[%s2023_s3] sm:$0xff] %v1362_v10   ;;  %1534 = vst [vmem:[%s2023_s3 + $0x80] sm:$0xff] %v1442_v11   ;;  %vm654_vm10 = vcmp.ge.f32.partialorder %v418_v12, 0.0  ;;  %v718_v22 = vmul.f32 0.2, %v418_v12  ;;  %vm686_vm11 = vcmp.ge.f32.partialorder %v546_v13, 0.0 }
  0xeb   :  { %v750_v23 = vmul.f32 0.2, %v546_v13  ;;  %vm652_vm12 = vcmp.ge.f32.partialorder %v410_v16, 0.0  ;;  %v716_v24 = vmul.f32 0.2, %v410_v16  ;;  %vm684_vm13 = vcmp.ge.f32.partialorder %v538_v17, 0.0 }
  0xec   :  { %v748_v25 = vmul.f32 0.2, %v538_v17  ;;  %v782_v26 = vsel %vm654_vm10, %v418_v12, %v718_v22  ;;  %vm655_vm14 = vcmp.ge.f32.partialorder %v421_v18, 0.0  ;;  %v719_v28 = vmul.f32 0.2, %v421_v18 }
  0xed   :  { %v814_v27 = vsel %vm686_vm11, %v546_v13, %v750_v23  ;;  %v780_v29 = vsel %vm652_vm12, %v410_v16, %v716_v24  ;;  %vm687_vm15 = vcmp.ge.f32.partialorder %v549_v19, 0.0  ;;  %v751_v31 = vmul.f32 0.2, %v549_v19  ;;  %v1598_v32 = vpop.f32.mrb[8].mxu0  ;;  %v1630_v33 = vpop.f32.mrb[8].mxu1 }
  0xee   :  { %v812_v30 = vsel %vm684_vm13, %v538_v17, %v748_v25  ;;  %v783_v34 = vsel %vm655_vm14, %v421_v18, %v719_v28  ;;  %v413_v36 = vadd.f32 %v1849_v35, %v412_v20  ;;  %v541_v37 = vadd.f32 %v1849_v35, %v540_v21  ;;  %v425_v39 = vpop.f32.mrb[9].mxu0  ;;  %v553_v40 = vpop.f32.mrb[9].mxu1 }
  0xef   :  { %v434_v38 = vadd.f32 %v1598_v32, %v1849_v35  ;;  %v1377_v41 = vpack.c.bf16 %v783_v34, %v782_v26  ;;  %v815_v42 = vsel %vm687_vm15, %v549_v19, %v751_v31  ;;  %v562_v43 = vadd.f32 %v1630_v33, %v1849_v35  ;;  %v1599_v45 = vpop.f32.mrb[10].mxu0  ;;  %v1631_v46 = vpop.f32.mrb[10].mxu1 }
  0xf0   :  { %v426_v44 = vadd.f32 %v1849_v35, %v425_v39  ;;  %v1457_v47 = vpack.c.bf16 %v815_v42, %v814_v27  ;;  %vm653_vm0 = vcmp.ge.f32.partialorder %v413_v36, 0.0  ;;  %v717_v48 = vmul.f32 0.2, %v413_v36  ;;  %v428_v49 = vpop.f32.mrb[11].mxu0  ;;  %v556_v50 = vpop.f32.mrb[11].mxu1 }
  0xf1   :  { %vm685_vm1 = vcmp.ge.f32.partialorder %v541_v37, 0.0  ;;  %1521 = vst [vmem:[%s2023_s3 + $0x18] sm:$0xff] %v1377_v41   ;;  %v749_v51 = vmul.f32 0.2, %v541_v37  ;;  %vm658_vm2 = vcmp.ge.f32.partialorder %v434_v38, 0.0  ;;  %vm690_vm3 = vcmp.ge.f32.partialorder %v562_v43, 0.0 }
  0xf2   :  { %v722_v52 = vmul.f32 0.2, %v434_v38  ;;  %1537 = vst [vmem:[%s2023_s3 + $0x98] sm:$0xff] %v1457_v47   ;;  %v781_v53 = vsel %vm653_vm0, %v413_v36, %v717_v48  ;;  %v754_v54 = vmul.f32 0.2, %v562_v43  ;;  %vm656_vm4 = vcmp.ge.f32.partialorder %v426_v44, 0.0 }
  0xf3   :  { %v720_v55 = vmul.f32 0.2, %v426_v44  ;;  %v1372_v56 = vpack.c.bf16 %v781_v53, %v780_v29  ;;  %v813_v57 = vsel %vm685_vm1, %v541_v37, %v749_v51  ;;  %v554_v59 = vadd.f32 %v1849_v35, %v553_v40 }
  0xf4   :  { %v786_v58 = vsel %vm658_vm2, %v434_v38, %v722_v52  ;;  %v1452_v60 = vpack.c.bf16 %v813_v57, %v812_v30  ;;  %v818_v61 = vsel %vm690_vm3, %v562_v43, %v754_v54  ;;  %v437_v63 = vadd.f32 %v1599_v45, %v1849_v35 }
  0xf5   :  { %v784_v62 = vsel %vm656_vm4, %v426_v44, %v720_v55  ;;  %1520 = vst [vmem:[%s2023_s3 + $0x10] sm:$0xff] %v1372_v56   ;;  %vm688_vm5 = vcmp.ge.f32.partialorder %v554_v59, 0.0  ;;  %v752_v0 = vmul.f32 0.2, %v554_v59  ;;  %v565_v1 = vadd.f32 %v1631_v46, %v1849_v35  ;;  %v1602_v3 = vpop.f32.mrb[12].mxu0  ;;  %v1634_v4 = vpop.f32.mrb[12].mxu1 }
  0xf6   :  { %v429_v2 = vadd.f32 %v1849_v35, %v428_v49  ;;  %1536 = vst [vmem:[%s2023_s3 + $0x90] sm:$0xff] %v1452_v60   ;;  %vm659_vm6 = vcmp.ge.f32.partialorder %v437_v63, 0.0  ;;  %v723_v5 = vmul.f32 0.2, %v437_v63  ;;  %v557_v6 = vadd.f32 %v1849_v35, %v556_v50  ;;  %v441_v8 = vpop.f32.mrb[13].mxu0  ;;  %v569_v9 = vpop.f32.mrb[13].mxu1 }
  0xf7   :  { %v450_v7 = vadd.f32 %v1602_v3, %v1849_v35  ;;  %v816_v10 = vsel %vm688_vm5, %v554_v59, %v752_v0  ;;  %vm691_vm7 = vcmp.ge.f32.partialorder %v565_v1, 0.0  ;;  %v755_v11 = vmul.f32 0.2, %v565_v1  ;;  %v1603_v12 = vpop.f32.mrb[14].mxu0  ;;  %v1635_v13 = vpop.f32.mrb[14].mxu1 }
  0xf8   :  { %vm657_vm8 = vcmp.ge.f32.partialorder %v429_v2, 0.0  ;;  %v787_v14 = vsel %vm659_vm6, %v437_v63, %v723_v5  ;;  %v721_v15 = vmul.f32 0.2, %v429_v2  ;;  %vm689_vm9 = vcmp.ge.f32.partialorder %v557_v6, 0.0  ;;  %v444_v17 = vpop.f32.mrb[15].mxu0  ;;  %v572_v21 = vpop.f32.mrb[15].mxu1 }
  0xf9   :  { %v753_v16 = vmul.f32 0.2, %v557_v6  ;;  %v1387_v18 = vpack.c.bf16 %v787_v14, %v786_v58  ;;  %v819_v19 = vsel %vm691_vm7, %v565_v1, %v755_v11  ;;  %vm662_vm10 = vcmp.ge.f32.partialorder %v450_v7, 0.0 }
  0xfa   :  { %v726_v20 = vmul.f32 0.2, %v450_v7  ;;  %v1467_v22 = vpack.c.bf16 %v819_v19, %v818_v61  ;;  %v785_v23 = vsel %vm657_vm8, %v429_v2, %v721_v15  ;;  %v578_v25 = vadd.f32 %v1634_v4, %v1849_v35 }
  0xfb   :  { %v817_v24 = vsel %vm689_vm9, %v557_v6, %v753_v16  ;;  %1523 = vst [vmem:[%s2023_s3 + $0x28] sm:$0xff] %v1387_v18   ;;  %v1382_v26 = vpack.c.bf16 %v785_v23, %v784_v62  ;;  %v442_v29 = vadd.f32 %v1849_v35, %v441_v8  ;;  %v570_v31 = vadd.f32 %v1849_v35, %v569_v9 }
  0xfc   :  { %v1462_v27 = vpack.c.bf16 %v817_v24, %v816_v10  ;;  %v790_v28 = vsel %vm662_vm10, %v450_v7, %v726_v20  ;;  %1539 = vst [vmem:[%s2023_s3 + $0xa8] sm:$0xff] %v1467_v22   ;;  %vm694_vm11 = vcmp.ge.f32.partialorder %v578_v25, 0.0  ;;  %v758_v30 = vmul.f32 0.2, %v578_v25 }
  0xfd   :  { %v453_v32 = vadd.f32 %v1603_v12, %v1849_v35  ;;  %1522 = vst [vmem:[%s2023_s3 + $0x20] sm:$0xff] %v1382_v26   ;;  %vm660_vm12 = vcmp.ge.f32.partialorder %v442_v29, 0.0  ;;  %v724_v33 = vmul.f32 0.2, %v442_v29  ;;  %v581_v34 = vadd.f32 %v1635_v13, %v1849_v35  ;;  %v1606_v37 = vpop.f32.mrb[16].mxu0  ;;  %v1638_v38 = vpop.f32.mrb[16].mxu1 }
  0xfe   :  { %1538 = vst [vmem:[%s2023_s3 + $0xa0] sm:$0xff] %v1462_v27   ;;  %v445_v36 = vadd.f32 %v1849_v35, %v444_v17  ;;  %v822_v39 = vsel %vm694_vm11, %v578_v25, %v758_v30  ;;  %vm692_vm13 = vcmp.ge.f32.partialorder %v570_v31, 0.0  ;;  %v756_v40 = vmul.f32 0.2, %v570_v31  ;;  %v457_v41 = vpop.f32.mrb[17].mxu0  ;;  %v585_v42 = vpop.f32.mrb[17].mxu1 }
  0xff   :  { %vm663_vm14 = vcmp.ge.f32.partialorder %v453_v32, 0.0  ;;  %v788_v43 = vsel %vm660_vm12, %v442_v29, %v724_v33  ;;  %v727_v44 = vmul.f32 0.2, %v453_v32  ;;  %vm695_vm15 = vcmp.ge.f32.partialorder %v581_v34, 0.0  ;;  %v1607_v46 = vpop.f32.mrb[18].mxu0  ;;  %v1639_v50 = vpop.f32.mrb[18].mxu1 }
 0x100   :  { %v759_v45 = vmul.f32 0.2, %v581_v34  ;;  %v820_v47 = vsel %vm692_vm13, %v570_v31, %v756_v40  ;;  %vm661_vm0 = vcmp.ge.f32.partialorder %v445_v36, 0.0  ;;  %v725_v48 = vmul.f32 0.2, %v445_v36  ;;  %v460_v51 = vpop.f32.mrb[19].mxu0 }
 0x101   :  { %v573_v49 = vadd.f32 %v1849_v35, %v572_v21  ;;  %v791_v52 = vsel %vm663_vm14, %v453_v32, %v727_v44  ;;  %v466_v54 = vadd.f32 %v1606_v37, %v1849_v35  ;;  %v594_v55 = vadd.f32 %v1638_v38, %v1849_v35  ;;  %v588_v56 = vpop.f32.mrb[19].mxu1 }
 0x102   :  { %v823_v53 = vsel %vm695_vm15, %v581_v34, %v759_v45  ;;  %v1397_v57 = vpack.c.bf16 %v791_v52, %v790_v28  ;;  %v789_v59 = vsel %vm661_vm0, %v445_v36, %v725_v48  ;;  %v458_v0 = vadd.f32 %v1849_v35, %v457_v41 }
 0x103   :  { %v1477_v58 = vpack.c.bf16 %v823_v53, %v822_v39  ;;  %vm693_vm1 = vcmp.ge.f32.partialorder %v573_v49, 0.0  ;;  %v1392_v60 = vpack.c.bf16 %v789_v59, %v788_v43  ;;  %v757_v61 = vmul.f32 0.2, %v573_v49 }
 0x104   :  { %vm666_vm2 = vcmp.ge.f32.partialorder %v466_v54, 0.0  ;;  %v730_v62 = vmul.f32 0.2, %v466_v54  ;;  %1525 = vst [vmem:[%s2023_s3 + $0x38] sm:$0xff] %v1397_v57   ;;  %vm698_vm3 = vcmp.ge.f32.partialorder %v594_v55, 0.0  ;;  %v586_v1 = vadd.f32 %v1849_v35, %v585_v42 }
 0x105   :  { %1541 = vst [vmem:[%s2023_s3 + $0xb8] sm:$0xff] %v1477_v58   ;;  %v762_v63 = vmul.f32 0.2, %v594_v55  ;;  %1524 = vst [vmem:[%s2023_s3 + $0x30] sm:$0xff] %v1392_v60   ;;  %v821_v2 = vsel %vm693_vm1, %v573_v49, %v757_v61  ;;  %v469_v4 = vadd.f32 %v1607_v46, %v1849_v35  ;;  %v597_v5 = vadd.f32 %v1639_v50, %v1849_v35  ;;  %v1610_v6 = vpop.f32.mrb[20].mxu0  ;;  %v1642_v7 = vpop.f32.mrb[20].mxu1 }
 0x106   :  { %v794_v3 = vsel %vm666_vm2, %v466_v54, %v730_v62  ;;  %v1472_v8 = vpack.c.bf16 %v821_v2, %v820_v47  ;;  %vm664_vm4 = vcmp.ge.f32.partialorder %v458_v0, 0.0  ;;  %v728_v10 = vmul.f32 0.2, %v458_v0  ;;  %v473_v11 = vpop.f32.mrb[21].mxu0  ;;  %v601_v12 = vpop.f32.mrb[21].mxu1 }
 0x107   :  { %v826_v9 = vsel %vm698_vm3, %v594_v55, %v762_v63  ;;  %vm696_vm5 = vcmp.ge.f32.partialorder %v586_v1, 0.0  ;;  %v760_v13 = vmul.f32 0.2, %v586_v1  ;;  %vm667_vm6 = vcmp.ge.f32.partialorder %v469_v4, 0.0  ;;  %v1611_v18 = vpop.f32.mrb[22].mxu0  ;;  %v1643_v19 = vpop.f32.mrb[22].mxu1 }
 0x108   :  { %v731_v14 = vmul.f32 0.2, %v469_v4  ;;  %1540 = vst [vmem:[%s2023_s3 + $0xb0] sm:$0xff] %v1472_v8   ;;  %v792_v15 = vsel %vm664_vm4, %v458_v0, %v728_v10  ;;  %vm699_vm7 = vcmp.ge.f32.partialorder %v597_v5, 0.0  ;;  %v763_v16 = vmul.f32 0.2, %v597_v5 }
 0x109   :  { %v461_v17 = vadd.f32 %v1849_v35, %v460_v51  ;;  %v824_v20 = vsel %vm696_vm5, %v586_v1, %v760_v13  ;;  %v589_v22 = vadd.f32 %v1849_v35, %v588_v56  ;;  %v482_v23 = vadd.f32 %v1610_v6, %v1849_v35  ;;  %v476_v24 = vpop.f32.mrb[23].mxu0  ;;  %v604_v25 = vpop.f32.mrb[23].mxu1 }
 0x10a   :  { %v795_v21 = vsel %vm667_vm6, %v469_v4, %v731_v14  ;;  %v827_v27 = vsel %vm699_vm7, %v597_v5, %v763_v16  ;;  %v610_v33 = vadd.f32 %v1642_v7, %v1849_v35  ;;  %v474_v34 = vadd.f32 %v1849_v35, %v473_v11 }
 0x10b   :  { %v1407_v26 = vpack.c.bf16 %v795_v21, %v794_v3  ;;  %vm665_vm8 = vcmp.ge.f32.partialorder %v461_v17, 0.0  ;;  %v729_v28 = vmul.f32 0.2, %v461_v17  ;;  %v1487_v29 = vpack.c.bf16 %v827_v27, %v826_v9 }
 0x10c   :  { %vm697_vm9 = vcmp.ge.f32.partialorder %v589_v22, 0.0  ;;  %v761_v30 = vmul.f32 0.2, %v589_v22  ;;  %vm670_vm10 = vcmp.ge.f32.partialorder %v482_v23, 0.0  ;;  %v734_v32 = vmul.f32 0.2, %v482_v23 }
 0x10d   :  { %1527 = vst [vmem:[%s2023_s3 + $0x48] sm:$0xff] %v1407_v26   ;;  %v793_v31 = vsel %vm665_vm8, %v461_v17, %v729_v28  ;;  %1543 = vst [vmem:[%s2023_s3 + $0xc8] sm:$0xff] %v1487_v29   ;;  %v602_v38 = vadd.f32 %v1849_v35, %v601_v12  ;;  %v485_v39 = vadd.f32 %v1611_v18, %v1849_v35  ;;  %v1614_v40 = vpop.f32.mrb[24].mxu0  ;;  %v1646_v41 = vpop.f32.mrb[24].mxu1  ;;  %vm702_vm11 = vcmp.ge.f32.partialorder %v610_v33, 0.0 }
 0x10e   :  { %v1402_v36 = vpack.c.bf16 %v793_v31, %v792_v15  ;;  %v825_v37 = vsel %vm697_vm9, %v589_v22, %v761_v30  ;;  %v766_v43 = vmul.f32 0.2, %v610_v33  ;;  %v489_v44 = vpop.f32.mrb[25].mxu0  ;;  %v617_v45 = vpop.f32.mrb[25].mxu1  ;;  %v798_v46 = vsel %vm670_vm10, %v482_v23, %v734_v32 }
 0x10f   :  { %v1482_v42 = vpack.c.bf16 %v825_v37, %v824_v20  ;;  %vm668_vm12 = vcmp.ge.f32.partialorder %v474_v34, 0.0  ;;  %v732_v47 = vmul.f32 0.2, %v474_v34  ;;  %v764_v48 = vmul.f32 0.2, %v602_v38  ;;  %v1615_v51 = vpop.f32.mrb[26].mxu0 }
 0x110   :  { %1526 = vst [vmem:[%s2023_s3 + $0x40] sm:$0xff] %v1402_v36   ;;  %vm700_vm13 = vcmp.ge.f32.partialorder %v602_v38, 0.0  ;;  %vm671_vm14 = vcmp.ge.f32.partialorder %v485_v39, 0.0  ;;  %v735_v49 = vmul.f32 0.2, %v485_v39  ;;  %v613_v50 = vadd.f32 %v1643_v19, %v1849_v35  ;;  %v1647_v52 = vpop.f32.mrb[26].mxu1 }
 0x111   :  { %1542 = vst [vmem:[%s2023_s3 + $0xc0] sm:$0xff] %v1482_v42   ;;  %v830_v53 = vsel %vm702_vm11, %v610_v33, %v766_v43  ;;  %v796_v54 = vsel %vm668_vm12, %v474_v34, %v732_v47  ;;  %v477_v55 = vadd.f32 %v1849_v35, %v476_v24  ;;  %v605_v56 = vadd.f32 %v1849_v35, %v604_v25  ;;  %v492_v57 = vpop.f32.mrb[27].mxu0  ;;  %v620_v58 = vpop.f32.mrb[27].mxu1 }
 0x112   :  { %v799_v59 = vsel %vm671_vm14, %v485_v39, %v735_v49  ;;  %vm703_vm15 = vcmp.ge.f32.partialorder %v613_v50, 0.0  ;;  %v767_v60 = vmul.f32 0.2, %v613_v50  ;;  %v498_v61 = vadd.f32 %v1614_v40, %v1849_v35 }
 0x113   :  { %v1417_v62 = vpack.c.bf16 %v799_v59, %v798_v46  ;;  %vm669_vm0 = vcmp.ge.f32.partialorder %v477_v55, 0.0  ;;  %v733_v63 = vmul.f32 0.2, %v477_v55  ;;  %vm701_vm1 = vcmp.ge.f32.partialorder %v605_v56, 0.0 }
 0x114   :  { %v831_v0 = vsel %vm703_vm15, %v613_v50, %v767_v60  ;;  %v765_v1 = vmul.f32 0.2, %v605_v56  ;;  %vm674_vm2 = vcmp.ge.f32.partialorder %v498_v61, 0.0  ;;  %v738_v2 = vmul.f32 0.2, %v498_v61 }
 0x115   :  { %1529 = vst [vmem:[%s2023_s3 + $0x58] sm:$0xff] %v1417_v62   ;;  %v1497_v3 = vpack.c.bf16 %v831_v0, %v830_v53  ;;  %v797_v4 = vsel %vm669_vm0, %v477_v55, %v733_v63  ;;  %v626_v5 = vadd.f32 %v1646_v41, %v1849_v35  ;;  %v490_v6 = vadd.f32 %v1849_v35, %v489_v44  ;;  %v1618_v7 = vpop.f32.mrb[28].mxu0  ;;  %v1650_v8 = vpop.f32.mrb[28].mxu1 }
 0x116   :  { %v828_v9 = vsel %vm700_vm13, %v602_v38, %v764_v48  ;;  %v1412_v10 = vpack.c.bf16 %v797_v4, %v796_v54  ;;  %v829_v11 = vsel %vm701_vm1, %v605_v56, %v765_v1  ;;  %v618_v12 = vadd.f32 %v1849_v35, %v617_v45  ;;  %v505_v13 = vpop.f32.mrb[29].mxu0  ;;  %v633_v14 = vpop.f32.mrb[29].mxu1 }
 0x117   :  { %1545 = vst [vmem:[%s2023_s3 + $0xd8] sm:$0xff] %v1497_v3   ;;  %v1492_v15 = vpack.c.bf16 %v829_v11, %v828_v9  ;;  %vm706_vm3 = vcmp.ge.f32.partialorder %v626_v5, 0.0  ;;  %v770_v16 = vmul.f32 0.2, %v626_v5  ;;  %vm672_vm4 = vcmp.ge.f32.partialorder %v490_v6, 0.0  ;;  %v1619_v17 = vpop.f32.mrb[30].mxu0 }
 0x118   :  { %v1651_v18 = vpop.f32.mrb[30].mxu1  ;;  %1528 = vst [vmem:[%s2023_s3 + $0x50] sm:$0xff] %v1412_v10   ;;  %v802_v19 = vsel %vm674_vm2, %v498_v61, %v738_v2  ;;  %v736_v20 = vmul.f32 0.2, %v490_v6  ;;  %vm704_vm5 = vcmp.ge.f32.partialorder %v618_v12, 0.0  ;;  %v501_v21 = vadd.f32 %v1615_v51, %v1849_v35  ;;  %v508_v22 = vpop.f32.mrb[31].mxu0 }
 0x119   :  { %1544 = vst [vmem:[%s2023_s3 + $0xd0] sm:$0xff] %v1492_v15   ;;  %v768_v23 = vmul.f32 0.2, %v618_v12  ;;  %v629_v24 = vadd.f32 %v1647_v52, %v1849_v35  ;;  %v493_v25 = vadd.f32 %v1849_v35, %v492_v57  ;;  %v621_v26 = vadd.f32 %v1849_v35, %v620_v58  ;;  %v636_v27 = vpop.f32.mrb[31].mxu1 }
 0x11a   :  { %v834_v28 = vsel %vm706_vm3, %v626_v5, %v770_v16  ;;  %v800_v29 = vsel %vm672_vm4, %v490_v6, %v736_v20  ;;  %vm675_vm6 = vcmp.ge.f32.partialorder %v501_v21, 0.0  ;;  %v739_v30 = vmul.f32 0.2, %v501_v21 }
 0x11b   :  { %vm707_vm7 = vcmp.ge.f32.partialorder %v629_v24, 0.0  ;;  %v771_v31 = vmul.f32 0.2, %v629_v24  ;;  %vm673_vm8 = vcmp.ge.f32.partialorder %v493_v25, 0.0  ;;  %v737_v32 = vmul.f32 0.2, %v493_v25 }
 0x11c   :  { %v803_v33 = vsel %vm675_vm6, %v501_v21, %v739_v30  ;;  %vm705_vm9 = vcmp.ge.f32.partialorder %v621_v26, 0.0  ;;  %v769_v34 = vmul.f32 0.2, %v621_v26  ;;  %v514_v36 = vadd.f32 %v1618_v7, %v1849_v35 }
 0x11d   :  { %v1427_v37 = vpack.c.bf16 %v803_v33, %v802_v19  ;;  %v835_v38 = vsel %vm707_vm7, %v629_v24, %v771_v31  ;;  %v801_v39 = vsel %vm673_vm8, %v493_v25, %v737_v32  ;;  %v642_v40 = vadd.f32 %v1650_v8, %v1849_v35 }
 0x11e   :  { %v832_v41 = vsel %vm704_vm5, %v618_v12, %v768_v23  ;;  %v1507_v42 = vpack.c.bf16 %v835_v38, %v834_v28  ;;  %v1422_v43 = vpack.c.bf16 %v801_v39, %v800_v29  ;;  %v833_v44 = vsel %vm705_vm9, %v621_v26, %v769_v34 }
 0x11f   :  { %1531 = vst [vmem:[%s2023_s3 + $0x68] sm:$0xff] %v1427_v37   ;;  %v1502_v45 = vpack.c.bf16 %v833_v44, %v832_v41  ;;  %vm678_vm10 = vcmp.ge.f32.partialorder %v514_v36, 0.0  ;;  %v742_v46 = vmul.f32 0.2, %v514_v36  ;;  %v774_v47 = vmul.f32 0.2, %v642_v40 }
 0x120   :  { %1547 = vst [vmem:[%s2023_s3 + $0xe8] sm:$0xff] %v1507_v42   ;;  %1530 = vst [vmem:[%s2023_s3 + $0x60] sm:$0xff] %v1422_v43   ;;  %v506_v48 = vadd.f32 %v1849_v35, %v505_v13  ;;  %v634_v49 = vadd.f32 %v1849_v35, %v633_v14  ;;  %v517_v50 = vadd.f32 %v1619_v17, %v1849_v35  ;;  %vm710_vm11 = vcmp.ge.f32.partialorder %v642_v40, 0.0 }
 0x121   :  { %v645_v51 = vadd.f32 %v1651_v18, %v1849_v35  ;;  %1546 = vst [vmem:[%s2023_s3 + $0xe0] sm:$0xff] %v1502_v45   ;;  %v509_v52 = vadd.f32 %v1849_v35, %v508_v22  ;;  %v637_v53 = vadd.f32 %v1849_v35, %v636_v27  ;;  %v806_v54 = vsel %vm678_vm10, %v514_v36, %v742_v46 }
 0x122   :  { %vm676_vm12 = vcmp.ge.f32.partialorder %v506_v48, 0.0  ;;  %v740_v55 = vmul.f32 0.2, %v506_v48  ;;  %v772_v56 = vmul.f32 0.2, %v634_v49  ;;  %vm679_vm13 = vcmp.ge.f32.partialorder %v517_v50, 0.0 }
 0x123   :  { %v743_v57 = vmul.f32 0.2, %v517_v50  ;;  %vm711_vm14 = vcmp.ge.f32.partialorder %v645_v51, 0.0  ;;  %v775_v58 = vmul.f32 0.2, %v645_v51  ;;  %v838_v59 = vsel %vm710_vm11, %v642_v40, %v774_v47 }
 0x124   :  { %vm708_vm15 = vcmp.ge.f32.partialorder %v634_v49, 0.0  ;;  %vm677_vm0 = vcmp.ge.f32.partialorder %v509_v52, 0.0  ;;  %v741_v60 = vmul.f32 0.2, %v509_v52  ;;  %vm709_vm1 = vcmp.ge.f32.partialorder %v637_v53, 0.0 }
 0x125   :  { %v807_v61 = vsel %vm679_vm13, %v517_v50, %v743_v57  ;;  %v839_v62 = vsel %vm711_vm14, %v645_v51, %v775_v58  ;;  %v773_v63 = vmul.f32 0.2, %v637_v53  ;;  %v804_v0 = vsel %vm676_vm12, %v506_v48, %v740_v55 }
 0x126   :  { %v1437_v1 = vpack.c.bf16 %v807_v61, %v806_v54  ;;  %v1517_v2 = vpack.c.bf16 %v839_v62, %v838_v59  ;;  %v805_v35 = vsel %vm677_vm0, %v509_v52, %v741_v60  ;;  %v836_v3 = vsel %vm708_vm15, %v634_v49, %v772_v56 }
 0x127   :  { %v1432_v4 = vpack.c.bf16 %v805_v35, %v804_v0  ;;  %v837_v5 = vsel %vm709_vm1, %v637_v53, %v773_v63 }
 0x128   :  { %1533 = vst [vmem:[%s2023_s3 + $0x78] sm:$0xff] %v1437_v1   ;;  %1549 = vst [vmem:[%s2023_s3 + $0xf8] sm:$0xff] %v1517_v2   ;;  %v1512_v6 = vpack.c.bf16 %v837_v5, %v836_v3 }
 0x129   :  { %1532 = vst [vmem:[%s2023_s3 + $0x70] sm:$0xff] %v1432_v4  }
 0x12a   :  { %1548 = vst [vmem:[%s2023_s3 + $0xf0] sm:$0xff] %v1512_v6  }

// kernel: unet_forward.12
= control target key start
LH: loop header
LB: loop body
LE: loop exit
PB: predicated region body
PF: predicated region fallthrough
CT: control target
= control target key end

     0   :  { %v601_v0 = vmov 0   ;;  %vm182_vm0 = vcmask 130048   ;;  %s750_s1 = inlined_call_operand.vmem [shape: bf16[144,128], index: 1, kind: input, shape index: {}]   ;;  %s751_s0 = inlined_call_operand.vmem [shape: bf16[128,144], index: 0, kind: input, shape index: {}]   ;;  %s752_s2 = inlined_call_operand.vmem [shape: f32[1,128], index: 2, kind: input, shape index: {}]   ;;  %s753_s3 = inlined_call_operand.vmem [shape: bf16[128,128], index: 3, kind: output, shape index: {}]  }
   0x1   :  { %207 = vmatprep.subr.bf16.mxu0 %v601_v0  ;;  %549 = vmatprep.subr.bf16.mxu1 %v601_v0  ;;  %v568_v1 = vld [vmem:[%s750_s1] sm:$0xff]   ;;  %v569_v2 = vld [vmem:[%s750_s1 + $0x8] sm:$0xff]   ;;  %v570_v3 = vld [vmem:[%s750_s1 + $0x10] sm:$0xff]  }
   0x2   :  { %208 = vmatpush1.bf16.msra.mxu0 %v568_v1  ;;  %558 = vmatpush1.bf16.msra.mxu1 %v568_v1  ;;  %v571_v4 = vld [vmem:[%s750_s1 + $0x18] sm:$0xff]   ;;  %v579_v5 = vld [vmem:[%s751_s0 + $0x4] ss:$8 sps:$4 sm:$0xff]   ;;  %v574_v9 = vld [vmem:[%s750_s1 + $0x30] sm:$0xff]  }
   0x3   :  { %209 = vmatprep.subr.bf16.mxu0 %v601_v0  ;;  %550 = vmatprep.subr.bf16.mxu1 %v601_v0  ;;  %v582_v6 = vld [vmem:[%s751_s0 + $0x44] ss:$8 sps:$4 sm:$0xff]   ;;  %v575_v10 = vld [vmem:[%s750_s1 + $0x38] sm:$0xff]   ;;  %v577_v12 = vld [vmem:[%s751_s0] ss:$8 sps:$4 sm:$0xff]  }
   0x4   :  { %462 = vmatprep.mubr.msk.bf16.mxu0 %vm182_vm0, %v579_v5  ;;  %466 = vmatprep.mubr.msk.bf16.mxu1 %vm182_vm0, %v582_v6  ;;  %v572_v7 = vld [vmem:[%s750_s1 + $0x20] sm:$0xff]   ;;  %v573_v8 = vld [vmem:[%s750_s1 + $0x28] sm:$0xff]   ;;  %v583_v14 = vld [vmem:[%s751_s0 + $0x14] ss:$8 sps:$4 sm:$0xff]  }
   0x5   :  { %v576_v11 = vld [vmem:[%s750_s1 + $0x40] sm:$0xff]   ;;  %v585_v15 = vld [vmem:[%s751_s0 + $0x54] ss:$8 sps:$4 sm:$0xff]   ;;  %v587_v16 = vld [vmem:[%s751_s0 + $0x10] ss:$8 sps:$4 sm:$0xff]  }
   0x6   :  { %210 = vmatpush1.bf16.msra.mxu0 %v569_v2  ;;  %559 = vmatpush1.bf16.msra.mxu1 %v569_v2  ;;  %v580_v13 = vld [vmem:[%s751_s0 + $0x40] ss:$8 sps:$4 sm:$0xff]   ;;  %v588_v17 = vld [vmem:[%s751_s0 + $0x50] ss:$8 sps:$4 sm:$0xff]   ;;  %v589_v18 = vld [vmem:[%s751_s0 + $0x24] ss:$8 sps:$4 sm:$0xff]  }
   0x7   :  { %211 = vmatprep.subr.bf16.mxu0 %v601_v0  ;;  %551 = vmatprep.subr.bf16.mxu1 %v601_v0  ;;  %v591_v19 = vld [vmem:[%s751_s0 + $0x64] ss:$8 sps:$4 sm:$0xff]   ;;  %v593_v20 = vld [vmem:[%s751_s0 + $0x20] ss:$8 sps:$4 sm:$0xff]   ;;  %v595_v22 = vld [vmem:[%s751_s0 + $0x34] ss:$8 sps:$4 sm:$0xff]  }
   0x8   :  { %v594_v21 = vld [vmem:[%s751_s0 + $0x60] ss:$8 sps:$4 sm:$0xff]   ;;  %v597_v23 = vld [vmem:[%s751_s0 + $0x74] ss:$8 sps:$4 sm:$0xff]   ;;  %v599_v24 = vld [vmem:[%s751_s0 + $0x30] ss:$8 sps:$4 sm:$0xff]  }
   0x9   :  { %v600_v25 = vld [vmem:[%s751_s0 + $0x70] ss:$8 sps:$4 sm:$0xff]   ;;  %v708_v26 = vld [vmem:[%s752_s2] ss:$0 sm:$0xff] }
   0xa   :  { %212 = vmatpush1.bf16.msra.mxu0 %v570_v3  ;;  %560 = vmatpush1.bf16.msra.mxu1 %v570_v3 }
   0xb   :  { %213 = vmatprep.subr.bf16.mxu0 %v601_v0  ;;  %552 = vmatprep.subr.bf16.mxu1 %v601_v0 }
   0xe   :  { %214 = vmatpush1.bf16.msra.mxu0 %v571_v4  ;;  %561 = vmatpush1.bf16.msra.mxu1 %v571_v4 }
   0xf   :  { %215 = vmatprep.subr.bf16.mxu0 %v601_v0  ;;  %553 = vmatprep.subr.bf16.mxu1 %v601_v0 }
  0x12   :  { %216 = vmatpush1.bf16.msra.mxu0 %v572_v7  ;;  %562 = vmatpush1.bf16.msra.mxu1 %v572_v7 }
  0x13   :  { %217 = vmatprep.subr.bf16.mxu0 %v601_v0  ;;  %554 = vmatprep.subr.bf16.mxu1 %v601_v0 }
  0x16   :  { %218 = vmatpush1.bf16.msra.mxu0 %v573_v8  ;;  %563 = vmatpush1.bf16.msra.mxu1 %v573_v8 }
  0x17   :  { %219 = vmatprep.subr.bf16.mxu0 %v601_v0  ;;  %555 = vmatprep.subr.bf16.mxu1 %v601_v0 }
  0x1a   :  { %220 = vmatpush1.bf16.msra.mxu0 %v574_v9  ;;  %564 = vmatpush1.bf16.msra.mxu1 %v574_v9 }
  0x1b   :  { %221 = vmatprep.subr.bf16.mxu0 %v601_v0  ;;  %556 = vmatprep.subr.bf16.mxu1 %v601_v0 }
  0x1e   :  { %222 = vmatpush1.bf16.msra.mxu0 %v575_v10  ;;  %565 = vmatpush1.bf16.msra.mxu1 %v575_v10 }
  0x1f   :  { %223 = vmatprep.subr.bf16.mxu0 %v601_v0  ;;  %557 = vmatprep.subr.bf16.mxu1 %v601_v0 }
  0x22   :  { %224 = vmatpush1.bf16.msra.mxu0 %v576_v11  ;;  %566 = vmatpush1.bf16.msra.mxu1 %v576_v11 }
  0x25   :  { %240 = vmatmul.mubr.bf16.vlgmr.msra.gmra.mrb[0].mxu0 %v577_v12  ;;  %272 = vmatmul.mubr.bf16.vlgmr.msra.gmra.mrb[0].mxu1 %v580_v13 }
  0x26   :  { %463 = vmatprep.mubr.msk.bf16.mxu0 %vm182_vm0, %v583_v14  ;;  %467 = vmatprep.mubr.msk.bf16.mxu1 %vm182_vm0, %v585_v15 }
  0x2d   :  { %248 = vmatmul.mubr.bf16.gmra.mrb[4].mxu0 %v587_v16  ;;  %280 = vmatmul.mubr.bf16.gmra.mrb[4].mxu1 %v588_v17 }
  0x2e   :  { %464 = vmatprep.mubr.msk.bf16.mxu0 %vm182_vm0, %v589_v18  ;;  %468 = vmatprep.mubr.msk.bf16.mxu1 %vm182_vm0, %v591_v19 }
  0x35   :  { %256 = vmatmul.mubr.bf16.gmra.mrb[8].mxu0 %v593_v20  ;;  %288 = vmatmul.mubr.bf16.gmra.mrb[8].mxu1 %v594_v21 }
  0x36   :  { %465 = vmatprep.mubr.msk.bf16.mxu0 %vm182_vm0, %v595_v22  ;;  %469 = vmatprep.mubr.msk.bf16.mxu1 %vm182_vm0, %v597_v23 }
  0x3d   :  { %264 = vmatmul.mubr.bf16.gmra.mrb[12].mxu0 %v599_v24  ;;  %296 = vmatmul.mubr.bf16.gmra.mrb[12].mxu1 %v600_v25 }
  0xf8   :  { %v241_v27 = vpop.f32.mrb[0].mxu0  ;;  %v273_v28 = vpop.f32.mrb[0].mxu1 }
  0xf9   :  { %v242_v29 = vadd.f32 %v708_v26, %v241_v27  ;;  %v274_v30 = vadd.f32 %v708_v26, %v273_v28  ;;  %v243_v31 = vpop.f32.mrb[1].mxu0  ;;  %v275_v32 = vpop.f32.mrb[1].mxu1 }
  0xfa   :  { %v244_v33 = vpop.f32.mrb[2].mxu0  ;;  %v276_v34 = vpop.f32.mrb[2].mxu1 }
  0xfb   :  { %v320_v35 = vmul.f32 0.2, %v242_v29  ;;  %v328_v36 = vmul.f32 0.2, %v274_v30  ;;  %v245_v37 = vadd.f32 %v708_v26, %v244_v33  ;;  %v277_v38 = vadd.f32 %v708_v26, %v276_v34  ;;  %v246_v39 = vpop.f32.mrb[3].mxu0  ;;  %v278_v40 = vpop.f32.mrb[3].mxu1 }
  0xfc   :  { %vm304_vm1 = vcmp.ge.f32.partialorder %v242_v29, 0.0  ;;  %vm312_vm2 = vcmp.ge.f32.partialorder %v274_v30, 0.0 }
  0xfd   :  { %vm305_vm3 = vcmp.ge.f32.partialorder %v245_v37, 0.0  ;;  %v321_v41 = vmul.f32 0.2, %v245_v37  ;;  %vm313_vm4 = vcmp.ge.f32.partialorder %v277_v38, 0.0  ;;  %v329_v42 = vmul.f32 0.2, %v277_v38 }
  0xfe   :  { %v336_v43 = vsel %vm304_vm1, %v242_v29, %v320_v35  ;;  %v344_v44 = vsel %vm312_vm2, %v274_v30, %v328_v36 }
  0xff   :  { %v337_v45 = vsel %vm305_vm3, %v245_v37, %v321_v41  ;;  %v345_v46 = vsel %vm313_vm4, %v277_v38, %v329_v42 }
 0x100   :  { %v249_v47 = vpop.f32.mrb[4].mxu0  ;;  %v281_v48 = vpop.f32.mrb[4].mxu1  ;;  %v505_v49 = vpack.c.bf16 %v337_v45, %v336_v43  ;;  %v525_v50 = vpack.c.bf16 %v345_v46, %v344_v44 }
 0x101   :  { %v250_v51 = vadd.f32 %v708_v26, %v249_v47  ;;  %v282_v52 = vadd.f32 %v708_v26, %v281_v48  ;;  %v251_v53 = vpop.f32.mrb[5].mxu0  ;;  %v283_v54 = vpop.f32.mrb[5].mxu1 }
 0x102   :  { %v252_v55 = vpop.f32.mrb[6].mxu0  ;;  %v284_v56 = vpop.f32.mrb[6].mxu1  ;;  %506 = vst [vmem:[%s753_s3] sm:$0xff] %v505_v49   ;;  %545 = vst [vmem:[%s753_s3 + $0x20] sm:$0xff] %v525_v50  }
 0x103   :  { %v322_v57 = vmul.f32 0.2, %v250_v51  ;;  %v330_v58 = vmul.f32 0.2, %v282_v52  ;;  %v253_v59 = vadd.f32 %v708_v26, %v252_v55  ;;  %v285_v60 = vadd.f32 %v708_v26, %v284_v56  ;;  %v254_v61 = vpop.f32.mrb[7].mxu0  ;;  %v286_v62 = vpop.f32.mrb[7].mxu1 }
 0x104   :  { %vm306_vm5 = vcmp.ge.f32.partialorder %v250_v51, 0.0  ;;  %vm314_vm6 = vcmp.ge.f32.partialorder %v282_v52, 0.0 }
 0x105   :  { %vm307_vm7 = vcmp.ge.f32.partialorder %v253_v59, 0.0  ;;  %v323_v63 = vmul.f32 0.2, %v253_v59  ;;  %vm315_vm8 = vcmp.ge.f32.partialorder %v285_v60, 0.0  ;;  %v331_v0 = vmul.f32 0.2, %v285_v60 }
 0x106   :  { %v338_v1 = vsel %vm306_vm5, %v250_v51, %v322_v57  ;;  %v346_v2 = vsel %vm314_vm6, %v282_v52, %v330_v58 }
 0x107   :  { %v339_v3 = vsel %vm307_vm7, %v253_v59, %v323_v63  ;;  %v347_v4 = vsel %vm315_vm8, %v285_v60, %v331_v0 }
 0x108   :  { %v257_v5 = vpop.f32.mrb[8].mxu0  ;;  %v289_v6 = vpop.f32.mrb[8].mxu1  ;;  %v510_v7 = vpack.c.bf16 %v339_v3, %v338_v1  ;;  %v530_v8 = vpack.c.bf16 %v347_v4, %v346_v2 }
 0x109   :  { %v258_v9 = vadd.f32 %v708_v26, %v257_v5  ;;  %v290_v10 = vadd.f32 %v708_v26, %v289_v6  ;;  %v259_v11 = vpop.f32.mrb[9].mxu0  ;;  %v291_v12 = vpop.f32.mrb[9].mxu1 }
 0x10a   :  { %v260_v13 = vpop.f32.mrb[10].mxu0  ;;  %v292_v14 = vpop.f32.mrb[10].mxu1  ;;  %542 = vst [vmem:[%s753_s3 + $0x8] sm:$0xff] %v510_v7   ;;  %546 = vst [vmem:[%s753_s3 + $0x28] sm:$0xff] %v530_v8  }
 0x10b   :  { %v324_v15 = vmul.f32 0.2, %v258_v9  ;;  %v332_v16 = vmul.f32 0.2, %v290_v10  ;;  %v261_v17 = vadd.f32 %v708_v26, %v260_v13  ;;  %v293_v18 = vadd.f32 %v708_v26, %v292_v14  ;;  %v262_v19 = vpop.f32.mrb[11].mxu0  ;;  %v294_v20 = vpop.f32.mrb[11].mxu1 }
 0x10c   :  { %vm308_vm9 = vcmp.ge.f32.partialorder %v258_v9, 0.0  ;;  %vm316_vm10 = vcmp.ge.f32.partialorder %v290_v10, 0.0 }
 0x10d   :  { %vm309_vm11 = vcmp.ge.f32.partialorder %v261_v17, 0.0  ;;  %v325_v21 = vmul.f32 0.2, %v261_v17  ;;  %vm317_vm12 = vcmp.ge.f32.partialorder %v293_v18, 0.0  ;;  %v333_v22 = vmul.f32 0.2, %v293_v18 }
 0x10e   :  { %v340_v23 = vsel %vm308_vm9, %v258_v9, %v324_v15  ;;  %v348_v24 = vsel %vm316_vm10, %v290_v10, %v332_v16 }
 0x10f   :  { %v341_v25 = vsel %vm309_vm11, %v261_v17, %v325_v21  ;;  %v349_v27 = vsel %vm317_vm12, %v293_v18, %v333_v22 }
 0x110   :  { %v265_v28 = vpop.f32.mrb[12].mxu0  ;;  %v297_v29 = vpop.f32.mrb[12].mxu1  ;;  %v515_v30 = vpack.c.bf16 %v341_v25, %v340_v23  ;;  %v535_v31 = vpack.c.bf16 %v349_v27, %v348_v24 }
 0x111   :  { %v266_v32 = vadd.f32 %v708_v26, %v265_v28  ;;  %v298_v33 = vadd.f32 %v708_v26, %v297_v29  ;;  %v267_v34 = vpop.f32.mrb[13].mxu0  ;;  %v299_v35 = vpop.f32.mrb[13].mxu1 }
 0x112   :  { %v268_v36 = vpop.f32.mrb[14].mxu0  ;;  %v300_v37 = vpop.f32.mrb[14].mxu1  ;;  %543 = vst [vmem:[%s753_s3 + $0x10] sm:$0xff] %v515_v30   ;;  %547 = vst [vmem:[%s753_s3 + $0x30] sm:$0xff] %v535_v31  }
 0x113   :  { %v326_v38 = vmul.f32 0.2, %v266_v32  ;;  %v334_v39 = vmul.f32 0.2, %v298_v33  ;;  %v269_v40 = vadd.f32 %v708_v26, %v268_v36  ;;  %v301_v41 = vadd.f32 %v708_v26, %v300_v37  ;;  %v270_v42 = vpop.f32.mrb[15].mxu0  ;;  %v302_v43 = vpop.f32.mrb[15].mxu1 }
 0x114   :  { %vm310_vm13 = vcmp.ge.f32.partialorder %v266_v32, 0.0  ;;  %vm318_vm14 = vcmp.ge.f32.partialorder %v298_v33, 0.0 }
 0x115   :  { %vm311_vm15 = vcmp.ge.f32.partialorder %v269_v40, 0.0  ;;  %v327_v44 = vmul.f32 0.2, %v269_v40  ;;  %vm319_vm0 = vcmp.ge.f32.partialorder %v301_v41, 0.0  ;;  %v335_v45 = vmul.f32 0.2, %v301_v41 }
 0x116   :  { %v342_v46 = vsel %vm310_vm13, %v266_v32, %v326_v38  ;;  %v350_v47 = vsel %vm318_vm14, %v298_v33, %v334_v39 }
 0x117   :  { %v343_v48 = vsel %vm311_vm15, %v269_v40, %v327_v44  ;;  %v351_v49 = vsel %vm319_vm0, %v301_v41, %v335_v45 }
 0x118   :  { %v520_v50 = vpack.c.bf16 %v343_v48, %v342_v46  ;;  %v540_v51 = vpack.c.bf16 %v351_v49, %v350_v47 }
 0x11a   :  { %544 = vst [vmem:[%s753_s3 + $0x18] sm:$0xff] %v520_v50   ;;  %548 = vst [vmem:[%s753_s3 + $0x38] sm:$0xff] %v540_v51  }

// kernel: unet_forward.13
= control target key start
LH: loop header
LB: loop body
LE: loop exit
PB: predicated region body
PF: predicated region fallthrough
CT: control target
= control target key end

     0   :  { %vm204_vm0 = vcmask 261120   ;;  %s558_s1 = inlined_call_operand.vmem [shape: bf16[288,128], index: 1, kind: input, shape index: {}]   ;;  %s559_s0 = inlined_call_operand.vmem [shape: bf16[32,288], index: 0, kind: input, shape index: {}]   ;;  %s560_s2 = inlined_call_operand.vmem [shape: f32[1,128], index: 2, kind: input, shape index: {}]   ;;  %s561_s3 = inlined_call_operand.vmem [shape: bf16[32,128], index: 3, kind: output, shape index: {}]  }
   0x1   :  { %v431_v0 = vld [vmem:[%s558_s1 + $0x40] sm:$0xff]   ;;  %v433_v2 = vld [vmem:[%s558_s1 + $0x48] sm:$0xff]   ;;  %v435_v4 = vld [vmem:[%s558_s1 + $0x50] sm:$0xff]  }
   0x2   :  { %v432_v1 = vld [vmem:[%s558_s1] sm:$0xff]   ;;  %391 = vmatprep.subr.bf16.mxu0 %v431_v0  ;;  %v434_v3 = vld [vmem:[%s558_s1 + $0x8] sm:$0xff]   ;;  %v436_v5 = vld [vmem:[%s558_s1 + $0x10] sm:$0xff]  }
   0x3   :  { %392 = vmatpush3.bf16.msra.mxu0 %v432_v1  ;;  %v437_v6 = vld [vmem:[%s558_s1 + $0x58] sm:$0xff]   ;;  %v439_v8 = vld [vmem:[%s558_s1 + $0x60] sm:$0xff]   ;;  %v441_v11 = vld [vmem:[%s558_s1 + $0x68] sm:$0xff]  }
   0x4   :  { %393 = vmatprep.subr.bf16.mxu0 %v433_v2  ;;  %v438_v7 = vld [vmem:[%s558_s1 + $0x18] sm:$0xff]   ;;  %v440_v9 = vld [vmem:[%s558_s1 + $0x20] sm:$0xff]   ;;  %v442_v12 = vld [vmem:[%s558_s1 + $0x28] sm:$0xff]  }
   0x5   :  { %v446_v10 = vld [vmem:[%s558_s1 + $0x80] sm:$0xff]   ;;  %v443_v13 = vld [vmem:[%s558_s1 + $0x70] sm:$0xff]   ;;  %v451_v15 = vld [vmem:[%s558_s1 + $0x88] sm:$0xff]  }
   0x6   :  { %423 = vmatprep.subr.bf16.mxu1 %v446_v10  ;;  %v450_v14 = vld [vmem:[%s559_s0 + $0x4] ss:$12 sps:$4 sm:$0xff]   ;;  %v452_v16 = vld [vmem:[%s559_s0 + $0x8] ss:$12 sps:$4 sm:$0xff]   ;;  %v453_v17 = vld [vmem:[%s559_s0 + $0x20] ss:$12 sps:$4 sm:$0xff]  }
   0x7   :  { %394 = vmatpush3.bf16.msra.mxu0 %v434_v3  ;;  %424 = vmatpush3.bf16.msra.mxu1 %v446_v10  ;;  %v444_v18 = vld [vmem:[%s558_s1 + $0x30] sm:$0xff]   ;;  %v445_v19 = vld [vmem:[%s558_s1 + $0x78] sm:$0xff]   ;;  %v448_v21 = vld [vmem:[%s559_s0] ss:$12 sps:$4 sm:$0xff]  }
   0x8   :  { %395 = vmatprep.subr.bf16.mxu0 %v435_v4  ;;  %243 = vmatprep.mubr.bf16.mxu0 %v450_v14  ;;  %v447_v20 = vld [vmem:[%s558_s1 + $0x38] sm:$0xff]   ;;  %v345_v30 = vld [vmem:[%s560_s2] ss:$0 sm:$0xff] }
   0x9   :  { %425 = vmatprep.subr.bf16.mxu1 %v451_v15  ;;  %427 = vmatprep.mubr.msk.bf16.mxu1 %vm204_vm0, %v452_v16  ;;  %v454_v22 = vld [vmem:[%s559_s0 + $0x1c] ss:$12 sps:$4 sm:$0xff]   ;;  %v456_v23 = vld [vmem:[%s559_s0 + $0x18] ss:$12 sps:$4 sm:$0xff]  }
   0xb   :  { %396 = vmatpush3.bf16.msra.mxu0 %v436_v5  ;;  %426 = vmatpush3.bf16.msra.mxu1 %v451_v15 }
   0xc   :  { %397 = vmatprep.subr.bf16.mxu0 %v437_v6 }
   0xe   :  { %428 = vmatmul.mubr.msk.bf16.vlgmr.msra.gmra.mrb[0].mxu1 %vm204_vm0, %v453_v17 }
   0xf   :  { %398 = vmatpush3.bf16.msra.mxu0 %v438_v7 }
  0x10   :  { %399 = vmatprep.subr.bf16.mxu0 %v439_v8 }
  0x13   :  { %400 = vmatpush3.bf16.msra.mxu0 %v440_v9 }
  0x14   :  { %401 = vmatprep.subr.bf16.mxu0 %v441_v11 }
  0x17   :  { %402 = vmatpush3.bf16.msra.mxu0 %v442_v12 }
  0x18   :  { %403 = vmatprep.subr.bf16.mxu0 %v443_v13 }
  0x1b   :  { %404 = vmatpush3.bf16.msra.mxu0 %v444_v18 }
  0x1c   :  { %405 = vmatprep.subr.bf16.mxu0 %v445_v19 }
  0x1f   :  { %406 = vmatpush3.bf16.msra.mxu0 %v447_v20 }
  0x22   :  { %244 = vmatmul.mubr.bf16.vlgmr.msra.gmra.mrb[0].mxu0 %v448_v21 }
  0x23   :  { %251 = vmatprep.mubr.bf16.mxu0 %v454_v22 }
  0x2a   :  { %252 = vmatmul.mubr.bf16.gmra.mrb[4].mxu0 %v456_v23 }
  0xe1   :  { %v429_v24 = vpop.f32.mrb[0].mxu1 }
  0xe2   :  { %v294_v25 = vpop.f32.mrb[1].mxu1 }
  0xe3   :  { %v430_v26 = vpop.f32.mrb[2].mxu1 }
  0xe4   :  { %v297_v27 = vpop.f32.mrb[3].mxu1 }
  0xf5   :  { %v407_v28 = vpop.f32.mrb[0].mxu0 }
  0xf6   :  { %v408_v29 = vpop.f32.mrb[1].mxu0 }
  0xf7   :  { %v409_v31 = vadd.f32 %v408_v29, %v407_v28  ;;  %v410_v32 = vpop.f32.mrb[2].mxu0 }
  0xf8   :  { %v411_v33 = vpop.f32.mrb[3].mxu0 }
  0xf9   :  { %v412_v34 = vadd.f32 %v411_v33, %v410_v32  ;;  %v246_v35 = vadd.f32 %v409_v31, %v345_v30 }
  0xfb   :  { %v295_v36 = vadd.f32 %v294_v25, %v246_v35  ;;  %v249_v37 = vadd.f32 %v412_v34, %v345_v30 }
  0xfd   :  { %v313_v38 = vmul.f32 0.2, %v295_v36  ;;  %v298_v39 = vadd.f32 %v297_v27, %v249_v37  ;;  %v413_v40 = vpop.f32.mrb[4].mxu0  ;;  %vm309_vm1 = vcmp.ge.f32.partialorder %v295_v36, 0.0 }
  0xfe   :  { %v414_v41 = vpop.f32.mrb[5].mxu0 }
  0xff   :  { %vm310_vm2 = vcmp.ge.f32.partialorder %v298_v39, 0.0  ;;  %v314_v42 = vmul.f32 0.2, %v298_v39  ;;  %v415_v43 = vadd.f32 %v414_v41, %v413_v40  ;;  %v416_v44 = vpop.f32.mrb[6].mxu0  ;;  %v317_v46 = vsel %vm309_vm1, %v295_v36, %v313_v38 }
 0x100   :  { %v417_v45 = vpop.f32.mrb[7].mxu0 }
 0x101   :  { %v318_v47 = vsel %vm310_vm2, %v298_v39, %v314_v42  ;;  %v254_v48 = vadd.f32 %v415_v43, %v345_v30  ;;  %v418_v49 = vadd.f32 %v417_v45, %v416_v44 }
 0x102   :  { %v383_v50 = vpack.c.bf16 %v318_v47, %v317_v46 }
 0x103   :  { %v303_v51 = vadd.f32 %v429_v24, %v254_v48  ;;  %v257_v52 = vadd.f32 %v418_v49, %v345_v30 }
 0x104   :  { %384 = vst [vmem:[%s561_s3] sm:$0xff] %v383_v50  }
 0x105   :  { %v315_v53 = vmul.f32 0.2, %v303_v51  ;;  %v306_v54 = vadd.f32 %v430_v26, %v257_v52  ;;  %vm311_vm3 = vcmp.ge.f32.partialorder %v303_v51, 0.0 }
 0x107   :  { %vm312_vm4 = vcmp.ge.f32.partialorder %v306_v54, 0.0  ;;  %v316_v55 = vmul.f32 0.2, %v306_v54  ;;  %v319_v56 = vsel %vm311_vm3, %v303_v51, %v315_v53 }
 0x109   :  { %v320_v57 = vsel %vm312_vm4, %v306_v54, %v316_v55 }
 0x10a   :  { %v388_v58 = vpack.c.bf16 %v320_v57, %v319_v56 }
 0x10c   :  { %390 = vst [vmem:[%s561_s3 + $0x8] sm:$0xff] %v388_v58  }

// kernel: unet_forward.14
= control target key start
LH: loop header
LB: loop body
LE: loop exit
PB: predicated region body
PF: predicated region fallthrough
CT: control target
= control target key end

     0   :  { %v380_v1 = vmov 0.0   ;;  %vm381_vm0 = vmmov 0   ;;  %vm185_vm1 = vcmask 261120   ;;  %s471_s1 = inlined_call_operand.vmem [shape: bf16[288,128], index: 1, kind: input, shape index: {}]   ;;  %s472_s0 = inlined_call_operand.vmem [shape: bf16[16,288], index: 0, kind: input, shape index: {}]   ;;  %s473_s2 = inlined_call_operand.vmem [shape: f32[1,128], index: 2, kind: input, shape index: {}]   ;;  %s474_s3 = inlined_call_operand.vmem [shape: bf16[16,128], index: 3, kind: output, shape index: {}]  }
   0x1   :  { %v358_v0 = vld [vmem:[%s471_s1 + $0x40] sm:$0xff]   ;;  %348 = vmatprep.subr.bf16.mxu1 %v380_v1  ;;  %352 = vmatprep.mubr.msk.bf16.mxu1 %vm381_vm0, %v380_v1  ;;  %v360_v3 = vld [vmem:[%s471_s1 + $0x48] sm:$0xff]   ;;  %v362_v5 = vld [vmem:[%s471_s1 + $0x50] sm:$0xff]  }
   0x2   :  { %v359_v2 = vld [vmem:[%s471_s1] sm:$0xff]   ;;  %323 = vmatprep.subr.bf16.mxu0 %v358_v0  ;;  %v361_v4 = vld [vmem:[%s471_s1 + $0x8] sm:$0xff]   ;;  %v363_v6 = vld [vmem:[%s471_s1 + $0x10] sm:$0xff]  }
   0x3   :  { %324 = vmatpush3.bf16.msra.mxu0 %v359_v2  ;;  %v364_v7 = vld [vmem:[%s471_s1 + $0x58] sm:$0xff]   ;;  %v366_v9 = vld [vmem:[%s471_s1 + $0x60] sm:$0xff]   ;;  %v368_v12 = vld [vmem:[%s471_s1 + $0x68] sm:$0xff]  }
   0x4   :  { %325 = vmatprep.subr.bf16.mxu0 %v360_v3  ;;  %v365_v8 = vld [vmem:[%s471_s1 + $0x18] sm:$0xff]   ;;  %v372_v10 = vld [vmem:[%s471_s1 + $0x80] sm:$0xff]   ;;  %v369_v13 = vld [vmem:[%s471_s1 + $0x28] sm:$0xff]  }
   0x5   :  { %v367_v11 = vld [vmem:[%s471_s1 + $0x20] sm:$0xff]   ;;  %349 = vmatpush3.bf16.msra.mxu1 %v372_v10  ;;  %v378_v15 = vld [vmem:[%s471_s1 + $0x88] sm:$0xff]   ;;  %v370_v16 = vld [vmem:[%s471_s1 + $0x70] sm:$0xff]  }
   0x6   :  { %350 = vmatprep.subr.bf16.mxu1 %v380_v1  ;;  %v377_v14 = vld [vmem:[%s472_s0 + $0x4] ss:$12 sps:$4 sm:$0xff]   ;;  %v379_v17 = vld [vmem:[%s472_s0 + $0x8] ss:$12 sps:$4 sm:$0xff]   ;;  %v373_v19 = vld [vmem:[%s471_s1 + $0x78] sm:$0xff]  }
   0x7   :  { %326 = vmatpush3.bf16.msra.mxu0 %v361_v4  ;;  %221 = vmatprep.mubr.bf16.mxu0 %v377_v14  ;;  %v371_v18 = vld [vmem:[%s471_s1 + $0x30] sm:$0xff]   ;;  %v374_v20 = vld [vmem:[%s471_s1 + $0x38] sm:$0xff]   ;;  %v375_v21 = vld [vmem:[%s472_s0] ss:$12 sps:$4 sm:$0xff]  }
   0x8   :  { %327 = vmatprep.subr.bf16.mxu0 %v362_v5  ;;  %v291_v28 = vld [vmem:[%s473_s2] ss:$0 sm:$0xff] }
   0x9   :  { %351 = vmatpush3.bf16.msra.mxu1 %v378_v15 }
   0xb   :  { %328 = vmatpush3.bf16.msra.mxu0 %v363_v6 }
   0xc   :  { %329 = vmatprep.subr.bf16.mxu0 %v364_v7  ;;  %353 = vmatmul.mubr.msk.bf16.vlgmr.msra.gmra.mrb[0].mxu1 %vm185_vm1, %v379_v17 }
   0xf   :  { %330 = vmatpush3.bf16.msra.mxu0 %v365_v8 }
  0x10   :  { %331 = vmatprep.subr.bf16.mxu0 %v366_v9 }
  0x13   :  { %332 = vmatpush3.bf16.msra.mxu0 %v367_v11 }
  0x14   :  { %333 = vmatprep.subr.bf16.mxu0 %v368_v12 }
  0x17   :  { %334 = vmatpush3.bf16.msra.mxu0 %v369_v13 }
  0x18   :  { %335 = vmatprep.subr.bf16.mxu0 %v370_v16 }
  0x1b   :  { %336 = vmatpush3.bf16.msra.mxu0 %v371_v18 }
  0x1c   :  { %337 = vmatprep.subr.bf16.mxu0 %v373_v19 }
  0x1f   :  { %338 = vmatpush3.bf16.msra.mxu0 %v374_v20 }
  0x22   :  { %222 = vmatmul.mubr.bf16.vlgmr.msra.gmra.mrb[0].mxu0 %v375_v21 }
  0xdf   :  { %v264_v22 = vpop.f32.mrb[0].mxu1 }
  0xe0   :  { %v354_v23 = vpop.f32.mrb[1].mxu1 }
  0xe1   :  { %v267_v24 = vpop.f32.mrb[2].mxu1 }
  0xe2   :  { %v355_v25 = vpop.f32.mrb[3].mxu1 }
  0xf5   :  { %v339_v26 = vpop.f32.mrb[0].mxu0 }
  0xf6   :  { %v340_v27 = vpop.f32.mrb[1].mxu0 }
  0xf7   :  { %v341_v29 = vadd.f32 %v340_v27, %v339_v26  ;;  %v342_v30 = vpop.f32.mrb[2].mxu0 }
  0xf8   :  { %v343_v31 = vpop.f32.mrb[3].mxu0 }
  0xf9   :  { %v224_v32 = vadd.f32 %v341_v29, %v291_v28  ;;  %v344_v33 = vadd.f32 %v343_v31, %v342_v30 }
  0xfb   :  { %v265_v34 = vadd.f32 %v264_v22, %v224_v32  ;;  %v227_v35 = vadd.f32 %v344_v33, %v291_v28 }
  0xfd   :  { %v273_v36 = vmul.f32 0.2, %v265_v34  ;;  %v268_v37 = vadd.f32 %v267_v24, %v227_v35  ;;  %vm271_vm2 = vcmp.ge.f32.partialorder %v265_v34, 0.0 }
  0xff   :  { %vm272_vm3 = vcmp.ge.f32.partialorder %v268_v37, 0.0  ;;  %v274_v38 = vmul.f32 0.2, %v268_v37  ;;  %v275_v39 = vsel %vm271_vm2, %v265_v34, %v273_v36 }
 0x101   :  { %v276_v40 = vsel %vm272_vm3, %v268_v37, %v274_v38 }
 0x102   :  { %v321_v41 = vpack.c.bf16 %v276_v40, %v275_v39 }
 0x104   :  { %322 = vst [vmem:[%s474_s3] sm:$0xff] %v321_v41  }

// kernel: unet_forward.15
= control target key start
LH: loop header
LB: loop body
LE: loop exit
PB: predicated region body
PF: predicated region fallthrough
CT: control target
= control target key end

     0   :  { %v646_v33 = vmov 0.0   ;;  %vm647_vm0 = vmmov 0   ;;  %vm341_vm1 = vcmask 523264   ;;  %s797_s1 = inlined_call_operand.vmem [shape: bf16[576,128], index: 1, kind: input, shape index: {}]   ;;  %s798_s0 = inlined_call_operand.vmem [shape: bf16[16,576], index: 0, kind: input, shape index: {}]   ;;  %s799_s2 = inlined_call_operand.vmem [shape: f32[1,128], index: 2, kind: input, shape index: {}]   ;;  %s800_s3 = inlined_call_operand.vmem [shape: bf16[16,128], index: 3, kind: output, shape index: {}]  }
   0x1   :  { %v603_v0 = vld [vmem:[%s797_s1 + $0x40] sm:$0xff]   ;;  %v607_v4 = vld [vmem:[%s797_s1 + $0x48] sm:$0xff]   ;;  %v611_v8 = vld [vmem:[%s797_s1 + $0x50] sm:$0xff]  }
   0x2   :  { %v604_v1 = vld [vmem:[%s797_s1] sm:$0xff]   ;;  %540 = vmatprep.subr.bf16.mxu0 %v603_v0  ;;  %v608_v5 = vld [vmem:[%s797_s1 + $0x8] sm:$0xff]   ;;  %v612_v9 = vld [vmem:[%s797_s1 + $0x10] sm:$0xff]  }
   0x3   :  { %v605_v2 = vld [vmem:[%s797_s1 + $0xc0] sm:$0xff]   ;;  %541 = vmatpush3.bf16.msra.mxu0 %v604_v1  ;;  %v609_v6 = vld [vmem:[%s797_s1 + $0xc8] sm:$0xff]   ;;  %v613_v10 = vld [vmem:[%s797_s1 + $0xd0] sm:$0xff]  }
   0x4   :  { %v606_v3 = vld [vmem:[%s797_s1 + $0x80] sm:$0xff]   ;;  %562 = vmatprep.subr.bf16.mxu1 %v605_v2  ;;  %542 = vmatprep.subr.bf16.mxu0 %v607_v4  ;;  %v610_v7 = vld [vmem:[%s797_s1 + $0x88] sm:$0xff]   ;;  %v614_v11 = vld [vmem:[%s797_s1 + $0x90] sm:$0xff]  }
   0x5   :  { %563 = vmatpush3.bf16.msra.mxu1 %v606_v3  ;;  %v615_v12 = vld [vmem:[%s797_s1 + $0x58] sm:$0xff]   ;;  %v619_v16 = vld [vmem:[%s797_s1 + $0x60] sm:$0xff]   ;;  %v623_v20 = vld [vmem:[%s797_s1 + $0x68] sm:$0xff]  }
   0x6   :  { %564 = vmatprep.subr.bf16.mxu1 %v609_v6  ;;  %v616_v13 = vld [vmem:[%s797_s1 + $0x18] sm:$0xff]   ;;  %v620_v17 = vld [vmem:[%s797_s1 + $0x20] sm:$0xff]   ;;  %v624_v21 = vld [vmem:[%s797_s1 + $0x28] sm:$0xff]  }
   0x7   :  { %543 = vmatpush3.bf16.msra.mxu0 %v608_v5  ;;  %v617_v14 = vld [vmem:[%s797_s1 + $0xd8] sm:$0xff]   ;;  %v621_v18 = vld [vmem:[%s797_s1 + $0xe0] sm:$0xff]   ;;  %v625_v22 = vld [vmem:[%s797_s1 + $0xe8] sm:$0xff]  }
   0x8   :  { %544 = vmatprep.subr.bf16.mxu0 %v611_v8  ;;  %v618_v15 = vld [vmem:[%s797_s1 + $0x98] sm:$0xff]   ;;  %v622_v19 = vld [vmem:[%s797_s1 + $0xa0] sm:$0xff]   ;;  %v626_v23 = vld [vmem:[%s797_s1 + $0xa8] sm:$0xff]  }
   0x9   :  { %565 = vmatpush3.bf16.msra.mxu1 %v610_v7  ;;  %v627_v24 = vld [vmem:[%s797_s1 + $0x70] sm:$0xff]   ;;  %v631_v28 = vld [vmem:[%s797_s1 + $0x78] sm:$0xff]   ;;  %v640_v36 = vld [vmem:[%s798_s0 + $0xc] ss:$20 sps:$4 sm:$0xff]  }
   0xa   :  { %566 = vmatprep.subr.bf16.mxu1 %v613_v10  ;;  %v628_v25 = vld [vmem:[%s797_s1 + $0x30] sm:$0xff]   ;;  %v632_v29 = vld [vmem:[%s797_s1 + $0x38] sm:$0xff]   ;;  %v641_v37 = vld [vmem:[%s797_s1 + $0x100] sm:$0xff]   ;;  %418 = vmatprep.mubr.bf16.mxu1 %v640_v36 }
   0xb   :  { %545 = vmatpush3.bf16.msra.mxu0 %v612_v9  ;;  %v629_v26 = vld [vmem:[%s797_s1 + $0xf0] sm:$0xff]   ;;  %v633_v30 = vld [vmem:[%s797_s1 + $0xf8] sm:$0xff]   ;;  %v642_v38 = vld [vmem:[%s797_s1 + $0x108] sm:$0xff]  }
   0xc   :  { %546 = vmatprep.subr.bf16.mxu0 %v615_v12  ;;  %v630_v27 = vld [vmem:[%s797_s1 + $0xb0] sm:$0xff]   ;;  %v636_v32 = vld [vmem:[%s798_s0 + $0x4] ss:$20 sps:$4 sm:$0xff]   ;;  %v638_v35 = vld [vmem:[%s798_s0 + $0x8] ss:$20 sps:$4 sm:$0xff]  }
   0xd   :  { %567 = vmatpush3.bf16.msra.mxu1 %v614_v11  ;;  %v634_v31 = vld [vmem:[%s798_s0] ss:$20 sps:$4 sm:$0xff]   ;;  %v637_v34 = vld [vmem:[%s797_s1 + $0xb8] sm:$0xff]   ;;  %377 = vmatprep.mubr.bf16.mxu0 %v636_v32  ;;  %v645_v41 = vld [vmem:[%s798_s0 + $0x10] ss:$20 sps:$4 sm:$0xff]  }
   0xe   :  { %568 = vmatprep.subr.bf16.mxu1 %v617_v14  ;;  %v643_v39 = vld [vmem:[%s797_s1 + $0x110] sm:$0xff]   ;;  %v644_v40 = vld [vmem:[%s797_s1 + $0x118] sm:$0xff]   ;;  %v488_v43 = vld [vmem:[%s799_s2] ss:$0 sm:$0xff] }
   0xf   :  { %547 = vmatpush3.bf16.msra.mxu0 %v616_v13 }
  0x10   :  { %548 = vmatprep.subr.bf16.mxu0 %v619_v16 }
  0x11   :  { %569 = vmatpush3.bf16.msra.mxu1 %v618_v15 }
  0x12   :  { %570 = vmatprep.subr.bf16.mxu1 %v621_v18 }
  0x13   :  { %549 = vmatpush3.bf16.msra.mxu0 %v620_v17 }
  0x14   :  { %550 = vmatprep.subr.bf16.mxu0 %v623_v20 }
  0x15   :  { %571 = vmatpush3.bf16.msra.mxu1 %v622_v19 }
  0x16   :  { %572 = vmatprep.subr.bf16.mxu1 %v625_v22 }
  0x17   :  { %551 = vmatpush3.bf16.msra.mxu0 %v624_v21 }
  0x18   :  { %552 = vmatprep.subr.bf16.mxu0 %v627_v24 }
  0x19   :  { %573 = vmatpush3.bf16.msra.mxu1 %v626_v23 }
  0x1a   :  { %574 = vmatprep.subr.bf16.mxu1 %v629_v26 }
  0x1b   :  { %553 = vmatpush3.bf16.msra.mxu0 %v628_v25 }
  0x1c   :  { %554 = vmatprep.subr.bf16.mxu0 %v631_v28 }
  0x1d   :  { %575 = vmatpush3.bf16.msra.mxu1 %v630_v27 }
  0x1e   :  { %576 = vmatprep.subr.bf16.mxu1 %v633_v30 }
  0x1f   :  { %555 = vmatpush3.bf16.msra.mxu0 %v632_v29 }
  0x20   :  { %589 = vmatprep.subr.bf16.mxu0 %v646_v33 }
  0x21   :  { %577 = vmatpush3.bf16.msra.mxu1 %v637_v34 }
  0x22   :  { %378 = vmatmul.mubr.bf16.vlgmr.msra.gmra.mrb[0].mxu0 %v634_v31 }
  0x23   :  { %597 = vmatprep.mubr.msk.bf16.mxu0 %vm647_vm0, %v646_v33  ;;  %590 = vmatpush3.bf16.msra.mxu0 %v641_v37 }
  0x24   :  { %419 = vmatmul.mubr.bf16.vlgmr.msra.gmra.mrb[0].mxu1 %v638_v35  ;;  %591 = vmatprep.subr.bf16.mxu0 %v646_v33 }
  0x27   :  { %592 = vmatpush3.bf16.msra.mxu0 %v642_v38 }
  0x28   :  { %593 = vmatprep.subr.bf16.mxu0 %v646_v33 }
  0x2b   :  { %594 = vmatpush3.bf16.msra.mxu0 %v643_v39 }
  0x2c   :  { %595 = vmatprep.subr.bf16.mxu0 %v646_v33 }
  0x2f   :  { %596 = vmatpush3.bf16.msra.mxu0 %v644_v40 }
  0x32   :  { %598 = vmatmul.mubr.msk.bf16.vlgmr.msra.gmra.mrb[4].mxu0 %vm341_vm1, %v645_v41 }
  0xf5   :  { %v556_v42 = vpop.f32.mrb[0].mxu0 }
  0xf6   :  { %v557_v44 = vpop.f32.mrb[1].mxu0 }
  0xf7   :  { %v558_v45 = vadd.f32 %v557_v44, %v556_v42  ;;  %v559_v46 = vpop.f32.mrb[2].mxu0  ;;  %v578_v47 = vpop.f32.mrb[0].mxu1 }
  0xf8   :  { %v560_v48 = vpop.f32.mrb[3].mxu0  ;;  %v579_v51 = vpop.f32.mrb[1].mxu1 }
  0xf9   :  { %v380_v49 = vadd.f32 %v558_v45, %v488_v43  ;;  %v561_v50 = vadd.f32 %v560_v48, %v559_v46  ;;  %v580_v52 = vadd.f32 %v579_v51, %v578_v47  ;;  %v581_v53 = vpop.f32.mrb[2].mxu1 }
  0xfa   :  { %v582_v55 = vpop.f32.mrb[3].mxu1 }
  0xfb   :  { %v383_v54 = vadd.f32 %v561_v50, %v488_v43  ;;  %v583_v56 = vadd.f32 %v582_v55, %v581_v53  ;;  %v421_v57 = vadd.f32 %v580_v52, %v380_v49 }
  0xfd   :  { %v424_v58 = vadd.f32 %v583_v56, %v383_v54 }
 0x105   :  { %v461_v59 = vpop.f32.mrb[4].mxu0 }
 0x106   :  { %v462_v60 = vadd.f32 %v461_v59, %v421_v57  ;;  %v599_v61 = vpop.f32.mrb[5].mxu0 }
 0x107   :  { %v464_v62 = vpop.f32.mrb[6].mxu0 }
 0x108   :  { %v470_v63 = vmul.f32 0.2, %v462_v60  ;;  %v465_v0 = vadd.f32 %v464_v62, %v424_v58  ;;  %v600_v1 = vpop.f32.mrb[7].mxu0  ;;  %vm468_vm2 = vcmp.ge.f32.partialorder %v462_v60, 0.0 }
 0x10a   :  { %vm469_vm3 = vcmp.ge.f32.partialorder %v465_v0, 0.0  ;;  %v471_v2 = vmul.f32 0.2, %v465_v0  ;;  %v472_v3 = vsel %vm468_vm2, %v462_v60, %v470_v63 }
 0x10c   :  { %v473_v4 = vsel %vm469_vm3, %v465_v0, %v471_v2 }
 0x10d   :  { %v538_v5 = vpack.c.bf16 %v473_v4, %v472_v3 }
 0x10f   :  { %539 = vst [vmem:[%s800_s3] sm:$0xff] %v538_v5  }

// kernel: unet_forward.17
= control target key start
LH: loop header
LB: loop body
LE: loop exit
PB: predicated region body
PF: predicated region fallthrough
CT: control target
= control target key end

     0   :  { %vm1175_vm0 = vmmov 0   ;;  %s1445_s1 = inlined_call_operand.vmem [shape: bf16[1152,128], index: 1, kind: input, shape index: {}]   ;;  %s1446_s0 = inlined_call_operand.vmem [shape: bf16[16,1152], index: 0, kind: input, shape index: {}]   ;;  %s1447_s2 = inlined_call_operand.vmem [shape: f32[1,128], index: 2, kind: input, shape index: {}]   ;;  %s1448_s3 = inlined_call_operand.vmem [shape: bf16[16,128], index: 3, kind: output, shape index: {}]  }
   0x1   :  { %v1089_v0 = vld [vmem:[%s1445_s1 + $0x40] sm:$0xff]   ;;  %v1093_v4 = vld [vmem:[%s1445_s1 + $0x48] sm:$0xff]   ;;  %v1097_v8 = vld [vmem:[%s1445_s1 + $0x50] sm:$0xff]  }
   0x2   :  { %v1090_v1 = vld [vmem:[%s1445_s1] sm:$0xff]   ;;  %970 = vmatprep.subr.bf16.mxu0 %v1089_v0  ;;  %v1094_v5 = vld [vmem:[%s1445_s1 + $0x8] sm:$0xff]   ;;  %v1098_v9 = vld [vmem:[%s1445_s1 + $0x10] sm:$0xff]  }
   0x3   :  { %v1091_v2 = vld [vmem:[%s1445_s1 + $0xc0] sm:$0xff]   ;;  %971 = vmatpush3.bf16.msra.mxu0 %v1090_v1  ;;  %v1095_v6 = vld [vmem:[%s1445_s1 + $0xc8] sm:$0xff]   ;;  %v1099_v10 = vld [vmem:[%s1445_s1 + $0xd0] sm:$0xff]  }
   0x4   :  { %v1092_v3 = vld [vmem:[%s1445_s1 + $0x80] sm:$0xff]   ;;  %992 = vmatprep.subr.bf16.mxu1 %v1091_v2  ;;  %972 = vmatprep.subr.bf16.mxu0 %v1093_v4  ;;  %v1096_v7 = vld [vmem:[%s1445_s1 + $0x88] sm:$0xff]   ;;  %v1100_v11 = vld [vmem:[%s1445_s1 + $0x90] sm:$0xff]  }
   0x5   :  { %993 = vmatpush3.bf16.msra.mxu1 %v1092_v3  ;;  %v1101_v12 = vld [vmem:[%s1445_s1 + $0x58] sm:$0xff]   ;;  %v1105_v16 = vld [vmem:[%s1445_s1 + $0x60] sm:$0xff]   ;;  %v1109_v20 = vld [vmem:[%s1445_s1 + $0x68] sm:$0xff]  }
   0x6   :  { %994 = vmatprep.subr.bf16.mxu1 %v1095_v6  ;;  %v1102_v13 = vld [vmem:[%s1445_s1 + $0x18] sm:$0xff]   ;;  %v1106_v17 = vld [vmem:[%s1445_s1 + $0x20] sm:$0xff]   ;;  %v1110_v21 = vld [vmem:[%s1445_s1 + $0x28] sm:$0xff]   ;;  %v1174_v6 = vmov 0.0  }
   0x7   :  { %973 = vmatpush3.bf16.msra.mxu0 %v1094_v5  ;;  %v1103_v14 = vld [vmem:[%s1445_s1 + $0xd8] sm:$0xff]   ;;  %v1107_v18 = vld [vmem:[%s1445_s1 + $0xe0] sm:$0xff]   ;;  %v1111_v22 = vld [vmem:[%s1445_s1 + $0xe8] sm:$0xff]  }
   0x8   :  { %974 = vmatprep.subr.bf16.mxu0 %v1097_v8  ;;  %v1104_v15 = vld [vmem:[%s1445_s1 + $0x98] sm:$0xff]   ;;  %v1108_v19 = vld [vmem:[%s1445_s1 + $0xa0] sm:$0xff]   ;;  %v1112_v23 = vld [vmem:[%s1445_s1 + $0xa8] sm:$0xff]  }
   0x9   :  { %995 = vmatpush3.bf16.msra.mxu1 %v1096_v7  ;;  %v1113_v24 = vld [vmem:[%s1445_s1 + $0x70] sm:$0xff]   ;;  %v1117_v28 = vld [vmem:[%s1445_s1 + $0x78] sm:$0xff]   ;;  %v1120_v31 = vld [vmem:[%s1446_s0] ss:$36 sps:$4 sm:$0xff]  }
   0xa   :  { %996 = vmatprep.subr.bf16.mxu1 %v1099_v10  ;;  %v1114_v25 = vld [vmem:[%s1445_s1 + $0x30] sm:$0xff]   ;;  %v1118_v29 = vld [vmem:[%s1445_s1 + $0x38] sm:$0xff]   ;;  %v1122_v32 = vld [vmem:[%s1446_s0 + $0x4] ss:$36 sps:$4 sm:$0xff]  }
   0xb   :  { %975 = vmatpush3.bf16.msra.mxu0 %v1098_v9  ;;  %v1115_v26 = vld [vmem:[%s1445_s1 + $0xf0] sm:$0xff]   ;;  %v1119_v30 = vld [vmem:[%s1445_s1 + $0xf8] sm:$0xff]   ;;  %686 = vmatprep.mubr.bf16.mxu0 %v1122_v32  ;;  %v1124_v34 = vld [vmem:[%s1445_s1 + $0x140] sm:$0xff]  }
   0xc   :  { %976 = vmatprep.subr.bf16.mxu0 %v1101_v12  ;;  %v1116_v27 = vld [vmem:[%s1445_s1 + $0xb0] sm:$0xff]   ;;  %v1123_v33 = vld [vmem:[%s1445_s1 + $0xb8] sm:$0xff]   ;;  %v1125_v35 = vld [vmem:[%s1446_s0 + $0x8] ss:$36 sps:$4 sm:$0xff]  }
   0xd   :  { %997 = vmatpush3.bf16.msra.mxu1 %v1100_v11  ;;  %v1127_v36 = vld [vmem:[%s1446_s0 + $0xc] ss:$36 sps:$4 sm:$0xff]   ;;  %v1128_v37 = vld [vmem:[%s1445_s1 + $0x100] sm:$0xff]   ;;  %v1139_v48 = vld [vmem:[%s1445_s1 + $0x158] sm:$0xff]  }
   0xe   :  { %998 = vmatprep.subr.bf16.mxu1 %v1103_v14  ;;  %727 = vmatprep.mubr.bf16.mxu1 %v1127_v36  ;;  %v1129_v38 = vld [vmem:[%s1445_s1 + $0x1c0] sm:$0xff]   ;;  %v1131_v40 = vld [vmem:[%s1445_s1 + $0x148] sm:$0xff]   ;;  %v1135_v44 = vld [vmem:[%s1445_s1 + $0x150] sm:$0xff]  }
   0xf   :  { %977 = vmatpush3.bf16.msra.mxu0 %v1102_v13  ;;  %v1130_v39 = vld [vmem:[%s1445_s1 + $0x180] sm:$0xff]   ;;  %v1132_v41 = vld [vmem:[%s1445_s1 + $0x108] sm:$0xff]   ;;  %v1136_v45 = vld [vmem:[%s1445_s1 + $0x110] sm:$0xff]  }
  0x10   :  { %978 = vmatprep.subr.bf16.mxu0 %v1105_v16  ;;  %v1133_v42 = vld [vmem:[%s1445_s1 + $0x1c8] sm:$0xff]   ;;  %v1137_v46 = vld [vmem:[%s1445_s1 + $0x1d0] sm:$0xff]   ;;  %v1140_v49 = vld [vmem:[%s1445_s1 + $0x118] sm:$0xff]  }
  0x11   :  { %999 = vmatpush3.bf16.msra.mxu1 %v1104_v15  ;;  %v1134_v43 = vld [vmem:[%s1445_s1 + $0x188] sm:$0xff]   ;;  %v1138_v47 = vld [vmem:[%s1445_s1 + $0x190] sm:$0xff]   ;;  %v1141_v50 = vld [vmem:[%s1445_s1 + $0x1d8] sm:$0xff]  }
  0x12   :  { %1000 = vmatprep.subr.bf16.mxu1 %v1107_v18  ;;  %v1142_v51 = vld [vmem:[%s1445_s1 + $0x198] sm:$0xff]   ;;  %v1143_v52 = vld [vmem:[%s1445_s1 + $0x160] sm:$0xff]   ;;  %v1147_v56 = vld [vmem:[%s1445_s1 + $0x168] sm:$0xff]  }
  0x13   :  { %979 = vmatpush3.bf16.msra.mxu0 %v1106_v17  ;;  %v1144_v53 = vld [vmem:[%s1445_s1 + $0x120] sm:$0xff]   ;;  %v1148_v57 = vld [vmem:[%s1445_s1 + $0x128] sm:$0xff]   ;;  %v1151_v60 = vld [vmem:[%s1445_s1 + $0x170] sm:$0xff]  }
  0x14   :  { %980 = vmatprep.subr.bf16.mxu0 %v1109_v20  ;;  %v1145_v54 = vld [vmem:[%s1445_s1 + $0x1e0] sm:$0xff]   ;;  %v1149_v58 = vld [vmem:[%s1445_s1 + $0x1e8] sm:$0xff]   ;;  %v1152_v61 = vld [vmem:[%s1445_s1 + $0x130] sm:$0xff]  }
  0x15   :  { %1001 = vmatpush3.bf16.msra.mxu1 %v1108_v19  ;;  %v1146_v55 = vld [vmem:[%s1445_s1 + $0x1a0] sm:$0xff]   ;;  %v1150_v59 = vld [vmem:[%s1445_s1 + $0x1a8] sm:$0xff]   ;;  %v1153_v62 = vld [vmem:[%s1445_s1 + $0x1f0] sm:$0xff]  }
  0x16   :  { %1002 = vmatprep.subr.bf16.mxu1 %v1111_v22  ;;  %v1154_v63 = vld [vmem:[%s1445_s1 + $0x1b0] sm:$0xff]   ;;  %v1155_v0 = vld [vmem:[%s1445_s1 + $0x178] sm:$0xff]   ;;  %v1165_v9 = vld [vmem:[%s1445_s1 + $0x200] sm:$0xff]  }
  0x17   :  { %981 = vmatpush3.bf16.msra.mxu0 %v1110_v21  ;;  %v1156_v1 = vld [vmem:[%s1445_s1 + $0x138] sm:$0xff]   ;;  %v1158_v3 = vld [vmem:[%s1446_s0 + $0x10] ss:$36 sps:$4 sm:$0xff]   ;;  %v1166_v10 = vld [vmem:[%s1445_s1 + $0x208] sm:$0xff]  }
  0x18   :  { %982 = vmatprep.subr.bf16.mxu0 %v1113_v24  ;;  %v1157_v2 = vld [vmem:[%s1445_s1 + $0x1f8] sm:$0xff]   ;;  %v1167_v11 = vld [vmem:[%s1445_s1 + $0x210] sm:$0xff]   ;;  %v1169_v13 = vld [vmem:[%s1445_s1 + $0x220] sm:$0xff]  }
  0x19   :  { %1003 = vmatpush3.bf16.msra.mxu1 %v1112_v23  ;;  %v1160_v4 = vld [vmem:[%s1446_s0 + $0x14] ss:$36 sps:$4 sm:$0xff]   ;;  %v1164_v8 = vld [vmem:[%s1446_s0 + $0x1c] ss:$36 sps:$4 sm:$0xff]   ;;  %v1170_v14 = vld [vmem:[%s1445_s1 + $0x228] sm:$0xff]  }
  0x1a   :  { %1004 = vmatprep.subr.bf16.mxu1 %v1115_v26  ;;  %v1161_v5 = vld [vmem:[%s1445_s1 + $0x1b8] sm:$0xff]   ;;  %v1171_v15 = vld [vmem:[%s1445_s1 + $0x230] sm:$0xff]   ;;  %v1173_v17 = vld [vmem:[%s1446_s0 + $0x20] ss:$36 sps:$4 sm:$0xff]  }
  0x1b   :  { %983 = vmatpush3.bf16.msra.mxu0 %v1114_v25  ;;  %v1162_v7 = vld [vmem:[%s1446_s0 + $0x18] ss:$36 sps:$4 sm:$0xff]   ;;  %v879_v19 = vld [vmem:[%s1447_s2] ss:$0 sm:$0xff] }
  0x1c   :  { %984 = vmatprep.subr.bf16.mxu0 %v1117_v28  ;;  %v1168_v12 = vld [vmem:[%s1445_s1 + $0x218] sm:$0xff]  }
  0x1d   :  { %1005 = vmatpush3.bf16.msra.mxu1 %v1116_v27  ;;  %v1172_v16 = vld [vmem:[%s1445_s1 + $0x238] sm:$0xff]  }
  0x1e   :  { %1006 = vmatprep.subr.bf16.mxu1 %v1119_v30 }
  0x1f   :  { %985 = vmatpush3.bf16.msra.mxu0 %v1118_v29 }
  0x20   :  { %1014 = vmatprep.subr.bf16.mxu0 %v1124_v34 }
  0x21   :  { %1007 = vmatpush3.bf16.msra.mxu1 %v1123_v33 }
  0x22   :  { %687 = vmatmul.mubr.bf16.vlgmr.msra.gmra.mrb[0].mxu0 %v1120_v31  ;;  %1036 = vmatprep.subr.bf16.mxu1 %v1129_v38 }
  0x23   :  { %1015 = vmatpush3.bf16.msra.mxu0 %v1128_v37  ;;  %768 = vmatprep.mubr.bf16.mxu0 %v1160_v4 }
  0x24   :  { %728 = vmatmul.mubr.bf16.vlgmr.msra.gmra.mrb[0].mxu1 %v1125_v35  ;;  %1016 = vmatprep.subr.bf16.mxu0 %v1131_v40 }
  0x25   :  { %1037 = vmatpush3.bf16.msra.mxu1 %v1130_v39  ;;  %809 = vmatprep.mubr.bf16.mxu1 %v1164_v8 }
  0x26   :  { %1038 = vmatprep.subr.bf16.mxu1 %v1133_v42 }
  0x27   :  { %1017 = vmatpush3.bf16.msra.mxu0 %v1132_v41 }
  0x28   :  { %1018 = vmatprep.subr.bf16.mxu0 %v1135_v44 }
  0x29   :  { %1039 = vmatpush3.bf16.msra.mxu1 %v1134_v43 }
  0x2a   :  { %1040 = vmatprep.subr.bf16.mxu1 %v1137_v46 }
  0x2b   :  { %1019 = vmatpush3.bf16.msra.mxu0 %v1136_v45 }
  0x2c   :  { %1020 = vmatprep.subr.bf16.mxu0 %v1139_v48 }
  0x2d   :  { %1041 = vmatpush3.bf16.msra.mxu1 %v1138_v47 }
  0x2e   :  { %1042 = vmatprep.subr.bf16.mxu1 %v1141_v50 }
  0x2f   :  { %1021 = vmatpush3.bf16.msra.mxu0 %v1140_v49 }
  0x30   :  { %1022 = vmatprep.subr.bf16.mxu0 %v1143_v52 }
  0x31   :  { %1043 = vmatpush3.bf16.msra.mxu1 %v1142_v51 }
  0x32   :  { %1044 = vmatprep.subr.bf16.mxu1 %v1145_v54 }
  0x33   :  { %1023 = vmatpush3.bf16.msra.mxu0 %v1144_v53 }
  0x34   :  { %1024 = vmatprep.subr.bf16.mxu0 %v1147_v56 }
  0x35   :  { %1045 = vmatpush3.bf16.msra.mxu1 %v1146_v55 }
  0x36   :  { %1046 = vmatprep.subr.bf16.mxu1 %v1149_v58 }
  0x37   :  { %1025 = vmatpush3.bf16.msra.mxu0 %v1148_v57 }
  0x38   :  { %1026 = vmatprep.subr.bf16.mxu0 %v1151_v60 }
  0x39   :  { %1047 = vmatpush3.bf16.msra.mxu1 %v1150_v59 }
  0x3a   :  { %1048 = vmatprep.subr.bf16.mxu1 %v1153_v62 }
  0x3b   :  { %1027 = vmatpush3.bf16.msra.mxu0 %v1152_v61 }
  0x3c   :  { %1028 = vmatprep.subr.bf16.mxu0 %v1155_v0 }
  0x3d   :  { %1049 = vmatpush3.bf16.msra.mxu1 %v1154_v63 }
  0x3e   :  { %1050 = vmatprep.subr.bf16.mxu1 %v1157_v2 }
  0x3f   :  { %1029 = vmatpush3.bf16.msra.mxu0 %v1156_v1 }
  0x40   :  { %1067 = vmatprep.subr.bf16.mxu0 %v1174_v6 }
  0x41   :  { %1051 = vmatpush3.bf16.msra.mxu1 %v1161_v5 }
  0x42   :  { %769 = vmatmul.mubr.bf16.vlgmr.msra.gmra.mrb[4].mxu0 %v1158_v3 }
  0x43   :  { %1083 = vmatprep.mubr.msk.bf16.mxu0 %vm1175_vm0, %v1174_v6  ;;  %1068 = vmatpush3.bf16.msra.mxu0 %v1165_v9 }
  0x44   :  { %810 = vmatmul.mubr.bf16.vlgmr.msra.gmra.mrb[4].mxu1 %v1162_v7  ;;  %1069 = vmatprep.subr.bf16.mxu0 %v1174_v6 }
  0x47   :  { %1070 = vmatpush3.bf16.msra.mxu0 %v1166_v10 }
  0x48   :  { %1071 = vmatprep.subr.bf16.mxu0 %v1174_v6 }
  0x4b   :  { %1072 = vmatpush3.bf16.msra.mxu0 %v1167_v11 }
  0x4c   :  { %1073 = vmatprep.subr.bf16.mxu0 %v1174_v6 }
  0x4f   :  { %1074 = vmatpush3.bf16.msra.mxu0 %v1168_v12 }
  0x50   :  { %1075 = vmatprep.subr.bf16.mxu0 %v1174_v6 }
  0x53   :  { %1076 = vmatpush3.bf16.msra.mxu0 %v1169_v13 }
  0x54   :  { %1077 = vmatprep.subr.bf16.mxu0 %v1174_v6 }
  0x57   :  { %1078 = vmatpush3.bf16.msra.mxu0 %v1170_v14 }
  0x58   :  { %1079 = vmatprep.subr.bf16.mxu0 %v1174_v6 }
  0x5b   :  { %1080 = vmatpush3.bf16.msra.mxu0 %v1171_v15 }
  0x5c   :  { %1081 = vmatprep.subr.bf16.mxu0 %v1174_v6 }
  0x5f   :  { %1082 = vmatpush3.bf16.msra.mxu0 %v1172_v16 }
  0x62   :  { %1084 = vmatmul.mubr.bf16.vlgmr.msra.gmra.mrb[8].mxu0 %v1173_v17 }
  0xf5   :  { %v986_v18 = vpop.f32.mrb[0].mxu0 }
  0xf6   :  { %v987_v20 = vpop.f32.mrb[1].mxu0 }
  0xf7   :  { %v988_v21 = vadd.f32 %v987_v20, %v986_v18  ;;  %v989_v22 = vpop.f32.mrb[2].mxu0  ;;  %v1008_v23 = vpop.f32.mrb[0].mxu1 }
  0xf8   :  { %v990_v24 = vpop.f32.mrb[3].mxu0  ;;  %v1009_v27 = vpop.f32.mrb[1].mxu1 }
  0xf9   :  { %v689_v25 = vadd.f32 %v988_v21, %v879_v19  ;;  %v991_v26 = vadd.f32 %v990_v24, %v989_v22  ;;  %v1010_v28 = vadd.f32 %v1009_v27, %v1008_v23  ;;  %v1011_v29 = vpop.f32.mrb[2].mxu1 }
  0xfa   :  { %v1012_v31 = vpop.f32.mrb[3].mxu1 }
  0xfb   :  { %v692_v30 = vadd.f32 %v991_v26, %v879_v19  ;;  %v730_v32 = vadd.f32 %v1010_v28, %v689_v25  ;;  %v1013_v33 = vadd.f32 %v1012_v31, %v1011_v29 }
  0xfd   :  { %v733_v34 = vadd.f32 %v1013_v33, %v692_v30 }
 0x115   :  { %v1030_v35 = vpop.f32.mrb[4].mxu0 }
 0x116   :  { %v1031_v36 = vpop.f32.mrb[5].mxu0 }
 0x117   :  { %v1032_v37 = vadd.f32 %v1031_v36, %v1030_v35  ;;  %v1033_v38 = vpop.f32.mrb[6].mxu0  ;;  %v1052_v39 = vpop.f32.mrb[4].mxu1 }
 0x118   :  { %v1034_v40 = vpop.f32.mrb[7].mxu0  ;;  %v1053_v43 = vpop.f32.mrb[5].mxu1 }
 0x119   :  { %v771_v41 = vadd.f32 %v1032_v37, %v730_v32  ;;  %v1035_v42 = vadd.f32 %v1034_v40, %v1033_v38  ;;  %v1054_v44 = vadd.f32 %v1053_v43, %v1052_v39  ;;  %v1055_v45 = vpop.f32.mrb[6].mxu1 }
 0x11a   :  { %v1056_v47 = vpop.f32.mrb[7].mxu1 }
 0x11b   :  { %v774_v46 = vadd.f32 %v1035_v42, %v733_v34  ;;  %v1057_v48 = vadd.f32 %v1056_v47, %v1055_v45  ;;  %v812_v49 = vadd.f32 %v1054_v44, %v771_v41 }
 0x11d   :  { %v815_v50 = vadd.f32 %v1057_v48, %v774_v46 }
 0x135   :  { %v852_v51 = vpop.f32.mrb[8].mxu0 }
 0x136   :  { %v853_v52 = vadd.f32 %v852_v51, %v812_v49  ;;  %v1085_v53 = vpop.f32.mrb[9].mxu0 }
 0x137   :  { %v855_v54 = vpop.f32.mrb[10].mxu0 }
 0x138   :  { %v861_v55 = vmul.f32 0.2, %v853_v52  ;;  %v856_v56 = vadd.f32 %v855_v54, %v815_v50  ;;  %v1086_v57 = vpop.f32.mrb[11].mxu0  ;;  %vm859_vm1 = vcmp.ge.f32.partialorder %v853_v52, 0.0 }
 0x13a   :  { %vm860_vm2 = vcmp.ge.f32.partialorder %v856_v56, 0.0  ;;  %v862_v58 = vmul.f32 0.2, %v856_v56  ;;  %v863_v59 = vsel %vm859_vm1, %v853_v52, %v861_v55 }
 0x13c   :  { %v864_v60 = vsel %vm860_vm2, %v856_v56, %v862_v58 }
 0x13d   :  { %v968_v61 = vpack.c.bf16 %v864_v60, %v863_v59 }
 0x13f   :  { %969 = vst [vmem:[%s1448_s3] sm:$0xff] %v968_v61  }

// kernel: unet_forward.18
= control target key start
LH: loop header
LB: loop body
LE: loop exit
PB: predicated region body
PF: predicated region fallthrough
CT: control target
= control target key end

     0   :  { %vm372_vm0 = vcmask 523264   ;;  %s921_s1 = inlined_call_operand.vmem [shape: bf16[576,128], index: 1, kind: input, shape index: {}]   ;;  %s922_s0 = inlined_call_operand.vmem [shape: bf16[32,576], index: 0, kind: input, shape index: {}]   ;;  %s923_s2 = inlined_call_operand.vmem [shape: f32[1,128], index: 2, kind: input, shape index: {}]   ;;  %s924_s3 = inlined_call_operand.vmem [shape: bf16[32,128], index: 3, kind: output, shape index: {}]  }
   0x1   :  { %v704_v0 = vld [vmem:[%s921_s1 + $0x40] sm:$0xff]   ;;  %v708_v4 = vld [vmem:[%s921_s1 + $0x48] sm:$0xff]   ;;  %v712_v8 = vld [vmem:[%s921_s1 + $0x50] sm:$0xff]  }
   0x2   :  { %v705_v1 = vld [vmem:[%s921_s1] sm:$0xff]   ;;  %630 = vmatprep.subr.bf16.mxu0 %v704_v0  ;;  %v709_v5 = vld [vmem:[%s921_s1 + $0x8] sm:$0xff]   ;;  %v713_v9 = vld [vmem:[%s921_s1 + $0x10] sm:$0xff]  }
   0x3   :  { %v706_v2 = vld [vmem:[%s921_s1 + $0xc0] sm:$0xff]   ;;  %631 = vmatpush3.bf16.msra.mxu0 %v705_v1  ;;  %v710_v6 = vld [vmem:[%s921_s1 + $0xc8] sm:$0xff]   ;;  %v714_v10 = vld [vmem:[%s921_s1 + $0xd0] sm:$0xff]  }
   0x4   :  { %v707_v3 = vld [vmem:[%s921_s1 + $0x80] sm:$0xff]   ;;  %658 = vmatprep.subr.bf16.mxu1 %v706_v2  ;;  %632 = vmatprep.subr.bf16.mxu0 %v708_v4  ;;  %v711_v7 = vld [vmem:[%s921_s1 + $0x88] sm:$0xff]   ;;  %v715_v11 = vld [vmem:[%s921_s1 + $0x90] sm:$0xff]  }
   0x5   :  { %659 = vmatpush3.bf16.msra.mxu1 %v707_v3  ;;  %v716_v12 = vld [vmem:[%s921_s1 + $0x58] sm:$0xff]   ;;  %v720_v16 = vld [vmem:[%s921_s1 + $0x60] sm:$0xff]   ;;  %v724_v20 = vld [vmem:[%s921_s1 + $0x68] sm:$0xff]  }
   0x6   :  { %660 = vmatprep.subr.bf16.mxu1 %v710_v6  ;;  %v717_v13 = vld [vmem:[%s921_s1 + $0x18] sm:$0xff]   ;;  %v721_v17 = vld [vmem:[%s921_s1 + $0x20] sm:$0xff]   ;;  %v725_v21 = vld [vmem:[%s921_s1 + $0x28] sm:$0xff]  }
   0x7   :  { %633 = vmatpush3.bf16.msra.mxu0 %v709_v5  ;;  %v718_v14 = vld [vmem:[%s921_s1 + $0xd8] sm:$0xff]   ;;  %v722_v18 = vld [vmem:[%s921_s1 + $0xe0] sm:$0xff]   ;;  %v726_v22 = vld [vmem:[%s921_s1 + $0xe8] sm:$0xff]  }
   0x8   :  { %634 = vmatprep.subr.bf16.mxu0 %v712_v8  ;;  %v719_v15 = vld [vmem:[%s921_s1 + $0x98] sm:$0xff]   ;;  %v723_v19 = vld [vmem:[%s921_s1 + $0xa0] sm:$0xff]   ;;  %v727_v23 = vld [vmem:[%s921_s1 + $0xa8] sm:$0xff]  }
   0x9   :  { %661 = vmatpush3.bf16.msra.mxu1 %v711_v7  ;;  %v728_v24 = vld [vmem:[%s921_s1 + $0x70] sm:$0xff]   ;;  %v732_v28 = vld [vmem:[%s921_s1 + $0x78] sm:$0xff]   ;;  %v739_v34 = vld [vmem:[%s921_s1 + $0x100] sm:$0xff]  }
   0xa   :  { %662 = vmatprep.subr.bf16.mxu1 %v714_v10  ;;  %v729_v25 = vld [vmem:[%s921_s1 + $0x30] sm:$0xff]   ;;  %v733_v29 = vld [vmem:[%s921_s1 + $0x38] sm:$0xff]   ;;  %v742_v36 = vld [vmem:[%s922_s0 + $0xc] ss:$20 sps:$4 sm:$0xff]  }
   0xb   :  { %635 = vmatpush3.bf16.msra.mxu0 %v713_v9  ;;  %v730_v26 = vld [vmem:[%s921_s1 + $0xf0] sm:$0xff]   ;;  %v734_v30 = vld [vmem:[%s921_s1 + $0xf8] sm:$0xff]   ;;  %v743_v37 = vld [vmem:[%s921_s1 + $0x108] sm:$0xff]   ;;  %460 = vmatprep.mubr.bf16.mxu1 %v742_v36 }
   0xc   :  { %636 = vmatprep.subr.bf16.mxu0 %v716_v12  ;;  %v731_v27 = vld [vmem:[%s921_s1 + $0xb0] sm:$0xff]   ;;  %v737_v32 = vld [vmem:[%s922_s0 + $0x4] ss:$20 sps:$4 sm:$0xff]   ;;  %v740_v35 = vld [vmem:[%s922_s0 + $0x8] ss:$20 sps:$4 sm:$0xff]  }
   0xd   :  { %663 = vmatpush3.bf16.msra.mxu1 %v715_v11  ;;  %v735_v31 = vld [vmem:[%s922_s0] ss:$20 sps:$4 sm:$0xff]   ;;  %v738_v33 = vld [vmem:[%s921_s1 + $0xb8] sm:$0xff]   ;;  %411 = vmatprep.mubr.bf16.mxu0 %v737_v32  ;;  %v750_v42 = vld [vmem:[%s922_s0 + $0x30] ss:$20 sps:$4 sm:$0xff]  }
   0xe   :  { %664 = vmatprep.subr.bf16.mxu1 %v718_v14  ;;  %v744_v38 = vld [vmem:[%s922_s0 + $0x2c] ss:$20 sps:$4 sm:$0xff]   ;;  %v746_v39 = vld [vmem:[%s922_s0 + $0x28] ss:$20 sps:$4 sm:$0xff]   ;;  %v747_v40 = vld [vmem:[%s921_s1 + $0x110] sm:$0xff]  }
   0xf   :  { %637 = vmatpush3.bf16.msra.mxu0 %v717_v13  ;;  %v748_v41 = vld [vmem:[%s922_s0 + $0x34] ss:$20 sps:$4 sm:$0xff]   ;;  %v751_v43 = vld [vmem:[%s921_s1 + $0x118] sm:$0xff]   ;;  %v752_v44 = vld [vmem:[%s922_s0 + $0x10] ss:$20 sps:$4 sm:$0xff]  }
  0x10   :  { %638 = vmatprep.subr.bf16.mxu0 %v720_v16  ;;  %v753_v45 = vld [vmem:[%s922_s0 + $0x38] ss:$20 sps:$4 sm:$0xff]   ;;  %v562_v47 = vld [vmem:[%s923_s2] ss:$0 sm:$0xff] }
  0x11   :  { %665 = vmatpush3.bf16.msra.mxu1 %v719_v15 }
  0x12   :  { %666 = vmatprep.subr.bf16.mxu1 %v722_v18 }
  0x13   :  { %639 = vmatpush3.bf16.msra.mxu0 %v721_v17 }
  0x14   :  { %640 = vmatprep.subr.bf16.mxu0 %v724_v20 }
  0x15   :  { %667 = vmatpush3.bf16.msra.mxu1 %v723_v19 }
  0x16   :  { %668 = vmatprep.subr.bf16.mxu1 %v726_v22 }
  0x17   :  { %641 = vmatpush3.bf16.msra.mxu0 %v725_v21 }
  0x18   :  { %642 = vmatprep.subr.bf16.mxu0 %v728_v24 }
  0x19   :  { %669 = vmatpush3.bf16.msra.mxu1 %v727_v23 }
  0x1a   :  { %670 = vmatprep.subr.bf16.mxu1 %v730_v26 }
  0x1b   :  { %643 = vmatpush3.bf16.msra.mxu0 %v729_v25 }
  0x1c   :  { %644 = vmatprep.subr.bf16.mxu0 %v732_v28 }
  0x1d   :  { %671 = vmatpush3.bf16.msra.mxu1 %v731_v27 }
  0x1e   :  { %672 = vmatprep.subr.bf16.mxu1 %v734_v30 }
  0x1f   :  { %645 = vmatpush3.bf16.msra.mxu0 %v733_v29 }
  0x20   :  { %692 = vmatprep.subr.bf16.mxu0 %v739_v34 }
  0x21   :  { %673 = vmatpush3.bf16.msra.mxu1 %v738_v33 }
  0x22   :  { %412 = vmatmul.mubr.bf16.vlgmr.msra.gmra.mrb[0].mxu0 %v735_v31 }
  0x23   :  { %693 = vmatpush3.bf16.msra.mxu0 %v739_v34  ;;  %419 = vmatprep.mubr.bf16.mxu0 %v744_v38 }
  0x24   :  { %461 = vmatmul.mubr.bf16.vlgmr.msra.gmra.mrb[0].mxu1 %v740_v35  ;;  %694 = vmatprep.subr.bf16.mxu0 %v743_v37 }
  0x25   :  { %468 = vmatprep.mubr.bf16.mxu1 %v748_v41 }
  0x27   :  { %695 = vmatpush3.bf16.msra.mxu0 %v743_v37 }
  0x28   :  { %696 = vmatprep.subr.bf16.mxu0 %v747_v40 }
  0x2a   :  { %420 = vmatmul.mubr.bf16.gmra.mrb[4].mxu0 %v746_v39 }
  0x2b   :  { %700 = vmatprep.mubr.msk.bf16.mxu0 %vm372_vm0, %v752_v44  ;;  %697 = vmatpush3.bf16.msra.mxu0 %v747_v40 }
  0x2c   :  { %469 = vmatmul.mubr.bf16.gmra.mrb[4].mxu1 %v750_v42  ;;  %698 = vmatprep.subr.bf16.mxu0 %v751_v43 }
  0x2f   :  { %699 = vmatpush3.bf16.msra.mxu0 %v751_v43 }
  0x32   :  { %701 = vmatmul.mubr.msk.bf16.vlgmr.msra.gmra.mrb[8].mxu0 %vm372_vm0, %v753_v45 }
  0xf5   :  { %v646_v46 = vpop.f32.mrb[0].mxu0 }
  0xf6   :  { %v647_v48 = vpop.f32.mrb[1].mxu0 }
  0xf7   :  { %v648_v49 = vadd.f32 %v647_v48, %v646_v46  ;;  %v649_v50 = vpop.f32.mrb[2].mxu0  ;;  %v674_v51 = vpop.f32.mrb[0].mxu1 }
  0xf8   :  { %v650_v52 = vpop.f32.mrb[3].mxu0  ;;  %v675_v55 = vpop.f32.mrb[1].mxu1 }
  0xf9   :  { %v414_v53 = vadd.f32 %v648_v49, %v562_v47  ;;  %v651_v54 = vadd.f32 %v650_v52, %v649_v50  ;;  %v676_v56 = vadd.f32 %v675_v55, %v674_v51  ;;  %v677_v57 = vpop.f32.mrb[2].mxu1 }
  0xfa   :  { %v678_v59 = vpop.f32.mrb[3].mxu1 }
  0xfb   :  { %v417_v58 = vadd.f32 %v651_v54, %v562_v47  ;;  %v679_v60 = vadd.f32 %v678_v59, %v677_v57  ;;  %v463_v61 = vadd.f32 %v676_v56, %v414_v53 }
  0xfd   :  { %v652_v62 = vpop.f32.mrb[4].mxu0  ;;  %v466_v0 = vadd.f32 %v679_v60, %v417_v58 }
  0xfe   :  { %v653_v63 = vpop.f32.mrb[5].mxu0 }
  0xff   :  { %v654_v1 = vadd.f32 %v653_v63, %v652_v62  ;;  %v655_v2 = vpop.f32.mrb[6].mxu0  ;;  %v680_v3 = vpop.f32.mrb[4].mxu1 }
 0x100   :  { %v656_v4 = vpop.f32.mrb[7].mxu0  ;;  %v681_v7 = vpop.f32.mrb[5].mxu1 }
 0x101   :  { %v422_v5 = vadd.f32 %v654_v1, %v562_v47  ;;  %v657_v6 = vadd.f32 %v656_v4, %v655_v2  ;;  %v682_v8 = vadd.f32 %v681_v7, %v680_v3  ;;  %v683_v9 = vpop.f32.mrb[6].mxu1 }
 0x102   :  { %v684_v11 = vpop.f32.mrb[7].mxu1 }
 0x103   :  { %v425_v10 = vadd.f32 %v657_v6, %v562_v47  ;;  %v685_v12 = vadd.f32 %v684_v11, %v683_v9  ;;  %v471_v13 = vadd.f32 %v682_v8, %v422_v5 }
 0x105   :  { %v702_v14 = vpop.f32.mrb[8].mxu0  ;;  %v474_v15 = vadd.f32 %v685_v12, %v425_v10 }
 0x106   :  { %v520_v16 = vadd.f32 %v702_v14, %v471_v13  ;;  %v511_v17 = vpop.f32.mrb[9].mxu0 }
 0x107   :  { %v512_v18 = vadd.f32 %v511_v17, %v463_v61  ;;  %v703_v19 = vpop.f32.mrb[10].mxu0 }
 0x108   :  { %v532_v20 = vmul.f32 0.2, %v520_v16  ;;  %v523_v21 = vadd.f32 %v703_v19, %v474_v15  ;;  %v514_v22 = vpop.f32.mrb[11].mxu0  ;;  %vm528_vm1 = vcmp.ge.f32.partialorder %v520_v16, 0.0 }
 0x109   :  { %v530_v23 = vmul.f32 0.2, %v512_v18  ;;  %v515_v24 = vadd.f32 %v514_v22, %v466_v0  ;;  %vm526_vm2 = vcmp.ge.f32.partialorder %v512_v18, 0.0 }
 0x10a   :  { %vm529_vm3 = vcmp.ge.f32.partialorder %v523_v21, 0.0  ;;  %v533_v25 = vmul.f32 0.2, %v523_v21  ;;  %v536_v27 = vsel %vm528_vm1, %v520_v16, %v532_v20 }
 0x10b   :  { %vm527_vm4 = vcmp.ge.f32.partialorder %v515_v24, 0.0  ;;  %v531_v26 = vmul.f32 0.2, %v515_v24  ;;  %v534_v29 = vsel %vm526_vm2, %v512_v18, %v530_v23 }
 0x10c   :  { %v537_v28 = vsel %vm529_vm3, %v523_v21, %v533_v25 }
 0x10d   :  { %v627_v30 = vpack.c.bf16 %v537_v28, %v536_v27  ;;  %v535_v31 = vsel %vm527_vm4, %v515_v24, %v531_v26 }
 0x10e   :  { %v622_v32 = vpack.c.bf16 %v535_v31, %v534_v29 }
 0x10f   :  { %629 = vst [vmem:[%s924_s3 + $0x8] sm:$0xff] %v627_v30  }
 0x110   :  { %623 = vst [vmem:[%s924_s3] sm:$0xff] %v622_v32  }

// kernel: unet_forward.19
= control target key start
LH: loop header
LB: loop body
LE: loop exit
PB: predicated region body
PF: predicated region fallthrough
CT: control target
= control target key end

     0   :  { %vm558_vm0 = vcmask 523264   ;;  %s1774_s1 = inlined_call_operand.vmem [shape: bf16[576,128], index: 1, kind: input, shape index: {}]   ;;  %s1775_s0 = inlined_call_operand.vmem [shape: bf16[128,576], index: 0, kind: input, shape index: {}]   ;;  %s1776_s2 = inlined_call_operand.vmem [shape: f32[1,128], index: 2, kind: input, shape index: {}]   ;;  %s1777_s3 = inlined_call_operand.vmem [shape: bf16[128,128], index: 3, kind: output, shape index: {}]  }
   0x1   :  { %v1342_v0 = vld [vmem:[%s1774_s1 + $0x40] sm:$0xff]   ;;  %v1346_v4 = vld [vmem:[%s1774_s1 + $0x48] sm:$0xff]   ;;  %v1350_v8 = vld [vmem:[%s1774_s1 + $0x50] sm:$0xff]  }
   0x2   :  { %v1343_v1 = vld [vmem:[%s1774_s1 + $0xc0] sm:$0xff]   ;;  %1170 = vmatprep.subr.bf16.mxu0 %v1342_v0  ;;  %v1347_v5 = vld [vmem:[%s1774_s1 + $0xc8] sm:$0xff]   ;;  %v1351_v9 = vld [vmem:[%s1774_s1 + $0xd0] sm:$0xff]  }
   0x3   :  { %v1344_v2 = vld [vmem:[%s1774_s1] sm:$0xff]   ;;  %1234 = vmatprep.subr.bf16.mxu1 %v1343_v1  ;;  %v1348_v6 = vld [vmem:[%s1774_s1 + $0x8] sm:$0xff]   ;;  %v1352_v10 = vld [vmem:[%s1774_s1 + $0x10] sm:$0xff]  }
   0x4   :  { %v1345_v3 = vld [vmem:[%s1774_s1 + $0x80] sm:$0xff]   ;;  %1171 = vmatpush3.bf16.msra.mxu0 %v1344_v2  ;;  %v1349_v7 = vld [vmem:[%s1774_s1 + $0x88] sm:$0xff]   ;;  %v1353_v11 = vld [vmem:[%s1774_s1 + $0x90] sm:$0xff]  }
   0x5   :  { %1235 = vmatpush3.bf16.msra.mxu1 %v1345_v3  ;;  %1172 = vmatprep.subr.bf16.mxu0 %v1346_v4  ;;  %v1354_v12 = vld [vmem:[%s1774_s1 + $0x58] sm:$0xff]   ;;  %v1358_v16 = vld [vmem:[%s1774_s1 + $0x60] sm:$0xff]   ;;  %v1362_v20 = vld [vmem:[%s1774_s1 + $0x68] sm:$0xff]  }
   0x6   :  { %1236 = vmatprep.subr.bf16.mxu1 %v1347_v5  ;;  %v1355_v13 = vld [vmem:[%s1774_s1 + $0xd8] sm:$0xff]   ;;  %v1359_v17 = vld [vmem:[%s1774_s1 + $0xe0] sm:$0xff]   ;;  %v1363_v21 = vld [vmem:[%s1774_s1 + $0xe8] sm:$0xff]  }
   0x7   :  { %v1356_v14 = vld [vmem:[%s1774_s1 + $0x18] sm:$0xff]   ;;  %v1360_v18 = vld [vmem:[%s1774_s1 + $0x20] sm:$0xff]   ;;  %v1364_v22 = vld [vmem:[%s1774_s1 + $0x28] sm:$0xff]  }
   0x8   :  { %1173 = vmatpush3.bf16.msra.mxu0 %v1348_v6  ;;  %v1357_v15 = vld [vmem:[%s1774_s1 + $0x98] sm:$0xff]   ;;  %v1361_v19 = vld [vmem:[%s1774_s1 + $0xa0] sm:$0xff]   ;;  %v1365_v23 = vld [vmem:[%s1774_s1 + $0xa8] sm:$0xff]  }
   0x9   :  { %1237 = vmatpush3.bf16.msra.mxu1 %v1349_v7  ;;  %1174 = vmatprep.subr.bf16.mxu0 %v1350_v8  ;;  %v1366_v24 = vld [vmem:[%s1774_s1 + $0x70] sm:$0xff]   ;;  %v1370_v28 = vld [vmem:[%s1774_s1 + $0x78] sm:$0xff]   ;;  %v1379_v35 = vld [vmem:[%s1775_s0 + $0xc] ss:$20 sps:$4 sm:$0xff]  }
   0xa   :  { %1238 = vmatprep.subr.bf16.mxu1 %v1351_v9  ;;  %v1367_v25 = vld [vmem:[%s1774_s1 + $0xf0] sm:$0xff]   ;;  %v1371_v29 = vld [vmem:[%s1774_s1 + $0xf8] sm:$0xff]   ;;  %v1380_v36 = vld [vmem:[%s1774_s1 + $0x100] sm:$0xff]   ;;  %712 = vmatprep.mubr.bf16.mxu1 %v1379_v35 }
   0xb   :  { %v1368_v26 = vld [vmem:[%s1774_s1 + $0x30] sm:$0xff]   ;;  %v1372_v30 = vld [vmem:[%s1774_s1 + $0x38] sm:$0xff]   ;;  %v1381_v37 = vld [vmem:[%s1775_s0 + $0x2c] ss:$20 sps:$4 sm:$0xff]  }
   0xc   :  { %1175 = vmatpush3.bf16.msra.mxu0 %v1352_v10  ;;  %v1369_v27 = vld [vmem:[%s1774_s1 + $0xb0] sm:$0xff]   ;;  %v1373_v31 = vld [vmem:[%s1774_s1 + $0xb8] sm:$0xff]   ;;  %v1393_v42 = vld [vmem:[%s1774_s1 + $0x108] sm:$0xff]  }
   0xd   :  { %1239 = vmatpush3.bf16.msra.mxu1 %v1353_v11  ;;  %1176 = vmatprep.subr.bf16.mxu0 %v1354_v12  ;;  %v1374_v32 = vld [vmem:[%s1775_s0] ss:$20 sps:$4 sm:$0xff]   ;;  %v1376_v33 = vld [vmem:[%s1775_s0 + $0x4] ss:$20 sps:$4 sm:$0xff]   ;;  %v1377_v34 = vld [vmem:[%s1775_s0 + $0x8] ss:$20 sps:$4 sm:$0xff]  }
   0xe   :  { %1240 = vmatprep.subr.bf16.mxu1 %v1355_v13  ;;  %615 = vmatprep.mubr.bf16.mxu0 %v1376_v33  ;;  %v1383_v38 = vld [vmem:[%s1775_s0 + $0x34] ss:$20 sps:$4 sm:$0xff]   ;;  %v1386_v40 = vld [vmem:[%s1775_s0 + $0x30] ss:$20 sps:$4 sm:$0xff]   ;;  %v1392_v45 = vld [vmem:[%s1775_s0 + $0x58] ss:$20 sps:$4 sm:$0xff]  }
   0xf   :  { %v1385_v39 = vld [vmem:[%s1775_s0 + $0x28] ss:$20 sps:$4 sm:$0xff]   ;;  %v1391_v44 = vld [vmem:[%s1775_s0 + $0x50] ss:$20 sps:$4 sm:$0xff]   ;;  %v1398_v50 = vld [vmem:[%s1775_s0 + $0x78] ss:$20 sps:$4 sm:$0xff]  }
  0x10   :  { %1177 = vmatpush3.bf16.msra.mxu0 %v1356_v14  ;;  %v1387_v41 = vld [vmem:[%s1775_s0 + $0x54] ss:$20 sps:$4 sm:$0xff]   ;;  %v1389_v43 = vld [vmem:[%s1775_s0 + $0x5c] ss:$20 sps:$4 sm:$0xff]   ;;  %v1396_v48 = vld [vmem:[%s1775_s0 + $0x84] ss:$20 sps:$4 sm:$0xff]  }
  0x11   :  { %1241 = vmatpush3.bf16.msra.mxu1 %v1357_v15  ;;  %1178 = vmatprep.subr.bf16.mxu0 %v1358_v16  ;;  %v1406_v46 = vld [vmem:[%s1774_s1 + $0x110] sm:$0xff]   ;;  %v1419_v49 = vld [vmem:[%s1774_s1 + $0x118] sm:$0xff]   ;;  %v1402_v53 = vld [vmem:[%s1775_s0 + $0xac] ss:$20 sps:$4 sm:$0xff]  }
  0x12   :  { %1242 = vmatprep.subr.bf16.mxu1 %v1359_v17  ;;  %v1394_v47 = vld [vmem:[%s1775_s0 + $0x7c] ss:$20 sps:$4 sm:$0xff]   ;;  %v1399_v51 = vld [vmem:[%s1775_s0 + $0x80] ss:$20 sps:$4 sm:$0xff]   ;;  %v1400_v52 = vld [vmem:[%s1775_s0 + $0xa4] ss:$20 sps:$4 sm:$0xff]  }
  0x13   :  { %v1404_v54 = vld [vmem:[%s1775_s0 + $0xa0] ss:$20 sps:$4 sm:$0xff]   ;;  %v1405_v55 = vld [vmem:[%s1775_s0 + $0xa8] ss:$20 sps:$4 sm:$0xff]   ;;  %v1412_v59 = vld [vmem:[%s1775_s0 + $0xd0] ss:$20 sps:$4 sm:$0xff]  }
  0x14   :  { %1179 = vmatpush3.bf16.msra.mxu0 %v1360_v18  ;;  %v1407_v56 = vld [vmem:[%s1775_s0 + $0xcc] ss:$20 sps:$4 sm:$0xff]   ;;  %v1409_v57 = vld [vmem:[%s1775_s0 + $0xd4] ss:$20 sps:$4 sm:$0xff]   ;;  %v1415_v61 = vld [vmem:[%s1775_s0 + $0xfc] ss:$20 sps:$4 sm:$0xff]  }
  0x15   :  { %1243 = vmatpush3.bf16.msra.mxu1 %v1361_v19  ;;  %1180 = vmatprep.subr.bf16.mxu0 %v1362_v20  ;;  %v1411_v58 = vld [vmem:[%s1775_s0 + $0xc8] ss:$20 sps:$4 sm:$0xff]   ;;  %v1417_v62 = vld [vmem:[%s1775_s0 + $0xf0] ss:$20 sps:$4 sm:$0xff]   ;;  %v1418_v63 = vld [vmem:[%s1775_s0 + $0xf8] ss:$20 sps:$4 sm:$0xff]  }
  0x16   :  { %1244 = vmatprep.subr.bf16.mxu1 %v1363_v21  ;;  %v1413_v60 = vld [vmem:[%s1775_s0 + $0xf4] ss:$20 sps:$4 sm:$0xff]   ;;  %v1420_v0 = vld [vmem:[%s1775_s0 + $0x11c] ss:$20 sps:$4 sm:$0xff]   ;;  %v1422_v1 = vld [vmem:[%s1775_s0 + $0x124] ss:$20 sps:$4 sm:$0xff]  }
  0x17   :  { %v1424_v2 = vld [vmem:[%s1775_s0 + $0x118] ss:$20 sps:$4 sm:$0xff]   ;;  %v1425_v3 = vld [vmem:[%s1775_s0 + $0x120] ss:$20 sps:$4 sm:$0xff]   ;;  %v1426_v4 = vld [vmem:[%s1775_s0 + $0x10] ss:$20 sps:$4 sm:$0xff]  }
  0x18   :  { %1181 = vmatpush3.bf16.msra.mxu0 %v1364_v22  ;;  %v1427_v5 = vld [vmem:[%s1775_s0 + $0xb0] ss:$20 sps:$4 sm:$0xff]   ;;  %v1428_v6 = vld [vmem:[%s1775_s0 + $0x38] ss:$20 sps:$4 sm:$0xff]   ;;  %v1430_v8 = vld [vmem:[%s1775_s0 + $0x60] ss:$20 sps:$4 sm:$0xff]  }
  0x19   :  { %1245 = vmatpush3.bf16.msra.mxu1 %v1365_v23  ;;  %1182 = vmatprep.subr.bf16.mxu0 %v1366_v24  ;;  %v1429_v7 = vld [vmem:[%s1775_s0 + $0xd8] ss:$20 sps:$4 sm:$0xff]   ;;  %v1431_v9 = vld [vmem:[%s1775_s0 + $0x100] ss:$20 sps:$4 sm:$0xff]   ;;  %v1432_v10 = vld [vmem:[%s1775_s0 + $0x88] ss:$20 sps:$4 sm:$0xff]  }
  0x1a   :  { %1246 = vmatprep.subr.bf16.mxu1 %v1367_v25  ;;  %v1433_v11 = vld [vmem:[%s1775_s0 + $0x128] ss:$20 sps:$4 sm:$0xff]   ;;  %v1693_v14 = vld [vmem:[%s1776_s2] ss:$0 sm:$0xff] }
  0x1c   :  { %1183 = vmatpush3.bf16.msra.mxu0 %v1368_v26 }
  0x1d   :  { %1247 = vmatpush3.bf16.msra.mxu1 %v1369_v27  ;;  %1184 = vmatprep.subr.bf16.mxu0 %v1370_v28 }
  0x1e   :  { %1248 = vmatprep.subr.bf16.mxu1 %v1371_v29 }
  0x20   :  { %1185 = vmatpush3.bf16.msra.mxu0 %v1372_v30 }
  0x21   :  { %1249 = vmatpush3.bf16.msra.mxu1 %v1373_v31  ;;  %1310 = vmatprep.subr.bf16.mxu0 %v1380_v36 }
  0x22   :  { %1334 = vmatprep.subr.bf16.mxu1 %v1380_v36 }
  0x23   :  { %616 = vmatmul.mubr.bf16.vlgmr.msra.gmra.mrb[0].mxu0 %v1374_v32 }
  0x24   :  { %713 = vmatmul.mubr.bf16.vlgmr.msra.gmra.mrb[0].mxu1 %v1377_v34  ;;  %1311 = vmatpush3.bf16.msra.mxu0 %v1380_v36 }
  0x25   :  { %1338 = vmatpush3.bf16.msra.mxu1 %v1380_v36  ;;  %623 = vmatprep.mubr.bf16.mxu0 %v1381_v37 }
  0x26   :  { %720 = vmatprep.mubr.bf16.mxu1 %v1383_v38  ;;  %1312 = vmatprep.subr.bf16.mxu0 %v1393_v42 }
  0x27   :  { %1335 = vmatprep.subr.bf16.mxu1 %v1393_v42 }
  0x28   :  { %1313 = vmatpush3.bf16.msra.mxu0 %v1393_v42 }
  0x29   :  { %1339 = vmatpush3.bf16.msra.mxu1 %v1393_v42  ;;  %1314 = vmatprep.subr.bf16.mxu0 %v1406_v46 }
  0x2a   :  { %1336 = vmatprep.subr.bf16.mxu1 %v1406_v46 }
  0x2b   :  { %624 = vmatmul.mubr.bf16.gmra.mrb[4].mxu0 %v1385_v39 }
  0x2c   :  { %721 = vmatmul.mubr.bf16.gmra.mrb[4].mxu1 %v1386_v40  ;;  %631 = vmatprep.mubr.bf16.mxu0 %v1387_v41 }
  0x2d   :  { %728 = vmatprep.mubr.bf16.mxu1 %v1389_v43  ;;  %1315 = vmatpush3.bf16.msra.mxu0 %v1406_v46 }
  0x2e   :  { %1340 = vmatpush3.bf16.msra.mxu1 %v1406_v46  ;;  %1316 = vmatprep.subr.bf16.mxu0 %v1419_v49 }
  0x2f   :  { %1337 = vmatprep.subr.bf16.mxu1 %v1419_v49 }
  0x31   :  { %1317 = vmatpush3.bf16.msra.mxu0 %v1419_v49 }
  0x32   :  { %1341 = vmatpush3.bf16.msra.mxu1 %v1419_v49 }
  0x33   :  { %632 = vmatmul.mubr.bf16.gmra.mrb[8].mxu0 %v1391_v44 }
  0x34   :  { %729 = vmatmul.mubr.bf16.gmra.mrb[8].mxu1 %v1392_v45  ;;  %639 = vmatprep.mubr.bf16.mxu0 %v1394_v47 }
  0x35   :  { %736 = vmatprep.mubr.bf16.mxu1 %v1396_v48 }
  0x3b   :  { %640 = vmatmul.mubr.bf16.gmra.mrb[12].mxu0 %v1398_v50 }
  0x3c   :  { %737 = vmatmul.mubr.bf16.gmra.mrb[12].mxu1 %v1399_v51  ;;  %647 = vmatprep.mubr.bf16.mxu0 %v1400_v52 }
  0x3d   :  { %744 = vmatprep.mubr.bf16.mxu1 %v1402_v53 }
  0x43   :  { %648 = vmatmul.mubr.bf16.gmra.mrb[16].mxu0 %v1404_v54 }
  0x44   :  { %745 = vmatmul.mubr.bf16.gmra.mrb[16].mxu1 %v1405_v55  ;;  %655 = vmatprep.mubr.bf16.mxu0 %v1407_v56 }
  0x45   :  { %752 = vmatprep.mubr.bf16.mxu1 %v1409_v57 }
  0x4b   :  { %656 = vmatmul.mubr.bf16.gmra.mrb[20].mxu0 %v1411_v58 }
  0x4c   :  { %753 = vmatmul.mubr.bf16.gmra.mrb[20].mxu1 %v1412_v59  ;;  %663 = vmatprep.mubr.bf16.mxu0 %v1413_v60 }
  0x4d   :  { %760 = vmatprep.mubr.bf16.mxu1 %v1415_v61 }
  0x53   :  { %664 = vmatmul.mubr.bf16.gmra.mrb[24].mxu0 %v1417_v62 }
  0x54   :  { %761 = vmatmul.mubr.bf16.gmra.mrb[24].mxu1 %v1418_v63  ;;  %671 = vmatprep.mubr.bf16.mxu0 %v1420_v0 }
  0x55   :  { %768 = vmatprep.mubr.bf16.mxu1 %v1422_v1 }
  0x5b   :  { %672 = vmatmul.mubr.bf16.gmra.mrb[28].mxu0 %v1424_v2 }
  0x5c   :  { %769 = vmatmul.mubr.bf16.gmra.mrb[28].mxu1 %v1425_v3  ;;  %1318 = vmatprep.mubr.msk.bf16.mxu0 %vm558_vm0, %v1426_v4 }
  0x5d   :  { %1326 = vmatprep.mubr.msk.bf16.mxu1 %vm558_vm0, %v1427_v5 }
  0x63   :  { %1319 = vmatmul.mubr.msk.bf16.vlgmr.msra.gmra.mrb[32].mxu0 %vm558_vm0, %v1428_v6 }
  0x64   :  { %1327 = vmatmul.mubr.msk.bf16.vlgmr.msra.gmra.mrb[32].mxu1 %vm558_vm0, %v1429_v7  ;;  %1322 = vmatprep.mubr.msk.bf16.mxu0 %vm558_vm0, %v1430_v8 }
  0x65   :  { %1330 = vmatprep.mubr.msk.bf16.mxu1 %vm558_vm0, %v1431_v9 }
  0x6b   :  { %1323 = vmatmul.mubr.msk.bf16.gmra.mrb[36].mxu0 %vm558_vm0, %v1432_v10 }
  0x6c   :  { %1331 = vmatmul.mubr.msk.bf16.gmra.mrb[36].mxu1 %vm558_vm0, %v1433_v11 }
  0xf6   :  { %v1186_v12 = vpop.f32.mrb[0].mxu0 }
  0xf7   :  { %v1250_v13 = vpop.f32.mrb[0].mxu1  ;;  %v1187_v15 = vpop.f32.mrb[1].mxu0 }
  0xf8   :  { %v1188_v16 = vadd.f32 %v1187_v15, %v1186_v12  ;;  %v1251_v17 = vpop.f32.mrb[1].mxu1  ;;  %v1189_v18 = vpop.f32.mrb[2].mxu0 }
  0xf9   :  { %v1252_v19 = vadd.f32 %v1251_v17, %v1250_v13  ;;  %v1253_v20 = vpop.f32.mrb[2].mxu1  ;;  %v1190_v21 = vpop.f32.mrb[3].mxu0 }
  0xfa   :  { %v618_v22 = vadd.f32 %v1188_v16, %v1693_v14  ;;  %v1191_v23 = vadd.f32 %v1190_v21, %v1189_v18  ;;  %v1254_v24 = vpop.f32.mrb[3].mxu1 }
  0xfb   :  { %v1255_v25 = vadd.f32 %v1254_v24, %v1253_v20 }
  0xfc   :  { %v621_v26 = vadd.f32 %v1191_v23, %v1693_v14  ;;  %v1697_v27 = vadd.f32 %v1252_v19, %v618_v22 }
  0xfe   :  { %v1192_v28 = vpop.f32.mrb[4].mxu0  ;;  %v1699_v29 = vadd.f32 %v1255_v25, %v621_v26 }
  0xff   :  { %v1256_v30 = vpop.f32.mrb[4].mxu1  ;;  %v1193_v31 = vpop.f32.mrb[5].mxu0 }
 0x100   :  { %v1194_v32 = vadd.f32 %v1193_v31, %v1192_v28  ;;  %v1257_v33 = vpop.f32.mrb[5].mxu1  ;;  %v1195_v34 = vpop.f32.mrb[6].mxu0 }
 0x101   :  { %v1258_v35 = vadd.f32 %v1257_v33, %v1256_v30  ;;  %v1259_v36 = vpop.f32.mrb[6].mxu1  ;;  %v1196_v37 = vpop.f32.mrb[7].mxu0 }
 0x102   :  { %v626_v38 = vadd.f32 %v1194_v32, %v1693_v14  ;;  %v1197_v39 = vadd.f32 %v1196_v37, %v1195_v34  ;;  %v1260_v40 = vpop.f32.mrb[7].mxu1 }
 0x103   :  { %v1261_v41 = vadd.f32 %v1260_v40, %v1259_v36 }
 0x104   :  { %v629_v42 = vadd.f32 %v1197_v39, %v1693_v14  ;;  %v1703_v43 = vadd.f32 %v1258_v35, %v626_v38 }
 0x106   :  { %v1198_v44 = vpop.f32.mrb[8].mxu0  ;;  %v1705_v45 = vadd.f32 %v1261_v41, %v629_v42 }
 0x107   :  { %v1262_v46 = vpop.f32.mrb[8].mxu1  ;;  %v1199_v47 = vpop.f32.mrb[9].mxu0 }
 0x108   :  { %v1200_v48 = vadd.f32 %v1199_v47, %v1198_v44  ;;  %v1263_v49 = vpop.f32.mrb[9].mxu1  ;;  %v1201_v50 = vpop.f32.mrb[10].mxu0 }
 0x109   :  { %v1264_v51 = vadd.f32 %v1263_v49, %v1262_v46  ;;  %v1265_v52 = vpop.f32.mrb[10].mxu1  ;;  %v1202_v53 = vpop.f32.mrb[11].mxu0 }
 0x10a   :  { %v634_v54 = vadd.f32 %v1200_v48, %v1693_v14  ;;  %v1203_v55 = vadd.f32 %v1202_v53, %v1201_v50  ;;  %v1266_v56 = vpop.f32.mrb[11].mxu1 }
 0x10b   :  { %v1267_v57 = vadd.f32 %v1266_v56, %v1265_v52 }
 0x10c   :  { %v637_v58 = vadd.f32 %v1203_v55, %v1693_v14  ;;  %v1709_v59 = vadd.f32 %v1264_v51, %v634_v54 }
 0x10e   :  { %v1204_v60 = vpop.f32.mrb[12].mxu0  ;;  %v1711_v61 = vadd.f32 %v1267_v57, %v637_v58 }
 0x10f   :  { %v1268_v62 = vpop.f32.mrb[12].mxu1  ;;  %v1205_v63 = vpop.f32.mrb[13].mxu0 }
 0x110   :  { %v1206_v0 = vadd.f32 %v1205_v63, %v1204_v60  ;;  %v1269_v1 = vpop.f32.mrb[13].mxu1  ;;  %v1207_v2 = vpop.f32.mrb[14].mxu0 }
 0x111   :  { %v1270_v3 = vadd.f32 %v1269_v1, %v1268_v62  ;;  %v1271_v4 = vpop.f32.mrb[14].mxu1  ;;  %v1208_v5 = vpop.f32.mrb[15].mxu0 }
 0x112   :  { %v642_v6 = vadd.f32 %v1206_v0, %v1693_v14  ;;  %v1209_v7 = vadd.f32 %v1208_v5, %v1207_v2  ;;  %v1272_v8 = vpop.f32.mrb[15].mxu1 }
 0x113   :  { %v1273_v9 = vadd.f32 %v1272_v8, %v1271_v4 }
 0x114   :  { %v645_v10 = vadd.f32 %v1209_v7, %v1693_v14  ;;  %v1715_v11 = vadd.f32 %v1270_v3, %v642_v6 }
 0x116   :  { %v1210_v12 = vpop.f32.mrb[16].mxu0  ;;  %v1717_v13 = vadd.f32 %v1273_v9, %v645_v10 }
 0x117   :  { %v1274_v15 = vpop.f32.mrb[16].mxu1  ;;  %v1211_v16 = vpop.f32.mrb[17].mxu0 }
 0x118   :  { %v1212_v17 = vadd.f32 %v1211_v16, %v1210_v12  ;;  %v1275_v18 = vpop.f32.mrb[17].mxu1  ;;  %v1213_v19 = vpop.f32.mrb[18].mxu0 }
 0x119   :  { %v1276_v20 = vadd.f32 %v1275_v18, %v1274_v15  ;;  %v1277_v21 = vpop.f32.mrb[18].mxu1  ;;  %v1214_v22 = vpop.f32.mrb[19].mxu0 }
 0x11a   :  { %v650_v23 = vadd.f32 %v1212_v17, %v1693_v14  ;;  %v1215_v24 = vadd.f32 %v1214_v22, %v1213_v19  ;;  %v1278_v25 = vpop.f32.mrb[19].mxu1 }
 0x11b   :  { %v1279_v26 = vadd.f32 %v1278_v25, %v1277_v21 }
 0x11c   :  { %v653_v28 = vadd.f32 %v1215_v24, %v1693_v14  ;;  %v747_v30 = vadd.f32 %v1276_v20, %v650_v23 }
 0x11e   :  { %v1216_v31 = vpop.f32.mrb[20].mxu0  ;;  %v1721_v32 = vadd.f32 %v1279_v26, %v653_v28 }
 0x11f   :  { %v1280_v33 = vpop.f32.mrb[20].mxu1  ;;  %v1217_v34 = vpop.f32.mrb[21].mxu0 }
 0x120   :  { %v1218_v35 = vadd.f32 %v1217_v34, %v1216_v31  ;;  %v1281_v36 = vpop.f32.mrb[21].mxu1  ;;  %v1219_v37 = vpop.f32.mrb[22].mxu0 }
 0x121   :  { %v1282_v38 = vadd.f32 %v1281_v36, %v1280_v33  ;;  %v1283_v39 = vpop.f32.mrb[22].mxu1  ;;  %v1220_v40 = vpop.f32.mrb[23].mxu0 }
 0x122   :  { %v658_v41 = vadd.f32 %v1218_v35, %v1693_v14  ;;  %v1221_v42 = vadd.f32 %v1220_v40, %v1219_v37  ;;  %v1284_v44 = vpop.f32.mrb[23].mxu1 }
 0x123   :  { %v1285_v46 = vadd.f32 %v1284_v44, %v1283_v39 }
 0x124   :  { %v661_v47 = vadd.f32 %v1221_v42, %v1693_v14  ;;  %v755_v48 = vadd.f32 %v1282_v38, %v658_v41 }
 0x126   :  { %v1222_v49 = vpop.f32.mrb[24].mxu0  ;;  %v758_v50 = vadd.f32 %v1285_v46, %v661_v47 }
 0x127   :  { %v1286_v51 = vpop.f32.mrb[24].mxu1  ;;  %v1223_v52 = vpop.f32.mrb[25].mxu0 }
 0x128   :  { %v1224_v53 = vadd.f32 %v1223_v52, %v1222_v49  ;;  %v1287_v54 = vpop.f32.mrb[25].mxu1  ;;  %v1225_v55 = vpop.f32.mrb[26].mxu0 }
 0x129   :  { %v1288_v56 = vadd.f32 %v1287_v54, %v1286_v51  ;;  %v1289_v57 = vpop.f32.mrb[26].mxu1  ;;  %v1226_v58 = vpop.f32.mrb[27].mxu0 }
 0x12a   :  { %v666_v60 = vadd.f32 %v1224_v53, %v1693_v14  ;;  %v1227_v62 = vadd.f32 %v1226_v58, %v1225_v55  ;;  %v1290_v63 = vpop.f32.mrb[27].mxu1 }
 0x12b   :  { %v1291_v0 = vadd.f32 %v1290_v63, %v1289_v57 }
 0x12c   :  { %v669_v1 = vadd.f32 %v1227_v62, %v1693_v14  ;;  %v1727_v2 = vadd.f32 %v1288_v56, %v666_v60 }
 0x12e   :  { %v1228_v3 = vpop.f32.mrb[28].mxu0  ;;  %v1729_v4 = vadd.f32 %v1291_v0, %v669_v1 }
 0x12f   :  { %v1292_v5 = vpop.f32.mrb[28].mxu1  ;;  %v1229_v6 = vpop.f32.mrb[29].mxu0 }
 0x130   :  { %v1230_v7 = vadd.f32 %v1229_v6, %v1228_v3  ;;  %v1293_v8 = vpop.f32.mrb[29].mxu1  ;;  %v1231_v9 = vpop.f32.mrb[30].mxu0 }
 0x131   :  { %v1294_v10 = vadd.f32 %v1293_v8, %v1292_v5  ;;  %v1295_v12 = vpop.f32.mrb[30].mxu1  ;;  %v1232_v15 = vpop.f32.mrb[31].mxu0 }
 0x132   :  { %v674_v16 = vadd.f32 %v1230_v7, %v1693_v14  ;;  %v1233_v17 = vadd.f32 %v1232_v15, %v1231_v9  ;;  %v1296_v18 = vpop.f32.mrb[31].mxu1 }
 0x133   :  { %v1297_v19 = vadd.f32 %v1296_v18, %v1295_v12 }
 0x134   :  { %v677_v20 = vadd.f32 %v1233_v17, %v1693_v14  ;;  %v771_v21 = vadd.f32 %v1294_v10, %v674_v16 }
 0x136   :  { %v1320_v22 = vpop.f32.mrb[32].mxu0  ;;  %v1733_v23 = vadd.f32 %v1297_v19, %v677_v20 }
 0x137   :  { %v820_v24 = vadd.f32 %v1320_v22, %v1703_v43  ;;  %v1328_v25 = vpop.f32.mrb[32].mxu1  ;;  %v811_v26 = vpop.f32.mrb[33].mxu0 }
 0x138   :  { %v852_v28 = vadd.f32 %v1328_v25, %v755_v48  ;;  %v812_v31 = vadd.f32 %v811_v26, %v1697_v27  ;;  %v843_v33 = vpop.f32.mrb[33].mxu1  ;;  %v1321_v34 = vpop.f32.mrb[34].mxu0 }
 0x139   :  { %vm876_vm1 = vcmp.ge.f32.partialorder %v820_v24, 0.0  ;;  %v892_v35 = vmul.f32 0.2, %v820_v24  ;;  %v844_v36 = vadd.f32 %v843_v33, %v747_v30  ;;  %v823_v37 = vadd.f32 %v1321_v34, %v1705_v45  ;;  %v1329_v38 = vpop.f32.mrb[34].mxu1  ;;  %v814_v14 = vpop.f32.mrb[35].mxu0 }
 0x13a   :  { %vm884_vm2 = vcmp.ge.f32.partialorder %v852_v28, 0.0  ;;  %v900_v39 = vmul.f32 0.2, %v852_v28  ;;  %v890_v40 = vmul.f32 0.2, %v812_v31  ;;  %vm874_vm3 = vcmp.ge.f32.partialorder %v812_v31, 0.0 }
 0x13b   :  { %vm877_vm4 = vcmp.ge.f32.partialorder %v823_v37, 0.0  ;;  %v846_v43 = vpop.f32.mrb[35].mxu1  ;;  %v908_v41 = vsel %vm876_vm1, %v820_v24, %v892_v35  ;;  %vm882_vm5 = vcmp.ge.f32.partialorder %v844_v36, 0.0  ;;  %v893_v42 = vmul.f32 0.2, %v823_v37 }
 0x13c   :  { %v855_v44 = vadd.f32 %v1329_v38, %v758_v50  ;;  %v916_v27 = vsel %vm884_vm2, %v852_v28, %v900_v39  ;;  %v898_v46 = vmul.f32 0.2, %v844_v36  ;;  %v815_v47 = vadd.f32 %v814_v14, %v1699_v29 }
 0x13d   :  { %v847_v30 = vadd.f32 %v846_v43, %v1721_v32  ;;  %v906_v48 = vsel %vm874_vm3, %v812_v31, %v890_v40  ;;  %v909_v45 = vsel %vm877_vm4, %v823_v37, %v893_v42 }
 0x13e   :  { %vm885_vm6 = vcmp.ge.f32.partialorder %v855_v44, 0.0  ;;  %v901_v49 = vmul.f32 0.2, %v855_v44  ;;  %v1324_v51 = vpop.f32.mrb[36].mxu0  ;;  %v1131_v52 = vpack.c.bf16 %v909_v45, %v908_v41  ;;  %vm875_vm7 = vcmp.ge.f32.partialorder %v815_v47, 0.0 }
 0x13f   :  { %v891_v53 = vmul.f32 0.2, %v815_v47  ;;  %vm883_vm8 = vcmp.ge.f32.partialorder %v847_v30, 0.0  ;;  %v1332_v54 = vpop.f32.mrb[36].mxu1  ;;  %v827_v55 = vpop.f32.mrb[37].mxu0  ;;  %v836_v50 = vadd.f32 %v1324_v51, %v1715_v11  ;;  %v914_v5 = vsel %vm882_vm5, %v844_v36, %v898_v46 }
 0x140   :  { %v917_v56 = vsel %vm885_vm6, %v855_v44, %v901_v49  ;;  %v899_v57 = vmul.f32 0.2, %v847_v30  ;;  %v868_v58 = vadd.f32 %v1332_v54, %v771_v21  ;;  %v859_v60 = vpop.f32.mrb[37].mxu1  ;;  %v1325_v29 = vpop.f32.mrb[38].mxu0  ;;  %1163 = vst [vmem:[%s1777_s3 + $0x8] sm:$0xff] %v1131_v52   ;;  %v828_v63 = vadd.f32 %v827_v55, %v1709_v59 }
 0x141   :  { %v1151_v32 = vpack.c.bf16 %v917_v56, %v916_v27  ;;  %v907_v62 = vsel %vm875_vm7, %v815_v47, %v891_v53  ;;  %v860_v0 = vadd.f32 %v859_v60, %v1727_v2  ;;  %v1333_v1 = vpop.f32.mrb[38].mxu1  ;;  %v830_v3 = vpop.f32.mrb[39].mxu0  ;;  %v896_v7 = vmul.f32 0.2, %v836_v50 }
 0x142   :  { %v1126_v6 = vpack.c.bf16 %v907_v62, %v906_v48  ;;  %v915_v11 = vsel %vm883_vm8, %v847_v30, %v899_v57  ;;  %v862_v8 = vpop.f32.mrb[39].mxu1  ;;  %vm880_vm9 = vcmp.ge.f32.partialorder %v836_v50, 0.0  ;;  %vm888_vm10 = vcmp.ge.f32.partialorder %v868_v58, 0.0 }
 0x143   :  { %1167 = vst [vmem:[%s1777_s3 + $0x28] sm:$0xff] %v1151_v32   ;;  %v1146_v9 = vpack.c.bf16 %v915_v11, %v914_v5  ;;  %v904_v10 = vmul.f32 0.2, %v868_v58  ;;  %vm878_vm11 = vcmp.ge.f32.partialorder %v828_v63, 0.0  ;;  %v894_v59 = vmul.f32 0.2, %v828_v63 }
 0x144   :  { %1127 = vst [vmem:[%s1777_s3] sm:$0xff] %v1126_v6   ;;  %v902_v2 = vmul.f32 0.2, %v860_v0  ;;  %v839_v12 = vadd.f32 %v1325_v29, %v1717_v13  ;;  %v871_v15 = vadd.f32 %v1333_v1, %v1733_v23  ;;  %v831_v16 = vadd.f32 %v830_v3, %v1711_v61 }
 0x145   :  { %1166 = vst [vmem:[%s1777_s3 + $0x20] sm:$0xff] %v1146_v9   ;;  %v912_v17 = vsel %vm880_vm9, %v836_v50, %v896_v7  ;;  %v920_v18 = vsel %vm888_vm10, %v868_v58, %v904_v10  ;;  %vm886_vm12 = vcmp.ge.f32.partialorder %v860_v0, 0.0  ;;  %v863_v19 = vadd.f32 %v862_v8, %v1729_v4 }
 0x146   :  { %vm881_vm13 = vcmp.ge.f32.partialorder %v839_v12, 0.0  ;;  %v897_v20 = vmul.f32 0.2, %v839_v12  ;;  %vm889_vm14 = vcmp.ge.f32.partialorder %v871_v15, 0.0  ;;  %v905_v21 = vmul.f32 0.2, %v871_v15 }
 0x147   :  { %vm879_vm15 = vcmp.ge.f32.partialorder %v831_v16, 0.0  ;;  %v895_v22 = vmul.f32 0.2, %v831_v16  ;;  %vm887_vm0 = vcmp.ge.f32.partialorder %v863_v19, 0.0  ;;  %v903_v24 = vmul.f32 0.2, %v863_v19 }
 0x148   :  { %v910_v25 = vsel %vm878_vm11, %v828_v63, %v894_v59  ;;  %v918_v13 = vsel %vm886_vm12, %v860_v0, %v902_v2  ;;  %v913_v26 = vsel %vm881_vm13, %v839_v12, %v897_v20  ;;  %v921_v23 = vsel %vm889_vm14, %v871_v15, %v905_v21 }
 0x149   :  { %v1141_v28 = vpack.c.bf16 %v913_v26, %v912_v17  ;;  %v1161_v61 = vpack.c.bf16 %v921_v23, %v920_v18  ;;  %v911_v31 = vsel %vm879_vm15, %v831_v16, %v895_v22  ;;  %v919_v33 = vsel %vm887_vm0, %v863_v19, %v903_v24 }
 0x14a   :  { %v1136_v34 = vpack.c.bf16 %v911_v31, %v910_v25  ;;  %v1156_v35 = vpack.c.bf16 %v919_v33, %v918_v13 }
 0x14b   :  { %1165 = vst [vmem:[%s1777_s3 + $0x18] sm:$0xff] %v1141_v28   ;;  %1169 = vst [vmem:[%s1777_s3 + $0x38] sm:$0xff] %v1161_v61  }
 0x14c   :  { %1164 = vst [vmem:[%s1777_s3 + $0x10] sm:$0xff] %v1136_v34   ;;  %1168 = vst [vmem:[%s1777_s3 + $0x30] sm:$0xff] %v1156_v35  }

// kernel: unet_forward.20
= control target key start
LH: loop header
LB: loop body
LE: loop exit
PB: predicated region body
PF: predicated region fallthrough
CT: control target
= control target key end

     0   :  { %v3021_v0 = vmov 0   ;;  %vm974_vm0 = vcmask 392192   ;;  %s3736_s1 = inlined_call_operand.vmem [shape: bf16[432,128], index: 1, kind: input, shape index: {}]   ;;  %s3737_s0 = inlined_call_operand.vmem [shape: bf16[512,432], index: 0, kind: input, shape index: {}]   ;;  %s3738_s2 = inlined_call_operand.vmem [shape: f32[1,128], index: 2, kind: input, shape index: {}]   ;;  %s3739_s3 = inlined_call_operand.vmem [shape: bf16[512,128], index: 3, kind: output, shape index: {}]  }
   0x1   :  { %1071 = vmatprep.subr.bf16.mxu1 %v3021_v0  ;;  %v2801_v1 = vld [vmem:[%s3736_s1] sm:$0xff]   ;;  %1360 = vmatprep.subr.bf16.mxu0 %v3021_v0  ;;  %v2802_v2 = vld [vmem:[%s3736_s1 + $0x8] sm:$0xff]   ;;  %v2803_v4 = vld [vmem:[%s3736_s1 + $0x10] sm:$0xff]  }
   0x2   :  { %1072 = vmatpush1.bf16.msra.mxu1 %v2801_v1  ;;  %v2806_v3 = vld [vmem:[%s3736_s1 + $0x80] sm:$0xff]   ;;  %v2808_v5 = vld [vmem:[%s3736_s1 + $0x88] sm:$0xff]   ;;  %v2804_v6 = vld [vmem:[%s3736_s1 + $0x18] sm:$0xff]  }
   0x3   :  { %1073 = vmatprep.subr.bf16.mxu1 %v3021_v0  ;;  %1361 = vmatpush1.bf16.msra.mxu0 %v2806_v3  ;;  %v2810_v7 = vld [vmem:[%s3736_s1 + $0x90] sm:$0xff]   ;;  %v2805_v8 = vld [vmem:[%s3736_s1 + $0x20] sm:$0xff]   ;;  %v2812_v9 = vld [vmem:[%s3736_s1 + $0x98] sm:$0xff]  }
   0x4   :  { %1362 = vmatprep.subr.bf16.mxu0 %v3021_v0  ;;  %v2807_v10 = vld [vmem:[%s3736_s1 + $0x28] sm:$0xff]   ;;  %v2814_v11 = vld [vmem:[%s3736_s1 + $0xa0] sm:$0xff]   ;;  %v2809_v12 = vld [vmem:[%s3736_s1 + $0x30] sm:$0xff]  }
   0x5   :  { %v2816_v13 = vld [vmem:[%s3736_s1 + $0xa8] sm:$0xff]   ;;  %v2811_v14 = vld [vmem:[%s3736_s1 + $0x38] sm:$0xff]   ;;  %v2818_v15 = vld [vmem:[%s3736_s1 + $0xb0] sm:$0xff]  }
   0x6   :  { %1074 = vmatpush1.bf16.msra.mxu1 %v2802_v2  ;;  %v2830_v16 = vld [vmem:[%s3737_s0 + $0xc] ss:$16 sps:$4 sm:$0xff]   ;;  %v2833_v17 = vld [vmem:[%s3737_s0 + $0x4] ss:$16 sps:$4 sm:$0xff]   ;;  %v2828_v27 = vld [vmem:[%s3737_s0 + $0x8] ss:$16 sps:$4 sm:$0xff]  }
   0x7   :  { %1075 = vmatprep.subr.bf16.mxu1 %v3021_v0  ;;  %1363 = vmatpush1.bf16.msra.mxu0 %v2808_v5  ;;  %v2813_v18 = vld [vmem:[%s3736_s1 + $0x40] sm:$0xff]   ;;  %v2820_v19 = vld [vmem:[%s3736_s1 + $0xb8] sm:$0xff]   ;;  %v2815_v20 = vld [vmem:[%s3736_s1 + $0x48] sm:$0xff]  }
   0x8   :  { %1364 = vmatprep.subr.bf16.mxu0 %v3021_v0  ;;  %2321 = vmatprep.mubr.msk.bf16.mxu0 %vm974_vm0, %v2830_v16  ;;  %v2822_v21 = vld [vmem:[%s3736_s1 + $0xc0] sm:$0xff]   ;;  %v2817_v22 = vld [vmem:[%s3736_s1 + $0x50] sm:$0xff]   ;;  %v2824_v23 = vld [vmem:[%s3736_s1 + $0xc8] sm:$0xff]  }
   0x9   :  { %1103 = vmatprep.mubr.bf16.mxu1 %v2833_v17  ;;  %v2819_v24 = vld [vmem:[%s3736_s1 + $0x58] sm:$0xff]   ;;  %v2826_v25 = vld [vmem:[%s3736_s1 + $0xd0] sm:$0xff]   ;;  %v2821_v26 = vld [vmem:[%s3736_s1 + $0x60] sm:$0xff]  }
   0xa   :  { %1076 = vmatpush1.bf16.msra.mxu1 %v2803_v4  ;;  %v2834_v28 = vld [vmem:[%s3737_s0 + $0x2c] ss:$16 sps:$4 sm:$0xff]   ;;  %v2825_v30 = vld [vmem:[%s3736_s1 + $0x70] sm:$0xff]   ;;  %v2838_v31 = vld [vmem:[%s3737_s0 + $0x28] ss:$16 sps:$4 sm:$0xff]  }
   0xb   :  { %1077 = vmatprep.subr.bf16.mxu1 %v3021_v0  ;;  %1365 = vmatpush1.bf16.msra.mxu0 %v2810_v7  ;;  %v2823_v29 = vld [vmem:[%s3736_s1 + $0x68] sm:$0xff]   ;;  %v2827_v33 = vld [vmem:[%s3736_s1 + $0x78] sm:$0xff]   ;;  %v2831_v34 = vld [vmem:[%s3737_s0] ss:$16 sps:$4 sm:$0xff]  }
   0xc   :  { %1366 = vmatprep.subr.bf16.mxu0 %v3021_v0  ;;  %v2840_v32 = vld [vmem:[%s3737_s0 + $0x4c] ss:$16 sps:$4 sm:$0xff]   ;;  %v2836_v35 = vld [vmem:[%s3737_s0 + $0x24] ss:$16 sps:$4 sm:$0xff]   ;;  %v2844_v36 = vld [vmem:[%s3737_s0 + $0x48] ss:$16 sps:$4 sm:$0xff]  }
   0xd   :  { %v2846_v37 = vld [vmem:[%s3737_s0 + $0x6c] ss:$16 sps:$4 sm:$0xff]   ;;  %v2839_v38 = vld [vmem:[%s3737_s0 + $0x20] ss:$16 sps:$4 sm:$0xff]   ;;  %v2842_v39 = vld [vmem:[%s3737_s0 + $0x44] ss:$16 sps:$4 sm:$0xff]  }
   0xe   :  { %1078 = vmatpush1.bf16.msra.mxu1 %v2804_v6  ;;  %v2850_v40 = vld [vmem:[%s3737_s0 + $0x68] ss:$16 sps:$4 sm:$0xff]   ;;  %v2852_v41 = vld [vmem:[%s3737_s0 + $0x8c] ss:$16 sps:$4 sm:$0xff]   ;;  %v2845_v42 = vld [vmem:[%s3737_s0 + $0x40] ss:$16 sps:$4 sm:$0xff]  }
   0xf   :  { %1079 = vmatprep.subr.bf16.mxu1 %v3021_v0  ;;  %1367 = vmatpush1.bf16.msra.mxu0 %v2812_v9  ;;  %v2848_v43 = vld [vmem:[%s3737_s0 + $0x64] ss:$16 sps:$4 sm:$0xff]   ;;  %v2856_v44 = vld [vmem:[%s3737_s0 + $0x88] ss:$16 sps:$4 sm:$0xff]   ;;  %v2858_v45 = vld [vmem:[%s3737_s0 + $0xac] ss:$16 sps:$4 sm:$0xff]  }
  0x10   :  { %1368 = vmatprep.subr.bf16.mxu0 %v3021_v0  ;;  %v2851_v46 = vld [vmem:[%s3737_s0 + $0x60] ss:$16 sps:$4 sm:$0xff]   ;;  %v2854_v47 = vld [vmem:[%s3737_s0 + $0x84] ss:$16 sps:$4 sm:$0xff]   ;;  %v2862_v48 = vld [vmem:[%s3737_s0 + $0xa8] ss:$16 sps:$4 sm:$0xff]  }
  0x11   :  { %v2864_v49 = vld [vmem:[%s3737_s0 + $0xcc] ss:$16 sps:$4 sm:$0xff]   ;;  %v2857_v50 = vld [vmem:[%s3737_s0 + $0x80] ss:$16 sps:$4 sm:$0xff]   ;;  %v2860_v51 = vld [vmem:[%s3737_s0 + $0xa4] ss:$16 sps:$4 sm:$0xff]  }
  0x12   :  { %1080 = vmatpush1.bf16.msra.mxu1 %v2805_v8  ;;  %v2868_v52 = vld [vmem:[%s3737_s0 + $0xc8] ss:$16 sps:$4 sm:$0xff]   ;;  %v2870_v53 = vld [vmem:[%s3737_s0 + $0xec] ss:$16 sps:$4 sm:$0xff]   ;;  %v2863_v54 = vld [vmem:[%s3737_s0 + $0xa0] ss:$16 sps:$4 sm:$0xff]  }
  0x13   :  { %1081 = vmatprep.subr.bf16.mxu1 %v3021_v0  ;;  %1369 = vmatpush1.bf16.msra.mxu0 %v2814_v11  ;;  %v2866_v55 = vld [vmem:[%s3737_s0 + $0xc4] ss:$16 sps:$4 sm:$0xff]   ;;  %v2874_v56 = vld [vmem:[%s3737_s0 + $0xe8] ss:$16 sps:$4 sm:$0xff]   ;;  %v2876_v57 = vld [vmem:[%s3737_s0 + $0x10c] ss:$16 sps:$4 sm:$0xff]  }
  0x14   :  { %1370 = vmatprep.subr.bf16.mxu0 %v3021_v0  ;;  %v2869_v58 = vld [vmem:[%s3737_s0 + $0xc0] ss:$16 sps:$4 sm:$0xff]   ;;  %v2872_v59 = vld [vmem:[%s3737_s0 + $0xe4] ss:$16 sps:$4 sm:$0xff]   ;;  %v2880_v60 = vld [vmem:[%s3737_s0 + $0x108] ss:$16 sps:$4 sm:$0xff]  }
  0x15   :  { %v2882_v61 = vld [vmem:[%s3737_s0 + $0x12c] ss:$16 sps:$4 sm:$0xff]   ;;  %v2875_v62 = vld [vmem:[%s3737_s0 + $0xe0] ss:$16 sps:$4 sm:$0xff]   ;;  %v2878_v63 = vld [vmem:[%s3737_s0 + $0x104] ss:$16 sps:$4 sm:$0xff]  }
  0x16   :  { %1082 = vmatpush1.bf16.msra.mxu1 %v2807_v10  ;;  %v2888_v1 = vld [vmem:[%s3737_s0 + $0x14c] ss:$16 sps:$4 sm:$0xff]   ;;  %v2881_v2 = vld [vmem:[%s3737_s0 + $0x100] ss:$16 sps:$4 sm:$0xff]   ;;  %v2884_v3 = vld [vmem:[%s3737_s0 + $0x124] ss:$16 sps:$4 sm:$0xff]  }
  0x17   :  { %1083 = vmatprep.subr.bf16.mxu1 %v3021_v0  ;;  %1371 = vmatpush1.bf16.msra.mxu0 %v2816_v13  ;;  %v2892_v4 = vld [vmem:[%s3737_s0 + $0x148] ss:$16 sps:$4 sm:$0xff]   ;;  %v2894_v5 = vld [vmem:[%s3737_s0 + $0x16c] ss:$16 sps:$4 sm:$0xff]   ;;  %v2887_v6 = vld [vmem:[%s3737_s0 + $0x120] ss:$16 sps:$4 sm:$0xff]  }
  0x18   :  { %1372 = vmatprep.subr.bf16.mxu0 %v3021_v0  ;;  %v2890_v7 = vld [vmem:[%s3737_s0 + $0x144] ss:$16 sps:$4 sm:$0xff]   ;;  %v2898_v8 = vld [vmem:[%s3737_s0 + $0x168] ss:$16 sps:$4 sm:$0xff]   ;;  %v2900_v9 = vld [vmem:[%s3737_s0 + $0x18c] ss:$16 sps:$4 sm:$0xff]  }
  0x19   :  { %v2893_v10 = vld [vmem:[%s3737_s0 + $0x140] ss:$16 sps:$4 sm:$0xff]   ;;  %v2896_v11 = vld [vmem:[%s3737_s0 + $0x164] ss:$16 sps:$4 sm:$0xff]   ;;  %v2906_v13 = vld [vmem:[%s3737_s0 + $0x1ac] ss:$16 sps:$4 sm:$0xff]  }
  0x1a   :  { %1084 = vmatpush1.bf16.msra.mxu1 %v2809_v12  ;;  %v2904_v12 = vld [vmem:[%s3737_s0 + $0x188] ss:$16 sps:$4 sm:$0xff]   ;;  %v2912_v17 = vld [vmem:[%s3737_s0 + $0x1cc] ss:$16 sps:$4 sm:$0xff]  }
  0x1b   :  { %1085 = vmatprep.subr.bf16.mxu1 %v3021_v0  ;;  %1373 = vmatpush1.bf16.msra.mxu0 %v2818_v15  ;;  %v2902_v15 = vld [vmem:[%s3737_s0 + $0x184] ss:$16 sps:$4 sm:$0xff]   ;;  %v2910_v16 = vld [vmem:[%s3737_s0 + $0x1a8] ss:$16 sps:$4 sm:$0xff]  }
  0x1c   :  { %1374 = vmatprep.subr.bf16.mxu0 %v3021_v0 }
  0x1e   :  { %1086 = vmatpush1.bf16.msra.mxu1 %v2811_v14  ;;  %v2899_v14 = vld [vmem:[%s3737_s0 + $0x160] ss:$16 sps:$4 sm:$0xff]  }
  0x1f   :  { %1087 = vmatprep.subr.bf16.mxu1 %v3021_v0  ;;  %1375 = vmatpush1.bf16.msra.mxu0 %v2820_v19  ;;  %v2908_v19 = vld [vmem:[%s3737_s0 + $0x1a4] ss:$16 sps:$4 sm:$0xff]  }
  0x20   :  { %1376 = vmatprep.subr.bf16.mxu0 %v3021_v0 }
  0x22   :  { %1088 = vmatpush1.bf16.msra.mxu1 %v2813_v18  ;;  %v2905_v18 = vld [vmem:[%s3737_s0 + $0x180] ss:$16 sps:$4 sm:$0xff]  }
  0x23   :  { %1089 = vmatprep.subr.bf16.mxu1 %v3021_v0  ;;  %1377 = vmatpush1.bf16.msra.mxu0 %v2822_v21  ;;  %v2918_v21 = vld [vmem:[%s3737_s0 + $0x1ec] ss:$16 sps:$4 sm:$0xff]  }
  0x24   :  { %1378 = vmatprep.subr.bf16.mxu0 %v3021_v0 }
  0x26   :  { %1090 = vmatpush1.bf16.msra.mxu1 %v2815_v20  ;;  %v2916_v20 = vld [vmem:[%s3737_s0 + $0x1c8] ss:$16 sps:$4 sm:$0xff]  }
  0x27   :  { %1091 = vmatprep.subr.bf16.mxu1 %v3021_v0  ;;  %1379 = vmatpush1.bf16.msra.mxu0 %v2824_v23  ;;  %v2914_v23 = vld [vmem:[%s3737_s0 + $0x1c4] ss:$16 sps:$4 sm:$0xff]  }
  0x28   :  { %1380 = vmatprep.subr.bf16.mxu0 %v3021_v0 }
  0x2a   :  { %1092 = vmatpush1.bf16.msra.mxu1 %v2817_v22  ;;  %v2911_v22 = vld [vmem:[%s3737_s0 + $0x1a0] ss:$16 sps:$4 sm:$0xff]  }
  0x2b   :  { %1093 = vmatprep.subr.bf16.mxu1 %v3021_v0  ;;  %1381 = vmatpush1.bf16.msra.mxu0 %v2826_v25  ;;  %v2924_v25 = vld [vmem:[%s3737_s0 + $0x20c] ss:$16 sps:$4 sm:$0xff]  }
  0x2e   :  { %1094 = vmatpush1.bf16.msra.mxu1 %v2819_v24  ;;  %1393 = vmatmul.mubr.bf16.vlgmr.msra.gmra.mrb[0].mxu0 %v2828_v27  ;;  %v2922_v24 = vld [vmem:[%s3737_s0 + $0x1e8] ss:$16 sps:$4 sm:$0xff]   ;;  %v2920_v27 = vld [vmem:[%s3737_s0 + $0x1e4] ss:$16 sps:$4 sm:$0xff]  }
  0x2f   :  { %1095 = vmatprep.subr.bf16.mxu1 %v3021_v0  ;;  %2322 = vmatprep.mubr.msk.bf16.mxu0 %vm974_vm0, %v2834_v28  ;;  %v2928_v28 = vld [vmem:[%s3737_s0 + $0x208] ss:$16 sps:$4 sm:$0xff]  }
  0x32   :  { %1096 = vmatpush1.bf16.msra.mxu1 %v2821_v26  ;;  %v2917_v26 = vld [vmem:[%s3737_s0 + $0x1c0] ss:$16 sps:$4 sm:$0xff]  }
  0x33   :  { %1097 = vmatprep.subr.bf16.mxu1 %v3021_v0 }
  0x36   :  { %1098 = vmatpush1.bf16.msra.mxu1 %v2823_v29  ;;  %1401 = vmatmul.mubr.bf16.gmra.mrb[4].mxu0 %v2838_v31  ;;  %v2930_v29 = vld [vmem:[%s3737_s0 + $0x22c] ss:$16 sps:$4 sm:$0xff]   ;;  %v2926_v31 = vld [vmem:[%s3737_s0 + $0x204] ss:$16 sps:$4 sm:$0xff]  }
  0x37   :  { %1099 = vmatprep.subr.bf16.mxu1 %v3021_v0  ;;  %2323 = vmatprep.mubr.msk.bf16.mxu0 %vm974_vm0, %v2840_v32  ;;  %v2934_v32 = vld [vmem:[%s3737_s0 + $0x228] ss:$16 sps:$4 sm:$0xff]  }
  0x3a   :  { %1100 = vmatpush1.bf16.msra.mxu1 %v2825_v30  ;;  %v2923_v30 = vld [vmem:[%s3737_s0 + $0x1e0] ss:$16 sps:$4 sm:$0xff]  }
  0x3b   :  { %1101 = vmatprep.subr.bf16.mxu1 %v3021_v0  ;;  %v2886_v0 = vld [vmem:[%s3737_s0 + $0x128] ss:$16 sps:$4 sm:$0xff]  }
  0x3e   :  { %1102 = vmatpush1.bf16.msra.mxu1 %v2827_v33  ;;  %1409 = vmatmul.mubr.bf16.gmra.mrb[8].mxu0 %v2844_v36  ;;  %v2936_v33 = vld [vmem:[%s3737_s0 + $0x24c] ss:$16 sps:$4 sm:$0xff]   ;;  %v2940_v36 = vld [vmem:[%s3737_s0 + $0x248] ss:$16 sps:$4 sm:$0xff]  }
  0x3f   :  { %2324 = vmatprep.mubr.msk.bf16.mxu0 %vm974_vm0, %v2846_v37  ;;  %v2942_v37 = vld [vmem:[%s3737_s0 + $0x26c] ss:$16 sps:$4 sm:$0xff]  }
  0x41   :  { %1104 = vmatmul.mubr.bf16.vlgmr.msra.gmra.mrb[0].mxu1 %v2831_v34  ;;  %v2929_v34 = vld [vmem:[%s3737_s0 + $0x200] ss:$16 sps:$4 sm:$0xff]  }
  0x42   :  { %1111 = vmatprep.mubr.bf16.mxu1 %v2836_v35  ;;  %v2932_v35 = vld [vmem:[%s3737_s0 + $0x224] ss:$16 sps:$4 sm:$0xff]  }
  0x46   :  { %1417 = vmatmul.mubr.bf16.gmra.mrb[12].mxu0 %v2850_v40  ;;  %v2946_v40 = vld [vmem:[%s3737_s0 + $0x268] ss:$16 sps:$4 sm:$0xff]  }
  0x47   :  { %2325 = vmatprep.mubr.msk.bf16.mxu0 %vm974_vm0, %v2852_v41  ;;  %v2948_v41 = vld [vmem:[%s3737_s0 + $0x28c] ss:$16 sps:$4 sm:$0xff]  }
  0x49   :  { %1112 = vmatmul.mubr.bf16.gmra.mrb[4].mxu1 %v2839_v38  ;;  %v2935_v38 = vld [vmem:[%s3737_s0 + $0x220] ss:$16 sps:$4 sm:$0xff]  }
  0x4a   :  { %1119 = vmatprep.mubr.bf16.mxu1 %v2842_v39  ;;  %v2938_v39 = vld [vmem:[%s3737_s0 + $0x244] ss:$16 sps:$4 sm:$0xff]  }
  0x4e   :  { %1425 = vmatmul.mubr.bf16.gmra.mrb[16].mxu0 %v2856_v44  ;;  %v2952_v44 = vld [vmem:[%s3737_s0 + $0x288] ss:$16 sps:$4 sm:$0xff]  }
  0x4f   :  { %2326 = vmatprep.mubr.msk.bf16.mxu0 %vm974_vm0, %v2858_v45  ;;  %v2954_v45 = vld [vmem:[%s3737_s0 + $0x2ac] ss:$16 sps:$4 sm:$0xff]  }
  0x51   :  { %1120 = vmatmul.mubr.bf16.gmra.mrb[8].mxu1 %v2845_v42  ;;  %v2941_v42 = vld [vmem:[%s3737_s0 + $0x240] ss:$16 sps:$4 sm:$0xff]  }
  0x52   :  { %1127 = vmatprep.mubr.bf16.mxu1 %v2848_v43  ;;  %v2944_v43 = vld [vmem:[%s3737_s0 + $0x264] ss:$16 sps:$4 sm:$0xff]  }
  0x56   :  { %1433 = vmatmul.mubr.bf16.gmra.mrb[20].mxu0 %v2862_v48  ;;  %v2958_v48 = vld [vmem:[%s3737_s0 + $0x2a8] ss:$16 sps:$4 sm:$0xff]  }
  0x57   :  { %2327 = vmatprep.mubr.msk.bf16.mxu0 %vm974_vm0, %v2864_v49  ;;  %v2960_v49 = vld [vmem:[%s3737_s0 + $0x2cc] ss:$16 sps:$4 sm:$0xff]  }
  0x59   :  { %1128 = vmatmul.mubr.bf16.gmra.mrb[12].mxu1 %v2851_v46  ;;  %v2947_v46 = vld [vmem:[%s3737_s0 + $0x260] ss:$16 sps:$4 sm:$0xff]  }
  0x5a   :  { %1135 = vmatprep.mubr.bf16.mxu1 %v2854_v47  ;;  %v2950_v47 = vld [vmem:[%s3737_s0 + $0x284] ss:$16 sps:$4 sm:$0xff]  }
  0x5e   :  { %1441 = vmatmul.mubr.bf16.gmra.mrb[24].mxu0 %v2868_v52  ;;  %v2964_v52 = vld [vmem:[%s3737_s0 + $0x2c8] ss:$16 sps:$4 sm:$0xff]  }
  0x5f   :  { %2328 = vmatprep.mubr.msk.bf16.mxu0 %vm974_vm0, %v2870_v53  ;;  %v2966_v53 = vld [vmem:[%s3737_s0 + $0x2ec] ss:$16 sps:$4 sm:$0xff]  }
  0x61   :  { %1136 = vmatmul.mubr.bf16.gmra.mrb[16].mxu1 %v2857_v50  ;;  %v2953_v50 = vld [vmem:[%s3737_s0 + $0x280] ss:$16 sps:$4 sm:$0xff]  }
  0x62   :  { %1143 = vmatprep.mubr.bf16.mxu1 %v2860_v51  ;;  %v2956_v51 = vld [vmem:[%s3737_s0 + $0x2a4] ss:$16 sps:$4 sm:$0xff]  }
  0x66   :  { %1449 = vmatmul.mubr.bf16.gmra.mrb[28].mxu0 %v2874_v56  ;;  %v2970_v56 = vld [vmem:[%s3737_s0 + $0x2e8] ss:$16 sps:$4 sm:$0xff]  }
  0x67   :  { %2329 = vmatprep.mubr.msk.bf16.mxu0 %vm974_vm0, %v2876_v57  ;;  %v2972_v57 = vld [vmem:[%s3737_s0 + $0x30c] ss:$16 sps:$4 sm:$0xff]  }
  0x69   :  { %1144 = vmatmul.mubr.bf16.gmra.mrb[20].mxu1 %v2863_v54  ;;  %v2959_v54 = vld [vmem:[%s3737_s0 + $0x2a0] ss:$16 sps:$4 sm:$0xff]  }
  0x6a   :  { %1151 = vmatprep.mubr.bf16.mxu1 %v2866_v55  ;;  %v2962_v55 = vld [vmem:[%s3737_s0 + $0x2c4] ss:$16 sps:$4 sm:$0xff]  }
  0x6e   :  { %1457 = vmatmul.mubr.bf16.gmra.mrb[32].mxu0 %v2880_v60  ;;  %v2976_v60 = vld [vmem:[%s3737_s0 + $0x308] ss:$16 sps:$4 sm:$0xff]  }
  0x6f   :  { %2330 = vmatprep.mubr.msk.bf16.mxu0 %vm974_vm0, %v2882_v61  ;;  %v2978_v61 = vld [vmem:[%s3737_s0 + $0x32c] ss:$16 sps:$4 sm:$0xff]  }
  0x71   :  { %1152 = vmatmul.mubr.bf16.gmra.mrb[24].mxu1 %v2869_v58  ;;  %v2965_v58 = vld [vmem:[%s3737_s0 + $0x2c0] ss:$16 sps:$4 sm:$0xff]  }
  0x72   :  { %1159 = vmatprep.mubr.bf16.mxu1 %v2872_v59  ;;  %v2968_v59 = vld [vmem:[%s3737_s0 + $0x2e4] ss:$16 sps:$4 sm:$0xff]  }
  0x76   :  { %1465 = vmatmul.mubr.bf16.gmra.mrb[36].mxu0 %v2886_v0  ;;  %v2982_v0 = vld [vmem:[%s3737_s0 + $0x328] ss:$16 sps:$4 sm:$0xff]  }
  0x77   :  { %2331 = vmatprep.mubr.msk.bf16.mxu0 %vm974_vm0, %v2888_v1  ;;  %v2984_v1 = vld [vmem:[%s3737_s0 + $0x34c] ss:$16 sps:$4 sm:$0xff]  }
  0x79   :  { %1160 = vmatmul.mubr.bf16.gmra.mrb[28].mxu1 %v2875_v62  ;;  %v2971_v62 = vld [vmem:[%s3737_s0 + $0x2e0] ss:$16 sps:$4 sm:$0xff]  }
  0x7a   :  { %1167 = vmatprep.mubr.bf16.mxu1 %v2878_v63  ;;  %v2974_v63 = vld [vmem:[%s3737_s0 + $0x304] ss:$16 sps:$4 sm:$0xff]  }
  0x7e   :  { %1473 = vmatmul.mubr.bf16.gmra.mrb[40].mxu0 %v2892_v4  ;;  %v2988_v4 = vld [vmem:[%s3737_s0 + $0x348] ss:$16 sps:$4 sm:$0xff]  }
  0x7f   :  { %2332 = vmatprep.mubr.msk.bf16.mxu0 %vm974_vm0, %v2894_v5  ;;  %v2990_v5 = vld [vmem:[%s3737_s0 + $0x36c] ss:$16 sps:$4 sm:$0xff]  }
  0x81   :  { %1168 = vmatmul.mubr.bf16.gmra.mrb[32].mxu1 %v2881_v2  ;;  %v2977_v2 = vld [vmem:[%s3737_s0 + $0x300] ss:$16 sps:$4 sm:$0xff]  }
  0x82   :  { %1175 = vmatprep.mubr.bf16.mxu1 %v2884_v3  ;;  %v2980_v3 = vld [vmem:[%s3737_s0 + $0x324] ss:$16 sps:$4 sm:$0xff]  }
  0x86   :  { %1481 = vmatmul.mubr.bf16.gmra.mrb[44].mxu0 %v2898_v8  ;;  %v2986_v8 = vld [vmem:[%s3737_s0 + $0x344] ss:$16 sps:$4 sm:$0xff]  }
  0x87   :  { %2333 = vmatprep.mubr.msk.bf16.mxu0 %vm974_vm0, %v2900_v9 }
  0x89   :  { %1176 = vmatmul.mubr.bf16.gmra.mrb[36].mxu1 %v2887_v6  ;;  %v2983_v6 = vld [vmem:[%s3737_s0 + $0x320] ss:$16 sps:$4 sm:$0xff]  }
  0x8a   :  { %1183 = vmatprep.mubr.bf16.mxu1 %v2890_v7 }
  0x8e   :  { %1489 = vmatmul.mubr.bf16.gmra.mrb[48].mxu0 %v2904_v12  ;;  %v2996_v12 = vld [vmem:[%s3737_s0 + $0x38c] ss:$16 sps:$4 sm:$0xff]  }
  0x8f   :  { %2334 = vmatprep.mubr.msk.bf16.mxu0 %vm974_vm0, %v2906_v13 }
  0x91   :  { %1184 = vmatmul.mubr.bf16.gmra.mrb[40].mxu1 %v2893_v10  ;;  %v2994_v10 = vld [vmem:[%s3737_s0 + $0x368] ss:$16 sps:$4 sm:$0xff]  }
  0x92   :  { %1191 = vmatprep.mubr.bf16.mxu1 %v2896_v11 }
  0x96   :  { %1497 = vmatmul.mubr.bf16.gmra.mrb[52].mxu0 %v2910_v16  ;;  %v2992_v16 = vld [vmem:[%s3737_s0 + $0x364] ss:$16 sps:$4 sm:$0xff]  }
  0x97   :  { %2335 = vmatprep.mubr.msk.bf16.mxu0 %vm974_vm0, %v2912_v17 }
  0x99   :  { %1192 = vmatmul.mubr.bf16.gmra.mrb[44].mxu1 %v2899_v14  ;;  %v2989_v14 = vld [vmem:[%s3737_s0 + $0x340] ss:$16 sps:$4 sm:$0xff]  }
  0x9a   :  { %1199 = vmatprep.mubr.bf16.mxu1 %v2902_v15 }
  0x9e   :  { %1505 = vmatmul.mubr.bf16.gmra.mrb[56].mxu0 %v2916_v20  ;;  %v3002_v20 = vld [vmem:[%s3737_s0 + $0x3ac] ss:$16 sps:$4 sm:$0xff]  }
  0x9f   :  { %2336 = vmatprep.mubr.msk.bf16.mxu0 %vm974_vm0, %v2918_v21 }
  0xa1   :  { %1200 = vmatmul.mubr.bf16.gmra.mrb[48].mxu1 %v2905_v18  ;;  %v3000_v18 = vld [vmem:[%s3737_s0 + $0x388] ss:$16 sps:$4 sm:$0xff]  }
  0xa2   :  { %1207 = vmatprep.mubr.bf16.mxu1 %v2908_v19 }
  0xa6   :  { %1513 = vmatmul.mubr.bf16.gmra.mrb[60].mxu0 %v2922_v24 }
  0xa7   :  { %2337 = vmatprep.mubr.msk.bf16.mxu0 %vm974_vm0, %v2924_v25 }
  0xa9   :  { %1208 = vmatmul.mubr.bf16.gmra.mrb[52].mxu1 %v2911_v22  ;;  %v3524_v22 = vld [vmem:[%s3738_s2] ss:$0 sm:$0xff] }
  0xaa   :  { %1215 = vmatprep.mubr.bf16.mxu1 %v2914_v23 }
  0xae   :  { %1521 = vmatmul.mubr.bf16.gmra.mrb[64].mxu0 %v2928_v28 }
  0xaf   :  { %2338 = vmatprep.mubr.msk.bf16.mxu0 %vm974_vm0, %v2930_v29  ;;  %v2998_v29 = vld [vmem:[%s3737_s0 + $0x384] ss:$16 sps:$4 sm:$0xff]  }
  0xb1   :  { %1216 = vmatmul.mubr.bf16.gmra.mrb[56].mxu1 %v2917_v26  ;;  %v2995_v26 = vld [vmem:[%s3737_s0 + $0x360] ss:$16 sps:$4 sm:$0xff]  }
  0xb2   :  { %1223 = vmatprep.mubr.bf16.mxu1 %v2920_v27 }
  0xb6   :  { %1529 = vmatmul.mubr.bf16.gmra.mrb[68].mxu0 %v2934_v32 }
  0xb7   :  { %2339 = vmatprep.mubr.msk.bf16.mxu0 %vm974_vm0, %v2936_v33 }
  0xb9   :  { %1224 = vmatmul.mubr.bf16.gmra.mrb[60].mxu1 %v2923_v30 }
  0xba   :  { %1231 = vmatprep.mubr.bf16.mxu1 %v2926_v31  ;;  %v3006_v31 = vld [vmem:[%s3737_s0 + $0x3a8] ss:$16 sps:$4 sm:$0xff]  }
  0xbe   :  { %1537 = vmatmul.mubr.bf16.gmra.mrb[72].mxu0 %v2940_v36  ;;  %v3008_v36 = vld [vmem:[%s3737_s0 + $0x3cc] ss:$16 sps:$4 sm:$0xff]  }
  0xbf   :  { %2340 = vmatprep.mubr.msk.bf16.mxu0 %vm974_vm0, %v2942_v37 }
  0xc1   :  { %1232 = vmatmul.mubr.bf16.gmra.mrb[64].mxu1 %v2929_v34 }
  0xc2   :  { %1239 = vmatprep.mubr.bf16.mxu1 %v2932_v35 }
  0xc6   :  { %1545 = vmatmul.mubr.bf16.gmra.mrb[76].mxu0 %v2946_v40 }
  0xc7   :  { %2341 = vmatprep.mubr.msk.bf16.mxu0 %vm974_vm0, %v2948_v41 }
  0xc9   :  { %1240 = vmatmul.mubr.bf16.gmra.mrb[68].mxu1 %v2935_v38 }
  0xca   :  { %1247 = vmatprep.mubr.bf16.mxu1 %v2938_v39 }
  0xce   :  { %1553 = vmatmul.mubr.bf16.gmra.mrb[80].mxu0 %v2952_v44 }
  0xcf   :  { %2342 = vmatprep.mubr.msk.bf16.mxu0 %vm974_vm0, %v2954_v45 }
  0xd1   :  { %1248 = vmatmul.mubr.bf16.gmra.mrb[72].mxu1 %v2941_v42 }
  0xd2   :  { %1255 = vmatprep.mubr.bf16.mxu1 %v2944_v43 }
  0xd6   :  { %1561 = vmatmul.mubr.bf16.gmra.mrb[84].mxu0 %v2958_v48 }
  0xd7   :  { %2343 = vmatprep.mubr.msk.bf16.mxu0 %vm974_vm0, %v2960_v49 }
  0xd9   :  { %1256 = vmatmul.mubr.bf16.gmra.mrb[76].mxu1 %v2947_v46  ;;  %v3001_v46 = vld [vmem:[%s3737_s0 + $0x380] ss:$16 sps:$4 sm:$0xff]  }
  0xda   :  { %1263 = vmatprep.mubr.bf16.mxu1 %v2950_v47 }
  0xde   :  { %1569 = vmatmul.mubr.bf16.gmra.mrb[88].mxu0 %v2964_v52  ;;  %v3012_v52 = vld [vmem:[%s3737_s0 + $0x3c8] ss:$16 sps:$4 sm:$0xff]  }
  0xdf   :  { %2344 = vmatprep.mubr.msk.bf16.mxu0 %vm974_vm0, %v2966_v53 }
  0xe1   :  { %1264 = vmatmul.mubr.bf16.gmra.mrb[80].mxu1 %v2953_v50  ;;  %v3004_v50 = vld [vmem:[%s3737_s0 + $0x3a4] ss:$16 sps:$4 sm:$0xff]  }
  0xe2   :  { %1271 = vmatprep.mubr.bf16.mxu1 %v2956_v51 }
  0xe6   :  { %1577 = vmatmul.mubr.bf16.gmra.mrb[92].mxu0 %v2970_v56 }
  0xe7   :  { %2345 = vmatprep.mubr.msk.bf16.mxu0 %vm974_vm0, %v2972_v57  ;;  %v3014_v57 = vld [vmem:[%s3737_s0 + $0x3ec] ss:$16 sps:$4 sm:$0xff]  }
  0xe9   :  { %1272 = vmatmul.mubr.bf16.gmra.mrb[84].mxu1 %v2959_v54 }
  0xea   :  { %1279 = vmatprep.mubr.bf16.mxu1 %v2962_v55 }
  0xee   :  { %1585 = vmatmul.mubr.bf16.gmra.mrb[96].mxu0 %v2976_v60 }
  0xef   :  { %2346 = vmatprep.mubr.msk.bf16.mxu0 %vm974_vm0, %v2978_v61 }
  0xf1   :  { %1280 = vmatmul.mubr.bf16.gmra.mrb[88].mxu1 %v2965_v58 }
  0xf2   :  { %1287 = vmatprep.mubr.bf16.mxu1 %v2968_v59 }
  0xf6   :  { %1593 = vmatmul.mubr.bf16.gmra.mrb[100].mxu0 %v2982_v0 }
  0xf7   :  { %2347 = vmatprep.mubr.msk.bf16.mxu0 %vm974_vm0, %v2984_v1 }
  0xf9   :  { %1288 = vmatmul.mubr.bf16.gmra.mrb[92].mxu1 %v2971_v62 }
  0xfa   :  { %1295 = vmatprep.mubr.bf16.mxu1 %v2974_v63 }
  0xfe   :  { %1601 = vmatmul.mubr.bf16.gmra.mrb[104].mxu0 %v2988_v4 }
  0xff   :  { %2348 = vmatprep.mubr.msk.bf16.mxu0 %vm974_vm0, %v2990_v5 }
 0x101   :  { %1296 = vmatmul.mubr.bf16.gmra.mrb[96].mxu1 %v2977_v2  ;;  %v1394_v7 = vpop.f32.mrb[0].mxu0 }
 0x102   :  { %1303 = vmatprep.mubr.bf16.mxu1 %v2980_v3  ;;  %v1396_v9 = vpop.f32.mrb[1].mxu0  ;;  %v3007_v3 = vld [vmem:[%s3737_s0 + $0x3a0] ss:$16 sps:$4 sm:$0xff]  }
 0x103   :  { %v1397_v11 = vpop.f32.mrb[2].mxu0  ;;  %v3018_v9 = vld [vmem:[%s3737_s0 + $0x3e8] ss:$16 sps:$4 sm:$0xff]  }
 0x104   :  { %v1399_v13 = vpop.f32.mrb[3].mxu0 }
 0x106   :  { %1609 = vmatmul.mubr.bf16.gmra.mrb[108].mxu0 %v2994_v10 }
 0x107   :  { %2349 = vmatprep.mubr.msk.bf16.mxu0 %vm974_vm0, %v2996_v12 }
 0x109   :  { %1304 = vmatmul.mubr.bf16.gmra.mrb[100].mxu1 %v2983_v6  ;;  %v1402_v15 = vpop.f32.mrb[4].mxu0 }
 0x10a   :  { %1311 = vmatprep.mubr.bf16.mxu1 %v2986_v8  ;;  %v1404_v17 = vpop.f32.mrb[5].mxu0 }
 0x10b   :  { %v1405_v19 = vpop.f32.mrb[6].mxu0 }
 0x10c   :  { %v1407_v21 = vpop.f32.mrb[7].mxu0 }
 0x10e   :  { %1617 = vmatmul.mubr.bf16.gmra.mrb[112].mxu0 %v3000_v18 }
 0x10f   :  { %2350 = vmatprep.mubr.msk.bf16.mxu0 %vm974_vm0, %v3002_v20 }
 0x111   :  { %1312 = vmatmul.mubr.bf16.gmra.mrb[104].mxu1 %v2989_v14  ;;  %v1410_v27 = vpop.f32.mrb[8].mxu0 }
 0x112   :  { %1319 = vmatprep.mubr.bf16.mxu1 %v2992_v16  ;;  %v1412_v30 = vpop.f32.mrb[9].mxu0 }
 0x113   :  { %v1413_v35 = vpop.f32.mrb[10].mxu0 }
 0x114   :  { %v1105_v23 = vpop.f32.mrb[0].mxu1  ;;  %v1415_v37 = vpop.f32.mrb[11].mxu0 }
 0x115   :  { %v1106_v24 = vadd.f32 %v3524_v22, %v1105_v23  ;;  %v1107_v25 = vpop.f32.mrb[1].mxu1 }
 0x116   :  { %v1108_v28 = vpop.f32.mrb[2].mxu1  ;;  %1625 = vmatmul.mubr.bf16.gmra.mrb[116].mxu0 %v3006_v31 }
 0x117   :  { %v1395_v32 = vadd.f32 %v1394_v7, %v1106_v24  ;;  %v1109_v33 = vadd.f32 %v3524_v22, %v1108_v28  ;;  %v1110_v34 = vpop.f32.mrb[3].mxu1  ;;  %2351 = vmatprep.mubr.msk.bf16.mxu0 %vm974_vm0, %v3008_v36  ;;  %v3010_v7 = vld [vmem:[%s3737_s0 + $0x3c4] ss:$16 sps:$4 sm:$0xff]   ;;  %v3013_v24 = vld [vmem:[%s3737_s0 + $0x3c0] ss:$16 sps:$4 sm:$0xff]  }
 0x118   :  { %v3016_v28 = vld [vmem:[%s3737_s0 + $0x3e4] ss:$16 sps:$4 sm:$0xff]  }
 0x119   :  { %v1713_v38 = vmul.f32 0.2, %v1395_v32  ;;  %v1398_v39 = vadd.f32 %v1397_v11, %v1109_v33  ;;  %1320 = vmatmul.mubr.bf16.gmra.mrb[108].mxu1 %v2995_v26  ;;  %vm1649_vm1 = vcmp.ge.f32.partialorder %v1395_v32, 0.0  ;;  %v1418_v47 = vpop.f32.mrb[12].mxu0 }
 0x11a   :  { %1327 = vmatprep.mubr.bf16.mxu1 %v2998_v29  ;;  %v1420_v51 = vpop.f32.mrb[13].mxu0 }
 0x11b   :  { %vm1650_vm2 = vcmp.ge.f32.partialorder %v1398_v39, 0.0  ;;  %v1714_v40 = vmul.f32 0.2, %v1398_v39  ;;  %v1777_v42 = vsel %vm1649_vm1, %v1395_v32, %v1713_v38  ;;  %v1421_v56 = vpop.f32.mrb[14].mxu0 }
 0x11c   :  { %v1113_v41 = vpop.f32.mrb[4].mxu1  ;;  %v1423_v58 = vpop.f32.mrb[15].mxu0 }
 0x11d   :  { %v1778_v43 = vsel %vm1650_vm2, %v1398_v39, %v1714_v40  ;;  %v1114_v44 = vadd.f32 %v3524_v22, %v1113_v41  ;;  %v1115_v45 = vpop.f32.mrb[5].mxu1 }
 0x11e   :  { %v2484_v48 = vpack.c.bf16 %v1778_v43, %v1777_v42  ;;  %v1116_v49 = vpop.f32.mrb[6].mxu1  ;;  %1633 = vmatmul.mubr.bf16.gmra.mrb[120].mxu0 %v3012_v52  ;;  %v3019_v43 = vld [vmem:[%s3737_s0 + $0x3e0] ss:$16 sps:$4 sm:$0xff]  }
 0x11f   :  { %v1403_v53 = vadd.f32 %v1402_v15, %v1114_v44  ;;  %v1117_v54 = vadd.f32 %v3524_v22, %v1116_v49  ;;  %v1118_v55 = vpop.f32.mrb[7].mxu1  ;;  %2352 = vmatprep.mubr.msk.bf16.mxu0 %vm974_vm0, %v3014_v57 }
 0x120   :  { %2485 = vst [vmem:[%s3739_s3] sm:$0xff] %v2484_v48  }
 0x121   :  { %v1715_v59 = vmul.f32 0.2, %v1403_v53  ;;  %v1406_v60 = vadd.f32 %v1405_v19, %v1117_v54  ;;  %1328 = vmatmul.mubr.bf16.gmra.mrb[112].mxu1 %v3001_v46  ;;  %vm1651_vm3 = vcmp.ge.f32.partialorder %v1403_v53, 0.0  ;;  %v1426_v4 = vpop.f32.mrb[16].mxu0 }
 0x122   :  { %1335 = vmatprep.mubr.bf16.mxu1 %v3004_v50  ;;  %v1428_v8 = vpop.f32.mrb[17].mxu0 }
 0x123   :  { %vm1652_vm4 = vcmp.ge.f32.partialorder %v1406_v60, 0.0  ;;  %v1716_v61 = vmul.f32 0.2, %v1406_v60  ;;  %v1779_v63 = vsel %vm1651_vm3, %v1403_v53, %v1715_v59  ;;  %v1429_v13 = vpop.f32.mrb[18].mxu0 }
 0x124   :  { %v1121_v62 = vpop.f32.mrb[8].mxu1  ;;  %v1431_v14 = vpop.f32.mrb[19].mxu0 }
 0x125   :  { %v1780_v0 = vsel %vm1652_vm4, %v1406_v60, %v1716_v61  ;;  %v1122_v1 = vadd.f32 %v3524_v22, %v1121_v62  ;;  %v1123_v2 = vpop.f32.mrb[9].mxu1 }
 0x126   :  { %v2489_v5 = vpack.c.bf16 %v1780_v0, %v1779_v63  ;;  %v1124_v6 = vpop.f32.mrb[10].mxu1  ;;  %1641 = vmatmul.mubr.bf16.gmra.mrb[124].mxu0 %v3018_v9 }
 0x127   :  { %v1411_v10 = vadd.f32 %v1410_v27, %v1122_v1  ;;  %v1125_v11 = vadd.f32 %v3524_v22, %v1124_v6  ;;  %v1126_v12 = vpop.f32.mrb[11].mxu1 }
 0x128   :  { %2641 = vst [vmem:[%s3739_s3 + $0x8] sm:$0xff] %v2489_v5  }
 0x129   :  { %v1717_v15 = vmul.f32 0.2, %v1411_v10  ;;  %v1414_v16 = vadd.f32 %v1413_v35, %v1125_v11  ;;  %1336 = vmatmul.mubr.bf16.gmra.mrb[116].mxu1 %v3007_v3  ;;  %vm1653_vm5 = vcmp.ge.f32.partialorder %v1411_v10, 0.0  ;;  %v1434_v25 = vpop.f32.mrb[20].mxu0 }
 0x12a   :  { %1343 = vmatprep.mubr.bf16.mxu1 %v3010_v7  ;;  %v1436_v29 = vpop.f32.mrb[21].mxu0 }
 0x12b   :  { %vm1654_vm6 = vcmp.ge.f32.partialorder %v1414_v16, 0.0  ;;  %v1718_v17 = vmul.f32 0.2, %v1414_v16  ;;  %v1781_v19 = vsel %vm1653_vm5, %v1411_v10, %v1717_v15  ;;  %v1437_v33 = vpop.f32.mrb[22].mxu0 }
 0x12c   :  { %v1129_v18 = vpop.f32.mrb[12].mxu1  ;;  %v1439_v34 = vpop.f32.mrb[23].mxu0 }
 0x12d   :  { %v1782_v20 = vsel %vm1654_vm6, %v1414_v16, %v1718_v17  ;;  %v1130_v21 = vadd.f32 %v3524_v22, %v1129_v18  ;;  %v1131_v23 = vpop.f32.mrb[13].mxu1 }
 0x12e   :  { %v2494_v26 = vpack.c.bf16 %v1782_v20, %v1781_v19  ;;  %v1132_v27 = vpop.f32.mrb[14].mxu1 }
 0x12f   :  { %v1419_v30 = vadd.f32 %v1418_v47, %v1130_v21  ;;  %v1133_v31 = vadd.f32 %v3524_v22, %v1132_v27  ;;  %v1134_v32 = vpop.f32.mrb[15].mxu1 }
 0x130   :  { %2642 = vst [vmem:[%s3739_s3 + $0x10] sm:$0xff] %v2494_v26  }
 0x131   :  { %v1719_v35 = vmul.f32 0.2, %v1419_v30  ;;  %v1422_v36 = vadd.f32 %v1421_v56, %v1133_v31  ;;  %1344 = vmatmul.mubr.bf16.gmra.mrb[120].mxu1 %v3013_v24  ;;  %vm1655_vm7 = vcmp.ge.f32.partialorder %v1419_v30, 0.0  ;;  %v1442_v44 = vpop.f32.mrb[24].mxu0 }
 0x132   :  { %1351 = vmatprep.mubr.bf16.mxu1 %v3016_v28  ;;  %v1444_v47 = vpop.f32.mrb[25].mxu0 }
 0x133   :  { %vm1656_vm8 = vcmp.ge.f32.partialorder %v1422_v36, 0.0  ;;  %v1720_v37 = vmul.f32 0.2, %v1422_v36  ;;  %v1783_v39 = vsel %vm1655_vm7, %v1419_v30, %v1719_v35  ;;  %v1445_v51 = vpop.f32.mrb[26].mxu0 }
 0x134   :  { %v1137_v38 = vpop.f32.mrb[16].mxu1  ;;  %v1447_v52 = vpop.f32.mrb[27].mxu0 }
 0x135   :  { %v1784_v40 = vsel %vm1656_vm8, %v1422_v36, %v1720_v37  ;;  %v1138_v41 = vadd.f32 %v3524_v22, %v1137_v38  ;;  %v1139_v42 = vpop.f32.mrb[17].mxu1 }
 0x136   :  { %v2499_v45 = vpack.c.bf16 %v1784_v40, %v1783_v39  ;;  %v1140_v46 = vpop.f32.mrb[18].mxu1 }
 0x137   :  { %v1427_v48 = vadd.f32 %v1426_v4, %v1138_v41  ;;  %v1141_v49 = vadd.f32 %v3524_v22, %v1140_v46  ;;  %v1142_v50 = vpop.f32.mrb[19].mxu1 }
 0x138   :  { %2643 = vst [vmem:[%s3739_s3 + $0x18] sm:$0xff] %v2499_v45  }
 0x139   :  { %v1721_v53 = vmul.f32 0.2, %v1427_v48  ;;  %v1430_v54 = vadd.f32 %v1429_v13, %v1141_v49  ;;  %1352 = vmatmul.mubr.bf16.gmra.mrb[124].mxu1 %v3019_v43  ;;  %vm1657_vm9 = vcmp.ge.f32.partialorder %v1427_v48, 0.0  ;;  %v1450_v61 = vpop.f32.mrb[28].mxu0 }
 0x13a   :  { %v1452_v0 = vpop.f32.mrb[29].mxu0 }
 0x13b   :  { %vm1658_vm10 = vcmp.ge.f32.partialorder %v1430_v54, 0.0  ;;  %v1722_v55 = vmul.f32 0.2, %v1430_v54  ;;  %v1785_v57 = vsel %vm1657_vm9, %v1427_v48, %v1721_v53  ;;  %v1453_v4 = vpop.f32.mrb[30].mxu0 }
 0x13c   :  { %v1145_v56 = vpop.f32.mrb[20].mxu1  ;;  %v1455_v5 = vpop.f32.mrb[31].mxu0 }
 0x13d   :  { %v1786_v58 = vsel %vm1658_vm10, %v1430_v54, %v1722_v55  ;;  %v1146_v59 = vadd.f32 %v3524_v22, %v1145_v56  ;;  %v1147_v60 = vpop.f32.mrb[21].mxu1 }
 0x13e   :  { %v2504_v62 = vpack.c.bf16 %v1786_v58, %v1785_v57  ;;  %v1148_v63 = vpop.f32.mrb[22].mxu1 }
 0x13f   :  { %v1435_v1 = vadd.f32 %v1434_v25, %v1146_v59  ;;  %v1149_v2 = vadd.f32 %v3524_v22, %v1148_v63  ;;  %v1150_v3 = vpop.f32.mrb[23].mxu1 }
 0x140   :  { %2644 = vst [vmem:[%s3739_s3 + $0x20] sm:$0xff] %v2504_v62  }
 0x141   :  { %v1723_v6 = vmul.f32 0.2, %v1435_v1  ;;  %v1438_v7 = vadd.f32 %v1437_v33, %v1149_v2  ;;  %vm1659_vm11 = vcmp.ge.f32.partialorder %v1435_v1, 0.0  ;;  %v1458_v14 = vpop.f32.mrb[32].mxu0 }
 0x142   :  { %v1460_v17 = vpop.f32.mrb[33].mxu0 }
 0x143   :  { %vm1660_vm12 = vcmp.ge.f32.partialorder %v1438_v7, 0.0  ;;  %v1724_v8 = vmul.f32 0.2, %v1438_v7  ;;  %v1787_v10 = vsel %vm1659_vm11, %v1435_v1, %v1723_v6  ;;  %v1461_v21 = vpop.f32.mrb[34].mxu0 }
 0x144   :  { %v1153_v9 = vpop.f32.mrb[24].mxu1  ;;  %v1463_v23 = vpop.f32.mrb[35].mxu0 }
 0x145   :  { %v1788_v11 = vsel %vm1660_vm12, %v1438_v7, %v1724_v8  ;;  %v1154_v12 = vadd.f32 %v3524_v22, %v1153_v9  ;;  %v1155_v13 = vpop.f32.mrb[25].mxu1 }
 0x146   :  { %v2509_v15 = vpack.c.bf16 %v1788_v11, %v1787_v10  ;;  %v1156_v16 = vpop.f32.mrb[26].mxu1 }
 0x147   :  { %v1443_v18 = vadd.f32 %v1442_v44, %v1154_v12  ;;  %v1157_v19 = vadd.f32 %v3524_v22, %v1156_v16  ;;  %v1158_v20 = vpop.f32.mrb[27].mxu1 }
 0x148   :  { %2645 = vst [vmem:[%s3739_s3 + $0x28] sm:$0xff] %v2509_v15  }
 0x149   :  { %v1725_v24 = vmul.f32 0.2, %v1443_v18  ;;  %v1446_v25 = vadd.f32 %v1445_v51, %v1157_v19  ;;  %vm1661_vm13 = vcmp.ge.f32.partialorder %v1443_v18, 0.0  ;;  %v1466_v32 = vpop.f32.mrb[36].mxu0 }
 0x14a   :  { %v1468_v35 = vpop.f32.mrb[37].mxu0 }
 0x14b   :  { %vm1662_vm14 = vcmp.ge.f32.partialorder %v1446_v25, 0.0  ;;  %v1726_v26 = vmul.f32 0.2, %v1446_v25  ;;  %v1789_v28 = vsel %vm1661_vm13, %v1443_v18, %v1725_v24  ;;  %v1469_v39 = vpop.f32.mrb[38].mxu0 }
 0x14c   :  { %v1161_v27 = vpop.f32.mrb[28].mxu1  ;;  %v1471_v40 = vpop.f32.mrb[39].mxu0 }
 0x14d   :  { %v1790_v29 = vsel %vm1662_vm14, %v1446_v25, %v1726_v26  ;;  %v1162_v30 = vadd.f32 %v3524_v22, %v1161_v27  ;;  %v1163_v31 = vpop.f32.mrb[29].mxu1 }
 0x14e   :  { %v2514_v33 = vpack.c.bf16 %v1790_v29, %v1789_v28  ;;  %v1164_v34 = vpop.f32.mrb[30].mxu1 }
 0x14f   :  { %v1451_v36 = vadd.f32 %v1450_v61, %v1162_v30  ;;  %v1165_v37 = vadd.f32 %v3524_v22, %v1164_v34  ;;  %v1166_v38 = vpop.f32.mrb[31].mxu1 }
 0x150   :  { %2646 = vst [vmem:[%s3739_s3 + $0x30] sm:$0xff] %v2514_v33  }
 0x151   :  { %v1727_v41 = vmul.f32 0.2, %v1451_v36  ;;  %v1454_v42 = vadd.f32 %v1453_v4, %v1165_v37  ;;  %vm1663_vm15 = vcmp.ge.f32.partialorder %v1451_v36, 0.0  ;;  %v1474_v49 = vpop.f32.mrb[40].mxu0 }
 0x152   :  { %v1476_v52 = vpop.f32.mrb[41].mxu0 }
 0x153   :  { %vm1664_vm0 = vcmp.ge.f32.partialorder %v1454_v42, 0.0  ;;  %v1728_v43 = vmul.f32 0.2, %v1454_v42  ;;  %v1791_v45 = vsel %vm1663_vm15, %v1451_v36, %v1727_v41  ;;  %v1477_v56 = vpop.f32.mrb[42].mxu0 }
 0x154   :  { %v1169_v44 = vpop.f32.mrb[32].mxu1  ;;  %v1479_v57 = vpop.f32.mrb[43].mxu0 }
 0x155   :  { %v1792_v46 = vsel %vm1664_vm0, %v1454_v42, %v1728_v43  ;;  %v1170_v47 = vadd.f32 %v3524_v22, %v1169_v44  ;;  %v1171_v48 = vpop.f32.mrb[33].mxu1 }
 0x156   :  { %v2519_v50 = vpack.c.bf16 %v1792_v46, %v1791_v45  ;;  %v1172_v51 = vpop.f32.mrb[34].mxu1 }
 0x157   :  { %v1459_v53 = vadd.f32 %v1458_v14, %v1170_v47  ;;  %v1173_v54 = vadd.f32 %v3524_v22, %v1172_v51  ;;  %v1174_v55 = vpop.f32.mrb[35].mxu1 }
 0x158   :  { %2647 = vst [vmem:[%s3739_s3 + $0x38] sm:$0xff] %v2519_v50  }
 0x159   :  { %v1729_v58 = vmul.f32 0.2, %v1459_v53  ;;  %v1462_v59 = vadd.f32 %v1461_v21, %v1173_v54  ;;  %vm1665_vm1 = vcmp.ge.f32.partialorder %v1459_v53, 0.0  ;;  %v1482_v2 = vpop.f32.mrb[44].mxu0 }
 0x15a   :  { %v1484_v5 = vpop.f32.mrb[45].mxu0 }
 0x15b   :  { %vm1666_vm2 = vcmp.ge.f32.partialorder %v1462_v59, 0.0  ;;  %v1730_v60 = vmul.f32 0.2, %v1462_v59  ;;  %v1793_v62 = vsel %vm1665_vm1, %v1459_v53, %v1729_v58  ;;  %v1485_v9 = vpop.f32.mrb[46].mxu0 }
 0x15c   :  { %v1177_v61 = vpop.f32.mrb[36].mxu1  ;;  %v1487_v10 = vpop.f32.mrb[47].mxu0 }
 0x15d   :  { %v1794_v63 = vsel %vm1666_vm2, %v1462_v59, %v1730_v60  ;;  %v1178_v0 = vadd.f32 %v3524_v22, %v1177_v61  ;;  %v1179_v1 = vpop.f32.mrb[37].mxu1 }
 0x15e   :  { %v2524_v3 = vpack.c.bf16 %v1794_v63, %v1793_v62  ;;  %v1180_v4 = vpop.f32.mrb[38].mxu1 }
 0x15f   :  { %v1467_v6 = vadd.f32 %v1466_v32, %v1178_v0  ;;  %v1181_v7 = vadd.f32 %v3524_v22, %v1180_v4  ;;  %v1182_v8 = vpop.f32.mrb[39].mxu1 }
 0x160   :  { %2648 = vst [vmem:[%s3739_s3 + $0x40] sm:$0xff] %v2524_v3  }
 0x161   :  { %v1731_v11 = vmul.f32 0.2, %v1467_v6  ;;  %v1470_v12 = vadd.f32 %v1469_v39, %v1181_v7  ;;  %vm1667_vm3 = vcmp.ge.f32.partialorder %v1467_v6, 0.0  ;;  %v1490_v19 = vpop.f32.mrb[48].mxu0 }
 0x162   :  { %v1492_v23 = vpop.f32.mrb[49].mxu0 }
 0x163   :  { %vm1668_vm4 = vcmp.ge.f32.partialorder %v1470_v12, 0.0  ;;  %v1732_v13 = vmul.f32 0.2, %v1470_v12  ;;  %v1795_v15 = vsel %vm1667_vm3, %v1467_v6, %v1731_v11  ;;  %v1493_v27 = vpop.f32.mrb[50].mxu0 }
 0x164   :  { %v1185_v14 = vpop.f32.mrb[40].mxu1  ;;  %v1495_v28 = vpop.f32.mrb[51].mxu0 }
 0x165   :  { %v1796_v16 = vsel %vm1668_vm4, %v1470_v12, %v1732_v13  ;;  %v1186_v17 = vadd.f32 %v3524_v22, %v1185_v14  ;;  %v1187_v18 = vpop.f32.mrb[41].mxu1 }
 0x166   :  { %v2529_v20 = vpack.c.bf16 %v1796_v16, %v1795_v15  ;;  %v1188_v21 = vpop.f32.mrb[42].mxu1 }
 0x167   :  { %v1475_v24 = vadd.f32 %v1474_v49, %v1186_v17  ;;  %v1189_v25 = vadd.f32 %v3524_v22, %v1188_v21  ;;  %v1190_v26 = vpop.f32.mrb[43].mxu1 }
 0x168   :  { %2649 = vst [vmem:[%s3739_s3 + $0x48] sm:$0xff] %v2529_v20  }
 0x169   :  { %v1733_v29 = vmul.f32 0.2, %v1475_v24  ;;  %v1478_v30 = vadd.f32 %v1477_v56, %v1189_v25  ;;  %vm1669_vm5 = vcmp.ge.f32.partialorder %v1475_v24, 0.0  ;;  %v1498_v37 = vpop.f32.mrb[52].mxu0 }
 0x16a   :  { %v1500_v40 = vpop.f32.mrb[53].mxu0 }
 0x16b   :  { %vm1670_vm6 = vcmp.ge.f32.partialorder %v1478_v30, 0.0  ;;  %v1734_v31 = vmul.f32 0.2, %v1478_v30  ;;  %v1797_v33 = vsel %vm1669_vm5, %v1475_v24, %v1733_v29  ;;  %v1501_v44 = vpop.f32.mrb[54].mxu0 }
 0x16c   :  { %v1193_v32 = vpop.f32.mrb[44].mxu1  ;;  %v1503_v45 = vpop.f32.mrb[55].mxu0 }
 0x16d   :  { %v1798_v34 = vsel %vm1670_vm6, %v1478_v30, %v1734_v31  ;;  %v1194_v35 = vadd.f32 %v3524_v22, %v1193_v32  ;;  %v1195_v36 = vpop.f32.mrb[45].mxu1 }
 0x16e   :  { %v2534_v38 = vpack.c.bf16 %v1798_v34, %v1797_v33  ;;  %v1196_v39 = vpop.f32.mrb[46].mxu1 }
 0x16f   :  { %v1483_v41 = vadd.f32 %v1482_v2, %v1194_v35  ;;  %v1197_v42 = vadd.f32 %v3524_v22, %v1196_v39  ;;  %v1198_v43 = vpop.f32.mrb[47].mxu1 }
 0x170   :  { %2650 = vst [vmem:[%s3739_s3 + $0x50] sm:$0xff] %v2534_v38  }
 0x171   :  { %v1735_v46 = vmul.f32 0.2, %v1483_v41  ;;  %v1486_v47 = vadd.f32 %v1485_v9, %v1197_v42  ;;  %vm1671_vm7 = vcmp.ge.f32.partialorder %v1483_v41, 0.0  ;;  %v1506_v54 = vpop.f32.mrb[56].mxu0 }
 0x172   :  { %v1508_v57 = vpop.f32.mrb[57].mxu0 }
 0x173   :  { %vm1672_vm8 = vcmp.ge.f32.partialorder %v1486_v47, 0.0  ;;  %v1736_v48 = vmul.f32 0.2, %v1486_v47  ;;  %v1799_v50 = vsel %vm1671_vm7, %v1483_v41, %v1735_v46  ;;  %v1509_v61 = vpop.f32.mrb[58].mxu0 }
 0x174   :  { %v1201_v49 = vpop.f32.mrb[48].mxu1  ;;  %v1511_v62 = vpop.f32.mrb[59].mxu0 }
 0x175   :  { %v1800_v51 = vsel %vm1672_vm8, %v1486_v47, %v1736_v48  ;;  %v1202_v52 = vadd.f32 %v3524_v22, %v1201_v49  ;;  %v1203_v53 = vpop.f32.mrb[49].mxu1 }
 0x176   :  { %v2539_v55 = vpack.c.bf16 %v1800_v51, %v1799_v50  ;;  %v1204_v56 = vpop.f32.mrb[50].mxu1 }
 0x177   :  { %v1491_v58 = vadd.f32 %v1490_v19, %v1202_v52  ;;  %v1205_v59 = vadd.f32 %v3524_v22, %v1204_v56  ;;  %v1206_v60 = vpop.f32.mrb[51].mxu1 }
 0x178   :  { %2651 = vst [vmem:[%s3739_s3 + $0x58] sm:$0xff] %v2539_v55  }
 0x179   :  { %v1737_v63 = vmul.f32 0.2, %v1491_v58  ;;  %v1494_v0 = vadd.f32 %v1493_v27, %v1205_v59  ;;  %vm1673_vm9 = vcmp.ge.f32.partialorder %v1491_v58, 0.0  ;;  %v1514_v7 = vpop.f32.mrb[60].mxu0 }
 0x17a   :  { %v1516_v10 = vpop.f32.mrb[61].mxu0 }
 0x17b   :  { %vm1674_vm10 = vcmp.ge.f32.partialorder %v1494_v0, 0.0  ;;  %v1738_v1 = vmul.f32 0.2, %v1494_v0  ;;  %v1801_v3 = vsel %vm1673_vm9, %v1491_v58, %v1737_v63  ;;  %v1517_v14 = vpop.f32.mrb[62].mxu0 }
 0x17c   :  { %v1209_v2 = vpop.f32.mrb[52].mxu1  ;;  %v1519_v15 = vpop.f32.mrb[63].mxu0 }
 0x17d   :  { %v1802_v4 = vsel %vm1674_vm10, %v1494_v0, %v1738_v1  ;;  %v1210_v5 = vadd.f32 %v3524_v22, %v1209_v2  ;;  %v1211_v6 = vpop.f32.mrb[53].mxu1 }
 0x17e   :  { %v2544_v8 = vpack.c.bf16 %v1802_v4, %v1801_v3  ;;  %v1212_v9 = vpop.f32.mrb[54].mxu1 }
 0x17f   :  { %v1499_v11 = vadd.f32 %v1498_v37, %v1210_v5  ;;  %v1213_v12 = vadd.f32 %v3524_v22, %v1212_v9  ;;  %v1214_v13 = vpop.f32.mrb[55].mxu1 }
 0x180   :  { %2652 = vst [vmem:[%s3739_s3 + $0x60] sm:$0xff] %v2544_v8  }
 0x181   :  { %v1739_v16 = vmul.f32 0.2, %v1499_v11  ;;  %v1502_v17 = vadd.f32 %v1501_v44, %v1213_v12  ;;  %vm1675_vm11 = vcmp.ge.f32.partialorder %v1499_v11, 0.0  ;;  %v1522_v25 = vpop.f32.mrb[64].mxu0 }
 0x182   :  { %v1524_v28 = vpop.f32.mrb[65].mxu0 }
 0x183   :  { %vm1676_vm12 = vcmp.ge.f32.partialorder %v1502_v17, 0.0  ;;  %v1740_v18 = vmul.f32 0.2, %v1502_v17  ;;  %v1803_v20 = vsel %vm1675_vm11, %v1499_v11, %v1739_v16  ;;  %v1525_v32 = vpop.f32.mrb[66].mxu0 }
 0x184   :  { %v1217_v19 = vpop.f32.mrb[56].mxu1  ;;  %v1527_v33 = vpop.f32.mrb[67].mxu0 }
 0x185   :  { %v1804_v21 = vsel %vm1676_vm12, %v1502_v17, %v1740_v18  ;;  %v1218_v23 = vadd.f32 %v3524_v22, %v1217_v19  ;;  %v1219_v24 = vpop.f32.mrb[57].mxu1 }
 0x186   :  { %v2549_v26 = vpack.c.bf16 %v1804_v21, %v1803_v20  ;;  %v1220_v27 = vpop.f32.mrb[58].mxu1 }
 0x187   :  { %v1507_v29 = vadd.f32 %v1506_v54, %v1218_v23  ;;  %v1221_v30 = vadd.f32 %v3524_v22, %v1220_v27  ;;  %v1222_v31 = vpop.f32.mrb[59].mxu1 }
 0x188   :  { %2653 = vst [vmem:[%s3739_s3 + $0x68] sm:$0xff] %v2549_v26  }
 0x189   :  { %v1741_v34 = vmul.f32 0.2, %v1507_v29  ;;  %v1510_v35 = vadd.f32 %v1509_v61, %v1221_v30  ;;  %vm1677_vm13 = vcmp.ge.f32.partialorder %v1507_v29, 0.0  ;;  %v1530_v42 = vpop.f32.mrb[68].mxu0 }
 0x18a   :  { %v1532_v45 = vpop.f32.mrb[69].mxu0 }
 0x18b   :  { %vm1678_vm14 = vcmp.ge.f32.partialorder %v1510_v35, 0.0  ;;  %v1742_v36 = vmul.f32 0.2, %v1510_v35  ;;  %v1805_v38 = vsel %vm1677_vm13, %v1507_v29, %v1741_v34  ;;  %v1533_v49 = vpop.f32.mrb[70].mxu0 }
 0x18c   :  { %v1225_v37 = vpop.f32.mrb[60].mxu1  ;;  %v1535_v50 = vpop.f32.mrb[71].mxu0 }
 0x18d   :  { %v1806_v39 = vsel %vm1678_vm14, %v1510_v35, %v1742_v36  ;;  %v1226_v40 = vadd.f32 %v3524_v22, %v1225_v37  ;;  %v1227_v41 = vpop.f32.mrb[61].mxu1 }
 0x18e   :  { %v2554_v43 = vpack.c.bf16 %v1806_v39, %v1805_v38  ;;  %v1228_v44 = vpop.f32.mrb[62].mxu1 }
 0x18f   :  { %v1515_v46 = vadd.f32 %v1514_v7, %v1226_v40  ;;  %v1229_v47 = vadd.f32 %v3524_v22, %v1228_v44  ;;  %v1230_v48 = vpop.f32.mrb[63].mxu1 }
 0x190   :  { %2654 = vst [vmem:[%s3739_s3 + $0x70] sm:$0xff] %v2554_v43  }
 0x191   :  { %v1743_v51 = vmul.f32 0.2, %v1515_v46  ;;  %v1518_v52 = vadd.f32 %v1517_v14, %v1229_v47  ;;  %vm1679_vm15 = vcmp.ge.f32.partialorder %v1515_v46, 0.0  ;;  %v1538_v59 = vpop.f32.mrb[72].mxu0 }
 0x192   :  { %v1540_v62 = vpop.f32.mrb[73].mxu0 }
 0x193   :  { %vm1680_vm0 = vcmp.ge.f32.partialorder %v1518_v52, 0.0  ;;  %v1744_v53 = vmul.f32 0.2, %v1518_v52  ;;  %v1807_v55 = vsel %vm1679_vm15, %v1515_v46, %v1743_v51  ;;  %v1541_v2 = vpop.f32.mrb[74].mxu0 }
 0x194   :  { %v1233_v54 = vpop.f32.mrb[64].mxu1  ;;  %v1543_v3 = vpop.f32.mrb[75].mxu0 }
 0x195   :  { %v1808_v56 = vsel %vm1680_vm0, %v1518_v52, %v1744_v53  ;;  %v1234_v57 = vadd.f32 %v3524_v22, %v1233_v54  ;;  %v1235_v58 = vpop.f32.mrb[65].mxu1 }
 0x196   :  { %v2559_v60 = vpack.c.bf16 %v1808_v56, %v1807_v55  ;;  %v1236_v61 = vpop.f32.mrb[66].mxu1 }
 0x197   :  { %v1523_v63 = vadd.f32 %v1522_v25, %v1234_v57  ;;  %v1237_v0 = vadd.f32 %v3524_v22, %v1236_v61  ;;  %v1238_v1 = vpop.f32.mrb[67].mxu1 }
 0x198   :  { %2655 = vst [vmem:[%s3739_s3 + $0x78] sm:$0xff] %v2559_v60  }
 0x199   :  { %v1745_v4 = vmul.f32 0.2, %v1523_v63  ;;  %v1526_v5 = vadd.f32 %v1525_v32, %v1237_v0  ;;  %vm1681_vm1 = vcmp.ge.f32.partialorder %v1523_v63, 0.0  ;;  %v1546_v12 = vpop.f32.mrb[76].mxu0 }
 0x19a   :  { %v1548_v15 = vpop.f32.mrb[77].mxu0 }
 0x19b   :  { %vm1682_vm2 = vcmp.ge.f32.partialorder %v1526_v5, 0.0  ;;  %v1746_v6 = vmul.f32 0.2, %v1526_v5  ;;  %v1809_v8 = vsel %vm1681_vm1, %v1523_v63, %v1745_v4  ;;  %v1549_v19 = vpop.f32.mrb[78].mxu0 }
 0x19c   :  { %v1241_v7 = vpop.f32.mrb[68].mxu1  ;;  %v1551_v20 = vpop.f32.mrb[79].mxu0 }
 0x19d   :  { %v1810_v9 = vsel %vm1682_vm2, %v1526_v5, %v1746_v6  ;;  %v1242_v10 = vadd.f32 %v3524_v22, %v1241_v7  ;;  %v1243_v11 = vpop.f32.mrb[69].mxu1 }
 0x19e   :  { %v2564_v13 = vpack.c.bf16 %v1810_v9, %v1809_v8  ;;  %v1244_v14 = vpop.f32.mrb[70].mxu1 }
 0x19f   :  { %v1531_v16 = vadd.f32 %v1530_v42, %v1242_v10  ;;  %v1245_v17 = vadd.f32 %v3524_v22, %v1244_v14  ;;  %v1246_v18 = vpop.f32.mrb[71].mxu1 }
 0x1a0   :  { %2656 = vst [vmem:[%s3739_s3 + $0x80] sm:$0xff] %v2564_v13  }
 0x1a1   :  { %v1747_v21 = vmul.f32 0.2, %v1531_v16  ;;  %v1534_v23 = vadd.f32 %v1533_v49, %v1245_v17  ;;  %vm1683_vm3 = vcmp.ge.f32.partialorder %v1531_v16, 0.0  ;;  %v1554_v30 = vpop.f32.mrb[80].mxu0 }
 0x1a2   :  { %v1556_v33 = vpop.f32.mrb[81].mxu0 }
 0x1a3   :  { %vm1684_vm4 = vcmp.ge.f32.partialorder %v1534_v23, 0.0  ;;  %v1748_v24 = vmul.f32 0.2, %v1534_v23  ;;  %v1811_v26 = vsel %vm1683_vm3, %v1531_v16, %v1747_v21  ;;  %v1557_v37 = vpop.f32.mrb[82].mxu0 }
 0x1a4   :  { %v1249_v25 = vpop.f32.mrb[72].mxu1  ;;  %v1559_v38 = vpop.f32.mrb[83].mxu0 }
 0x1a5   :  { %v1812_v27 = vsel %vm1684_vm4, %v1534_v23, %v1748_v24  ;;  %v1250_v28 = vadd.f32 %v3524_v22, %v1249_v25  ;;  %v1251_v29 = vpop.f32.mrb[73].mxu1 }
 0x1a6   :  { %v2569_v31 = vpack.c.bf16 %v1812_v27, %v1811_v26  ;;  %v1252_v32 = vpop.f32.mrb[74].mxu1 }
 0x1a7   :  { %v1539_v34 = vadd.f32 %v1538_v59, %v1250_v28  ;;  %v1253_v35 = vadd.f32 %v3524_v22, %v1252_v32  ;;  %v1254_v36 = vpop.f32.mrb[75].mxu1 }
 0x1a8   :  { %2657 = vst [vmem:[%s3739_s3 + $0x88] sm:$0xff] %v2569_v31  }
 0x1a9   :  { %v1749_v39 = vmul.f32 0.2, %v1539_v34  ;;  %v1542_v40 = vadd.f32 %v1541_v2, %v1253_v35  ;;  %vm1685_vm5 = vcmp.ge.f32.partialorder %v1539_v34, 0.0  ;;  %v1562_v47 = vpop.f32.mrb[84].mxu0 }
 0x1aa   :  { %v1564_v50 = vpop.f32.mrb[85].mxu0 }
 0x1ab   :  { %vm1686_vm6 = vcmp.ge.f32.partialorder %v1542_v40, 0.0  ;;  %v1750_v41 = vmul.f32 0.2, %v1542_v40  ;;  %v1813_v43 = vsel %vm1685_vm5, %v1539_v34, %v1749_v39  ;;  %v1565_v54 = vpop.f32.mrb[86].mxu0 }
 0x1ac   :  { %v1257_v42 = vpop.f32.mrb[76].mxu1  ;;  %v1567_v55 = vpop.f32.mrb[87].mxu0 }
 0x1ad   :  { %v1814_v44 = vsel %vm1686_vm6, %v1542_v40, %v1750_v41  ;;  %v1258_v45 = vadd.f32 %v3524_v22, %v1257_v42  ;;  %v1259_v46 = vpop.f32.mrb[77].mxu1 }
 0x1ae   :  { %v2574_v48 = vpack.c.bf16 %v1814_v44, %v1813_v43  ;;  %v1260_v49 = vpop.f32.mrb[78].mxu1 }
 0x1af   :  { %v1547_v51 = vadd.f32 %v1546_v12, %v1258_v45  ;;  %v1261_v52 = vadd.f32 %v3524_v22, %v1260_v49  ;;  %v1262_v53 = vpop.f32.mrb[79].mxu1 }
 0x1b0   :  { %2658 = vst [vmem:[%s3739_s3 + $0x90] sm:$0xff] %v2574_v48  }
 0x1b1   :  { %v1751_v56 = vmul.f32 0.2, %v1547_v51  ;;  %v1550_v57 = vadd.f32 %v1549_v19, %v1261_v52  ;;  %vm1687_vm7 = vcmp.ge.f32.partialorder %v1547_v51, 0.0  ;;  %v1570_v0 = vpop.f32.mrb[88].mxu0 }
 0x1b2   :  { %v1572_v3 = vpop.f32.mrb[89].mxu0 }
 0x1b3   :  { %vm1688_vm8 = vcmp.ge.f32.partialorder %v1550_v57, 0.0  ;;  %v1752_v58 = vmul.f32 0.2, %v1550_v57  ;;  %v1815_v60 = vsel %vm1687_vm7, %v1547_v51, %v1751_v56  ;;  %v1573_v7 = vpop.f32.mrb[90].mxu0  ;;  %v3691_v3 = vld [vmem:[%s3738_s2] ss:$0 sm:$0xff] }
 0x1b4   :  { %v1265_v59 = vpop.f32.mrb[80].mxu1  ;;  %v1575_v8 = vpop.f32.mrb[91].mxu0 }
 0x1b5   :  { %v1816_v61 = vsel %vm1688_vm8, %v1550_v57, %v1752_v58  ;;  %v1266_v62 = vadd.f32 %v3524_v22, %v1265_v59  ;;  %v1267_v63 = vpop.f32.mrb[81].mxu1 }
 0x1b6   :  { %v2579_v1 = vpack.c.bf16 %v1816_v61, %v1815_v60  ;;  %v1268_v2 = vpop.f32.mrb[82].mxu1 }
 0x1b7   :  { %v1555_v4 = vadd.f32 %v1554_v30, %v1266_v62  ;;  %v1269_v5 = vadd.f32 %v3524_v22, %v1268_v2  ;;  %v1270_v6 = vpop.f32.mrb[83].mxu1 }
 0x1b8   :  { %2659 = vst [vmem:[%s3739_s3 + $0x98] sm:$0xff] %v2579_v1  }
 0x1b9   :  { %v1753_v9 = vmul.f32 0.2, %v1555_v4  ;;  %v1558_v10 = vadd.f32 %v1557_v37, %v1269_v5  ;;  %vm1689_vm9 = vcmp.ge.f32.partialorder %v1555_v4, 0.0  ;;  %v1578_v17 = vpop.f32.mrb[92].mxu0 }
 0x1ba   :  { %v1580_v20 = vpop.f32.mrb[93].mxu0 }
 0x1bb   :  { %vm1690_vm10 = vcmp.ge.f32.partialorder %v1558_v10, 0.0  ;;  %v1754_v11 = vmul.f32 0.2, %v1558_v10  ;;  %v1817_v13 = vsel %vm1689_vm9, %v1555_v4, %v1753_v9  ;;  %v1581_v25 = vpop.f32.mrb[94].mxu0 }
 0x1bc   :  { %v1273_v12 = vpop.f32.mrb[84].mxu1  ;;  %v1583_v26 = vpop.f32.mrb[95].mxu0 }
 0x1bd   :  { %v1818_v14 = vsel %vm1690_vm10, %v1558_v10, %v1754_v11  ;;  %v1274_v15 = vadd.f32 %v3524_v22, %v1273_v12  ;;  %v1275_v16 = vpop.f32.mrb[85].mxu1 }
 0x1be   :  { %v2584_v18 = vpack.c.bf16 %v1818_v14, %v1817_v13  ;;  %v1276_v19 = vpop.f32.mrb[86].mxu1 }
 0x1bf   :  { %v1563_v21 = vadd.f32 %v1562_v47, %v1274_v15  ;;  %v1277_v23 = vadd.f32 %v3524_v22, %v1276_v19  ;;  %v1278_v24 = vpop.f32.mrb[87].mxu1 }
 0x1c0   :  { %2660 = vst [vmem:[%s3739_s3 + $0xa0] sm:$0xff] %v2584_v18  }
 0x1c1   :  { %v1755_v27 = vmul.f32 0.2, %v1563_v21  ;;  %v1566_v28 = vadd.f32 %v1565_v54, %v1277_v23  ;;  %vm1691_vm11 = vcmp.ge.f32.partialorder %v1563_v21, 0.0  ;;  %v1586_v35 = vpop.f32.mrb[96].mxu0 }
 0x1c2   :  { %v1588_v38 = vpop.f32.mrb[97].mxu0 }
 0x1c3   :  { %vm1692_vm12 = vcmp.ge.f32.partialorder %v1566_v28, 0.0  ;;  %v1756_v29 = vmul.f32 0.2, %v1566_v28  ;;  %v1819_v31 = vsel %vm1691_vm11, %v1563_v21, %v1755_v27  ;;  %v1589_v42 = vpop.f32.mrb[98].mxu0 }
 0x1c4   :  { %v1281_v30 = vpop.f32.mrb[88].mxu1  ;;  %v1591_v43 = vpop.f32.mrb[99].mxu0 }
 0x1c5   :  { %v1820_v32 = vsel %vm1692_vm12, %v1566_v28, %v1756_v29  ;;  %v1282_v33 = vadd.f32 %v3524_v22, %v1281_v30  ;;  %v1283_v34 = vpop.f32.mrb[89].mxu1 }
 0x1c6   :  { %v2589_v36 = vpack.c.bf16 %v1820_v32, %v1819_v31  ;;  %v1284_v37 = vpop.f32.mrb[90].mxu1 }
 0x1c7   :  { %v1571_v39 = vadd.f32 %v1570_v0, %v1282_v33  ;;  %v1285_v40 = vadd.f32 %v3524_v22, %v1284_v37  ;;  %v1286_v41 = vpop.f32.mrb[91].mxu1 }
 0x1c8   :  { %2661 = vst [vmem:[%s3739_s3 + $0xa8] sm:$0xff] %v2589_v36  }
 0x1c9   :  { %v1757_v44 = vmul.f32 0.2, %v1571_v39  ;;  %v1574_v45 = vadd.f32 %v1573_v7, %v1285_v40  ;;  %vm1693_vm13 = vcmp.ge.f32.partialorder %v1571_v39, 0.0  ;;  %v1594_v52 = vpop.f32.mrb[100].mxu0 }
 0x1ca   :  { %v1596_v55 = vpop.f32.mrb[101].mxu0 }
 0x1cb   :  { %vm1694_vm14 = vcmp.ge.f32.partialorder %v1574_v45, 0.0  ;;  %v1758_v46 = vmul.f32 0.2, %v1574_v45  ;;  %v1821_v48 = vsel %vm1693_vm13, %v1571_v39, %v1757_v44  ;;  %v1597_v59 = vpop.f32.mrb[102].mxu0 }
 0x1cc   :  { %v1289_v47 = vpop.f32.mrb[92].mxu1  ;;  %v1599_v60 = vpop.f32.mrb[103].mxu0 }
 0x1cd   :  { %v1822_v49 = vsel %vm1694_vm14, %v1574_v45, %v1758_v46  ;;  %v1290_v50 = vadd.f32 %v3524_v22, %v1289_v47  ;;  %v1291_v51 = vpop.f32.mrb[93].mxu1 }
 0x1ce   :  { %v2594_v53 = vpack.c.bf16 %v1822_v49, %v1821_v48  ;;  %v1292_v54 = vpop.f32.mrb[94].mxu1 }
 0x1cf   :  { %v1579_v56 = vadd.f32 %v1578_v17, %v1290_v50  ;;  %v1293_v57 = vadd.f32 %v3524_v22, %v1292_v54  ;;  %v1294_v58 = vpop.f32.mrb[95].mxu1 }
 0x1d0   :  { %2662 = vst [vmem:[%s3739_s3 + $0xb0] sm:$0xff] %v2594_v53  }
 0x1d1   :  { %v1759_v61 = vmul.f32 0.2, %v1579_v56  ;;  %v1582_v62 = vadd.f32 %v1581_v25, %v1293_v57  ;;  %vm1695_vm15 = vcmp.ge.f32.partialorder %v1579_v56, 0.0  ;;  %v1602_v5 = vpop.f32.mrb[104].mxu0 }
 0x1d2   :  { %v1604_v8 = vpop.f32.mrb[105].mxu0 }
 0x1d3   :  { %vm1696_vm0 = vcmp.ge.f32.partialorder %v1582_v62, 0.0  ;;  %v1760_v63 = vmul.f32 0.2, %v1582_v62  ;;  %v1823_v1 = vsel %vm1695_vm15, %v1579_v56, %v1759_v61  ;;  %v1605_v12 = vpop.f32.mrb[106].mxu0 }
 0x1d4   :  { %v1297_v0 = vpop.f32.mrb[96].mxu1  ;;  %v1607_v13 = vpop.f32.mrb[107].mxu0 }
 0x1d5   :  { %v1824_v2 = vsel %vm1696_vm0, %v1582_v62, %v1760_v63  ;;  %v1298_v22 = vadd.f32 %v3691_v3, %v1297_v0  ;;  %v1299_v4 = vpop.f32.mrb[97].mxu1 }
 0x1d6   :  { %v2599_v6 = vpack.c.bf16 %v1824_v2, %v1823_v1  ;;  %v1300_v7 = vpop.f32.mrb[98].mxu1 }
 0x1d7   :  { %v1587_v9 = vadd.f32 %v1586_v35, %v1298_v22  ;;  %v1301_v10 = vadd.f32 %v3691_v3, %v1300_v7  ;;  %v1302_v11 = vpop.f32.mrb[99].mxu1 }
 0x1d8   :  { %2663 = vst [vmem:[%s3739_s3 + $0xb8] sm:$0xff] %v2599_v6  }
 0x1d9   :  { %v1761_v14 = vmul.f32 0.2, %v1587_v9  ;;  %v1590_v15 = vadd.f32 %v1589_v42, %v1301_v10  ;;  %vm1697_vm1 = vcmp.ge.f32.partialorder %v1587_v9, 0.0  ;;  %v1610_v23 = vpop.f32.mrb[108].mxu0 }
 0x1da   :  { %v1612_v26 = vpop.f32.mrb[109].mxu0 }
 0x1db   :  { %vm1698_vm2 = vcmp.ge.f32.partialorder %v1590_v15, 0.0  ;;  %v1762_v16 = vmul.f32 0.2, %v1590_v15  ;;  %v1825_v18 = vsel %vm1697_vm1, %v1587_v9, %v1761_v14  ;;  %v1613_v30 = vpop.f32.mrb[110].mxu0 }
 0x1dc   :  { %v1305_v17 = vpop.f32.mrb[100].mxu1  ;;  %v1615_v31 = vpop.f32.mrb[111].mxu0 }
 0x1dd   :  { %v1826_v19 = vsel %vm1698_vm2, %v1590_v15, %v1762_v16  ;;  %v1306_v20 = vadd.f32 %v3691_v3, %v1305_v17  ;;  %v1307_v21 = vpop.f32.mrb[101].mxu1 }
 0x1de   :  { %v2604_v24 = vpack.c.bf16 %v1826_v19, %v1825_v18  ;;  %v1308_v25 = vpop.f32.mrb[102].mxu1 }
 0x1df   :  { %v1595_v27 = vadd.f32 %v1594_v52, %v1306_v20  ;;  %v1309_v28 = vadd.f32 %v3691_v3, %v1308_v25  ;;  %v1310_v29 = vpop.f32.mrb[103].mxu1 }
 0x1e0   :  { %2664 = vst [vmem:[%s3739_s3 + $0xc0] sm:$0xff] %v2604_v24  }
 0x1e1   :  { %v1763_v32 = vmul.f32 0.2, %v1595_v27  ;;  %v1598_v33 = vadd.f32 %v1597_v59, %v1309_v28  ;;  %vm1699_vm3 = vcmp.ge.f32.partialorder %v1595_v27, 0.0  ;;  %v1618_v40 = vpop.f32.mrb[112].mxu0 }
 0x1e2   :  { %v1620_v43 = vpop.f32.mrb[113].mxu0 }
 0x1e3   :  { %vm1700_vm4 = vcmp.ge.f32.partialorder %v1598_v33, 0.0  ;;  %v1764_v34 = vmul.f32 0.2, %v1598_v33  ;;  %v1827_v36 = vsel %vm1699_vm3, %v1595_v27, %v1763_v32  ;;  %v1621_v47 = vpop.f32.mrb[114].mxu0 }
 0x1e4   :  { %v1313_v35 = vpop.f32.mrb[104].mxu1  ;;  %v1623_v48 = vpop.f32.mrb[115].mxu0 }
 0x1e5   :  { %v1828_v37 = vsel %vm1700_vm4, %v1598_v33, %v1764_v34  ;;  %v1314_v38 = vadd.f32 %v3691_v3, %v1313_v35  ;;  %v1315_v39 = vpop.f32.mrb[105].mxu1 }
 0x1e6   :  { %v2609_v41 = vpack.c.bf16 %v1828_v37, %v1827_v36  ;;  %v1316_v42 = vpop.f32.mrb[106].mxu1 }
 0x1e7   :  { %v1603_v44 = vadd.f32 %v1602_v5, %v1314_v38  ;;  %v1317_v45 = vadd.f32 %v3691_v3, %v1316_v42  ;;  %v1318_v46 = vpop.f32.mrb[107].mxu1 }
 0x1e8   :  { %2665 = vst [vmem:[%s3739_s3 + $0xc8] sm:$0xff] %v2609_v41  }
 0x1e9   :  { %v1765_v49 = vmul.f32 0.2, %v1603_v44  ;;  %v1606_v50 = vadd.f32 %v1605_v12, %v1317_v45  ;;  %vm1701_vm5 = vcmp.ge.f32.partialorder %v1603_v44, 0.0  ;;  %v1626_v57 = vpop.f32.mrb[116].mxu0 }
 0x1ea   :  { %v1628_v60 = vpop.f32.mrb[117].mxu0 }
 0x1eb   :  { %vm1702_vm6 = vcmp.ge.f32.partialorder %v1606_v50, 0.0  ;;  %v1766_v51 = vmul.f32 0.2, %v1606_v50  ;;  %v1829_v53 = vsel %vm1701_vm5, %v1603_v44, %v1765_v49  ;;  %v1629_v0 = vpop.f32.mrb[118].mxu0 }
 0x1ec   :  { %v1321_v52 = vpop.f32.mrb[108].mxu1  ;;  %v1631_v1 = vpop.f32.mrb[119].mxu0 }
 0x1ed   :  { %v1830_v54 = vsel %vm1702_vm6, %v1606_v50, %v1766_v51  ;;  %v1322_v55 = vadd.f32 %v3691_v3, %v1321_v52  ;;  %v1323_v56 = vpop.f32.mrb[109].mxu1 }
 0x1ee   :  { %v2614_v58 = vpack.c.bf16 %v1830_v54, %v1829_v53  ;;  %v1324_v59 = vpop.f32.mrb[110].mxu1 }
 0x1ef   :  { %v1611_v61 = vadd.f32 %v1610_v23, %v1322_v55  ;;  %v1325_v62 = vadd.f32 %v3691_v3, %v1324_v59  ;;  %v1326_v63 = vpop.f32.mrb[111].mxu1 }
 0x1f0   :  { %2666 = vst [vmem:[%s3739_s3 + $0xd0] sm:$0xff] %v2614_v58  }
 0x1f1   :  { %v1767_v2 = vmul.f32 0.2, %v1611_v61  ;;  %v1614_v22 = vadd.f32 %v1613_v30, %v1325_v62  ;;  %vm1703_vm7 = vcmp.ge.f32.partialorder %v1611_v61, 0.0  ;;  %v1634_v10 = vpop.f32.mrb[120].mxu0 }
 0x1f2   :  { %v1636_v13 = vpop.f32.mrb[121].mxu0 }
 0x1f3   :  { %vm1704_vm8 = vcmp.ge.f32.partialorder %v1614_v22, 0.0  ;;  %v1768_v4 = vmul.f32 0.2, %v1614_v22  ;;  %v1831_v6 = vsel %vm1703_vm7, %v1611_v61, %v1767_v2  ;;  %v1637_v17 = vpop.f32.mrb[122].mxu0 }
 0x1f4   :  { %v1329_v5 = vpop.f32.mrb[112].mxu1  ;;  %v1639_v18 = vpop.f32.mrb[123].mxu0 }
 0x1f5   :  { %v1832_v7 = vsel %vm1704_vm8, %v1614_v22, %v1768_v4  ;;  %v1330_v8 = vadd.f32 %v3691_v3, %v1329_v5  ;;  %v1331_v9 = vpop.f32.mrb[113].mxu1 }
 0x1f6   :  { %v2619_v11 = vpack.c.bf16 %v1832_v7, %v1831_v6  ;;  %v1332_v12 = vpop.f32.mrb[114].mxu1 }
 0x1f7   :  { %v1619_v14 = vadd.f32 %v1618_v40, %v1330_v8  ;;  %v1333_v15 = vadd.f32 %v3691_v3, %v1332_v12  ;;  %v1334_v16 = vpop.f32.mrb[115].mxu1 }
 0x1f8   :  { %2667 = vst [vmem:[%s3739_s3 + $0xd8] sm:$0xff] %v2619_v11  }
 0x1f9   :  { %v1769_v19 = vmul.f32 0.2, %v1619_v14  ;;  %v1622_v20 = vadd.f32 %v1621_v47, %v1333_v15  ;;  %vm1705_vm9 = vcmp.ge.f32.partialorder %v1619_v14, 0.0  ;;  %v1642_v28 = vpop.f32.mrb[124].mxu0 }
 0x1fa   :  { %v1644_v31 = vpop.f32.mrb[125].mxu0 }
 0x1fb   :  { %vm1706_vm10 = vcmp.ge.f32.partialorder %v1622_v20, 0.0  ;;  %v1770_v21 = vmul.f32 0.2, %v1622_v20  ;;  %v1833_v24 = vsel %vm1705_vm9, %v1619_v14, %v1769_v19  ;;  %v1645_v35 = vpop.f32.mrb[126].mxu0 }
 0x1fc   :  { %v1337_v23 = vpop.f32.mrb[116].mxu1  ;;  %v1647_v36 = vpop.f32.mrb[127].mxu0 }
 0x1fd   :  { %v1834_v25 = vsel %vm1706_vm10, %v1622_v20, %v1770_v21  ;;  %v1338_v26 = vadd.f32 %v3691_v3, %v1337_v23  ;;  %v1339_v27 = vpop.f32.mrb[117].mxu1 }
 0x1fe   :  { %v2624_v29 = vpack.c.bf16 %v1834_v25, %v1833_v24  ;;  %v1340_v30 = vpop.f32.mrb[118].mxu1 }
 0x1ff   :  { %v1627_v32 = vadd.f32 %v1626_v57, %v1338_v26  ;;  %v1341_v33 = vadd.f32 %v3691_v3, %v1340_v30  ;;  %v1342_v34 = vpop.f32.mrb[119].mxu1 }
 0x200   :  { %2668 = vst [vmem:[%s3739_s3 + $0xe0] sm:$0xff] %v2624_v29  }
 0x201   :  { %v1771_v37 = vmul.f32 0.2, %v1627_v32  ;;  %v1630_v38 = vadd.f32 %v1629_v0, %v1341_v33  ;;  %vm1707_vm11 = vcmp.ge.f32.partialorder %v1627_v32, 0.0 }
 0x203   :  { %vm1708_vm12 = vcmp.ge.f32.partialorder %v1630_v38, 0.0  ;;  %v1772_v39 = vmul.f32 0.2, %v1630_v38  ;;  %v1835_v41 = vsel %vm1707_vm11, %v1627_v32, %v1771_v37 }
 0x204   :  { %v1345_v40 = vpop.f32.mrb[120].mxu1 }
 0x205   :  { %v1836_v42 = vsel %vm1708_vm12, %v1630_v38, %v1772_v39  ;;  %v1346_v43 = vadd.f32 %v3691_v3, %v1345_v40  ;;  %v1347_v44 = vpop.f32.mrb[121].mxu1 }
 0x206   :  { %v2629_v45 = vpack.c.bf16 %v1836_v42, %v1835_v41  ;;  %v1348_v46 = vpop.f32.mrb[122].mxu1 }
 0x207   :  { %v1635_v47 = vadd.f32 %v1634_v10, %v1346_v43  ;;  %v1349_v48 = vadd.f32 %v3691_v3, %v1348_v46  ;;  %v1350_v49 = vpop.f32.mrb[123].mxu1 }
 0x208   :  { %2669 = vst [vmem:[%s3739_s3 + $0xe8] sm:$0xff] %v2629_v45  }
 0x209   :  { %v1773_v50 = vmul.f32 0.2, %v1635_v47  ;;  %v1638_v51 = vadd.f32 %v1637_v17, %v1349_v48  ;;  %vm1709_vm13 = vcmp.ge.f32.partialorder %v1635_v47, 0.0 }
 0x20b   :  { %vm1710_vm14 = vcmp.ge.f32.partialorder %v1638_v51, 0.0  ;;  %v1774_v52 = vmul.f32 0.2, %v1638_v51  ;;  %v1837_v54 = vsel %vm1709_vm13, %v1635_v47, %v1773_v50 }
 0x20c   :  { %v1353_v53 = vpop.f32.mrb[124].mxu1 }
 0x20d   :  { %v1838_v55 = vsel %vm1710_vm14, %v1638_v51, %v1774_v52  ;;  %v1354_v56 = vadd.f32 %v3691_v3, %v1353_v53  ;;  %v1355_v57 = vpop.f32.mrb[125].mxu1 }
 0x20e   :  { %v2634_v58 = vpack.c.bf16 %v1838_v55, %v1837_v54  ;;  %v1356_v59 = vpop.f32.mrb[126].mxu1 }
 0x20f   :  { %v1643_v60 = vadd.f32 %v1642_v28, %v1354_v56  ;;  %v1357_v61 = vadd.f32 %v3691_v3, %v1356_v59  ;;  %v1358_v62 = vpop.f32.mrb[127].mxu1 }
 0x210   :  { %2670 = vst [vmem:[%s3739_s3 + $0xf0] sm:$0xff] %v2634_v58  }
 0x211   :  { %v1775_v63 = vmul.f32 0.2, %v1643_v60  ;;  %v1646_v0 = vadd.f32 %v1645_v35, %v1357_v61  ;;  %vm1711_vm15 = vcmp.ge.f32.partialorder %v1643_v60, 0.0 }
 0x213   :  { %vm1712_vm0 = vcmp.ge.f32.partialorder %v1646_v0, 0.0  ;;  %v1776_v1 = vmul.f32 0.2, %v1646_v0  ;;  %v1839_v2 = vsel %vm1711_vm15, %v1643_v60, %v1775_v63 }
 0x215   :  { %v1840_v22 = vsel %vm1712_vm0, %v1646_v0, %v1776_v1 }
 0x216   :  { %v2639_v4 = vpack.c.bf16 %v1840_v22, %v1839_v2 }
 0x218   :  { %2671 = vst [vmem:[%s3739_s3 + $0xf8] sm:$0xff] %v2639_v4  }

// kernel: unet_forward.21
= control target key start
LH: loop header
LB: loop body
LE: loop exit
PB: predicated region body
PF: predicated region fallthrough
CT: control target
= control target key end

     0   :  { %v1130_v0 = vmov 0   ;;  %vm446_vm0 = vcmask 130048   ;;  %s1663_s1 = inlined_call_operand.vmem [shape: bf16[144,128], index: 1, kind: input, shape index: {}]   ;;  %s1664_s0 = inlined_call_operand.vmem [shape: bf16[512,144], index: 0, kind: input, shape index: {}]   ;;  %s1665_s2 = inlined_call_operand.vmem [shape: f32[1,128], index: 2, kind: input, shape index: {}]   ;;  %s1666_s3 = inlined_call_operand.vmem [shape: f32[512,128], index: 3, kind: output, shape index: {}]  }
   0x1   :  { %543 = vmatprep.subr.bf16.mxu0 %v1130_v0  ;;  %1006 = vmatprep.subr.bf16.mxu1 %v1130_v0  ;;  %v1025_v1 = vld [vmem:[%s1663_s1] sm:$0xff]   ;;  %v1026_v2 = vld [vmem:[%s1663_s1 + $0x8] sm:$0xff]   ;;  %v1027_v3 = vld [vmem:[%s1663_s1 + $0x10] sm:$0xff]  }
   0x2   :  { %544 = vmatpush1.bf16.msra.mxu0 %v1025_v1  ;;  %1015 = vmatpush1.bf16.msra.mxu1 %v1025_v1  ;;  %v1028_v4 = vld [vmem:[%s1663_s1 + $0x18] sm:$0xff]   ;;  %v1036_v5 = vld [vmem:[%s1664_s0 + $0x4] ss:$8 sps:$4 sm:$0xff]   ;;  %v1031_v9 = vld [vmem:[%s1663_s1 + $0x30] sm:$0xff]  }
   0x3   :  { %545 = vmatprep.subr.bf16.mxu0 %v1130_v0  ;;  %1007 = vmatprep.subr.bf16.mxu1 %v1130_v0  ;;  %v1039_v6 = vld [vmem:[%s1664_s0 + $0x104] ss:$8 sps:$4 sm:$0xff]   ;;  %v1032_v10 = vld [vmem:[%s1663_s1 + $0x38] sm:$0xff]   ;;  %v1034_v12 = vld [vmem:[%s1664_s0] ss:$8 sps:$4 sm:$0xff]  }
   0x4   :  { %974 = vmatprep.mubr.msk.bf16.mxu0 %vm446_vm0, %v1036_v5  ;;  %990 = vmatprep.mubr.msk.bf16.mxu1 %vm446_vm0, %v1039_v6  ;;  %v1029_v7 = vld [vmem:[%s1663_s1 + $0x20] sm:$0xff]   ;;  %v1030_v8 = vld [vmem:[%s1663_s1 + $0x28] sm:$0xff]   ;;  %v1040_v14 = vld [vmem:[%s1664_s0 + $0x14] ss:$8 sps:$4 sm:$0xff]  }
   0x5   :  { %v1033_v11 = vld [vmem:[%s1663_s1 + $0x40] sm:$0xff]   ;;  %v1042_v15 = vld [vmem:[%s1664_s0 + $0x114] ss:$8 sps:$4 sm:$0xff]   ;;  %v1044_v16 = vld [vmem:[%s1664_s0 + $0x10] ss:$8 sps:$4 sm:$0xff]  }
   0x6   :  { %546 = vmatpush1.bf16.msra.mxu0 %v1026_v2  ;;  %1016 = vmatpush1.bf16.msra.mxu1 %v1026_v2  ;;  %v1037_v13 = vld [vmem:[%s1664_s0 + $0x100] ss:$8 sps:$4 sm:$0xff]   ;;  %v1045_v17 = vld [vmem:[%s1664_s0 + $0x110] ss:$8 sps:$4 sm:$0xff]   ;;  %v1046_v18 = vld [vmem:[%s1664_s0 + $0x24] ss:$8 sps:$4 sm:$0xff]  }
   0x7   :  { %547 = vmatprep.subr.bf16.mxu0 %v1130_v0  ;;  %1008 = vmatprep.subr.bf16.mxu1 %v1130_v0  ;;  %v1048_v19 = vld [vmem:[%s1664_s0 + $0x124] ss:$8 sps:$4 sm:$0xff]   ;;  %v1050_v20 = vld [vmem:[%s1664_s0 + $0x20] ss:$8 sps:$4 sm:$0xff]   ;;  %v1052_v22 = vld [vmem:[%s1664_s0 + $0x34] ss:$8 sps:$4 sm:$0xff]  }
   0x8   :  { %v1051_v21 = vld [vmem:[%s1664_s0 + $0x120] ss:$8 sps:$4 sm:$0xff]   ;;  %v1054_v23 = vld [vmem:[%s1664_s0 + $0x134] ss:$8 sps:$4 sm:$0xff]   ;;  %v1056_v24 = vld [vmem:[%s1664_s0 + $0x30] ss:$8 sps:$4 sm:$0xff]  }
   0x9   :  { %v1057_v25 = vld [vmem:[%s1664_s0 + $0x130] ss:$8 sps:$4 sm:$0xff]   ;;  %v1058_v26 = vld [vmem:[%s1664_s0 + $0x44] ss:$8 sps:$4 sm:$0xff]   ;;  %v1062_v28 = vld [vmem:[%s1664_s0 + $0x40] ss:$8 sps:$4 sm:$0xff]  }
   0xa   :  { %548 = vmatpush1.bf16.msra.mxu0 %v1027_v3  ;;  %1017 = vmatpush1.bf16.msra.mxu1 %v1027_v3  ;;  %v1060_v27 = vld [vmem:[%s1664_s0 + $0x144] ss:$8 sps:$4 sm:$0xff]   ;;  %v1063_v29 = vld [vmem:[%s1664_s0 + $0x140] ss:$8 sps:$4 sm:$0xff]   ;;  %v1064_v30 = vld [vmem:[%s1664_s0 + $0x54] ss:$8 sps:$4 sm:$0xff]  }
   0xb   :  { %549 = vmatprep.subr.bf16.mxu0 %v1130_v0  ;;  %1009 = vmatprep.subr.bf16.mxu1 %v1130_v0  ;;  %v1066_v31 = vld [vmem:[%s1664_s0 + $0x154] ss:$8 sps:$4 sm:$0xff]   ;;  %v1068_v32 = vld [vmem:[%s1664_s0 + $0x50] ss:$8 sps:$4 sm:$0xff]   ;;  %v1070_v34 = vld [vmem:[%s1664_s0 + $0x64] ss:$8 sps:$4 sm:$0xff]  }
   0xc   :  { %v1069_v33 = vld [vmem:[%s1664_s0 + $0x150] ss:$8 sps:$4 sm:$0xff]   ;;  %v1072_v35 = vld [vmem:[%s1664_s0 + $0x164] ss:$8 sps:$4 sm:$0xff]   ;;  %v1074_v36 = vld [vmem:[%s1664_s0 + $0x60] ss:$8 sps:$4 sm:$0xff]  }
   0xd   :  { %v1075_v37 = vld [vmem:[%s1664_s0 + $0x160] ss:$8 sps:$4 sm:$0xff]   ;;  %v1076_v38 = vld [vmem:[%s1664_s0 + $0x74] ss:$8 sps:$4 sm:$0xff]   ;;  %v1080_v40 = vld [vmem:[%s1664_s0 + $0x70] ss:$8 sps:$4 sm:$0xff]  }
   0xe   :  { %550 = vmatpush1.bf16.msra.mxu0 %v1028_v4  ;;  %1018 = vmatpush1.bf16.msra.mxu1 %v1028_v4  ;;  %v1078_v39 = vld [vmem:[%s1664_s0 + $0x174] ss:$8 sps:$4 sm:$0xff]   ;;  %v1081_v41 = vld [vmem:[%s1664_s0 + $0x170] ss:$8 sps:$4 sm:$0xff]   ;;  %v1082_v42 = vld [vmem:[%s1664_s0 + $0x84] ss:$8 sps:$4 sm:$0xff]  }
   0xf   :  { %551 = vmatprep.subr.bf16.mxu0 %v1130_v0  ;;  %1010 = vmatprep.subr.bf16.mxu1 %v1130_v0  ;;  %v1084_v43 = vld [vmem:[%s1664_s0 + $0x184] ss:$8 sps:$4 sm:$0xff]   ;;  %v1086_v44 = vld [vmem:[%s1664_s0 + $0x80] ss:$8 sps:$4 sm:$0xff]   ;;  %v1088_v46 = vld [vmem:[%s1664_s0 + $0x94] ss:$8 sps:$4 sm:$0xff]  }
  0x10   :  { %v1087_v45 = vld [vmem:[%s1664_s0 + $0x180] ss:$8 sps:$4 sm:$0xff]   ;;  %v1090_v47 = vld [vmem:[%s1664_s0 + $0x194] ss:$8 sps:$4 sm:$0xff]   ;;  %v1092_v48 = vld [vmem:[%s1664_s0 + $0x90] ss:$8 sps:$4 sm:$0xff]  }
  0x11   :  { %v1093_v49 = vld [vmem:[%s1664_s0 + $0x190] ss:$8 sps:$4 sm:$0xff]   ;;  %v1094_v50 = vld [vmem:[%s1664_s0 + $0xa4] ss:$8 sps:$4 sm:$0xff]   ;;  %v1098_v52 = vld [vmem:[%s1664_s0 + $0xa0] ss:$8 sps:$4 sm:$0xff]  }
  0x12   :  { %552 = vmatpush1.bf16.msra.mxu0 %v1029_v7  ;;  %1019 = vmatpush1.bf16.msra.mxu1 %v1029_v7  ;;  %v1096_v51 = vld [vmem:[%s1664_s0 + $0x1a4] ss:$8 sps:$4 sm:$0xff]   ;;  %v1099_v53 = vld [vmem:[%s1664_s0 + $0x1a0] ss:$8 sps:$4 sm:$0xff]   ;;  %v1100_v54 = vld [vmem:[%s1664_s0 + $0xb4] ss:$8 sps:$4 sm:$0xff]  }
  0x13   :  { %553 = vmatprep.subr.bf16.mxu0 %v1130_v0  ;;  %1011 = vmatprep.subr.bf16.mxu1 %v1130_v0  ;;  %v1102_v55 = vld [vmem:[%s1664_s0 + $0x1b4] ss:$8 sps:$4 sm:$0xff]   ;;  %v1104_v56 = vld [vmem:[%s1664_s0 + $0xb0] ss:$8 sps:$4 sm:$0xff]   ;;  %v1106_v58 = vld [vmem:[%s1664_s0 + $0xc4] ss:$8 sps:$4 sm:$0xff]  }
  0x14   :  { %v1105_v57 = vld [vmem:[%s1664_s0 + $0x1b0] ss:$8 sps:$4 sm:$0xff]   ;;  %v1108_v59 = vld [vmem:[%s1664_s0 + $0x1c4] ss:$8 sps:$4 sm:$0xff]   ;;  %v1110_v60 = vld [vmem:[%s1664_s0 + $0xc0] ss:$8 sps:$4 sm:$0xff]  }
  0x15   :  { %v1111_v61 = vld [vmem:[%s1664_s0 + $0x1c0] ss:$8 sps:$4 sm:$0xff]   ;;  %v1112_v62 = vld [vmem:[%s1664_s0 + $0xd4] ss:$8 sps:$4 sm:$0xff]   ;;  %v1117_v1 = vld [vmem:[%s1664_s0 + $0x1d0] ss:$8 sps:$4 sm:$0xff]  }
  0x16   :  { %554 = vmatpush1.bf16.msra.mxu0 %v1030_v8  ;;  %1020 = vmatpush1.bf16.msra.mxu1 %v1030_v8  ;;  %v1114_v63 = vld [vmem:[%s1664_s0 + $0x1d4] ss:$8 sps:$4 sm:$0xff]   ;;  %v1118_v2 = vld [vmem:[%s1664_s0 + $0xe4] ss:$8 sps:$4 sm:$0xff]   ;;  %v1122_v4 = vld [vmem:[%s1664_s0 + $0xe0] ss:$8 sps:$4 sm:$0xff]  }
  0x17   :  { %555 = vmatprep.subr.bf16.mxu0 %v1130_v0  ;;  %1012 = vmatprep.subr.bf16.mxu1 %v1130_v0  ;;  %v1120_v3 = vld [vmem:[%s1664_s0 + $0x1e4] ss:$8 sps:$4 sm:$0xff]   ;;  %v1123_v5 = vld [vmem:[%s1664_s0 + $0x1e0] ss:$8 sps:$4 sm:$0xff]   ;;  %v1124_v6 = vld [vmem:[%s1664_s0 + $0xf4] ss:$8 sps:$4 sm:$0xff]  }
  0x18   :  { %v1126_v7 = vld [vmem:[%s1664_s0 + $0x1f4] ss:$8 sps:$4 sm:$0xff]   ;;  %v1128_v8 = vld [vmem:[%s1664_s0 + $0xf0] ss:$8 sps:$4 sm:$0xff]  }
  0x1a   :  { %556 = vmatpush1.bf16.msra.mxu0 %v1031_v9  ;;  %1021 = vmatpush1.bf16.msra.mxu1 %v1031_v9  ;;  %v1129_v9 = vld [vmem:[%s1664_s0 + $0x1f0] ss:$8 sps:$4 sm:$0xff]  }
  0x1b   :  { %557 = vmatprep.subr.bf16.mxu0 %v1130_v0  ;;  %1013 = vmatprep.subr.bf16.mxu1 %v1130_v0 }
  0x1e   :  { %558 = vmatpush1.bf16.msra.mxu0 %v1032_v10  ;;  %1022 = vmatpush1.bf16.msra.mxu1 %v1032_v10  ;;  %v1405_v10 = vld [vmem:[%s1665_s2] ss:$0 sm:$0xff] }
  0x1f   :  { %559 = vmatprep.subr.bf16.mxu0 %v1130_v0  ;;  %1014 = vmatprep.subr.bf16.mxu1 %v1130_v0  ;;  %v1116_v0 = vld [vmem:[%s1664_s0 + $0xd0] ss:$8 sps:$4 sm:$0xff]  }
  0x22   :  { %560 = vmatpush1.bf16.msra.mxu0 %v1033_v11  ;;  %1023 = vmatpush1.bf16.msra.mxu1 %v1033_v11 }
  0x25   :  { %576 = vmatmul.mubr.bf16.vlgmr.msra.gmra.mrb[0].mxu0 %v1034_v12  ;;  %704 = vmatmul.mubr.bf16.vlgmr.msra.gmra.mrb[0].mxu1 %v1037_v13 }
  0x26   :  { %975 = vmatprep.mubr.msk.bf16.mxu0 %vm446_vm0, %v1040_v14  ;;  %991 = vmatprep.mubr.msk.bf16.mxu1 %vm446_vm0, %v1042_v15 }
  0x2d   :  { %584 = vmatmul.mubr.bf16.gmra.mrb[4].mxu0 %v1044_v16  ;;  %712 = vmatmul.mubr.bf16.gmra.mrb[4].mxu1 %v1045_v17 }
  0x2e   :  { %976 = vmatprep.mubr.msk.bf16.mxu0 %vm446_vm0, %v1046_v18  ;;  %992 = vmatprep.mubr.msk.bf16.mxu1 %vm446_vm0, %v1048_v19 }
  0x35   :  { %592 = vmatmul.mubr.bf16.gmra.mrb[8].mxu0 %v1050_v20  ;;  %720 = vmatmul.mubr.bf16.gmra.mrb[8].mxu1 %v1051_v21 }
  0x36   :  { %977 = vmatprep.mubr.msk.bf16.mxu0 %vm446_vm0, %v1052_v22  ;;  %993 = vmatprep.mubr.msk.bf16.mxu1 %vm446_vm0, %v1054_v23 }
  0x3d   :  { %600 = vmatmul.mubr.bf16.gmra.mrb[12].mxu0 %v1056_v24  ;;  %728 = vmatmul.mubr.bf16.gmra.mrb[12].mxu1 %v1057_v25 }
  0x3e   :  { %978 = vmatprep.mubr.msk.bf16.mxu0 %vm446_vm0, %v1058_v26  ;;  %994 = vmatprep.mubr.msk.bf16.mxu1 %vm446_vm0, %v1060_v27 }
  0x45   :  { %608 = vmatmul.mubr.bf16.gmra.mrb[16].mxu0 %v1062_v28  ;;  %736 = vmatmul.mubr.bf16.gmra.mrb[16].mxu1 %v1063_v29 }
  0x46   :  { %979 = vmatprep.mubr.msk.bf16.mxu0 %vm446_vm0, %v1064_v30  ;;  %995 = vmatprep.mubr.msk.bf16.mxu1 %vm446_vm0, %v1066_v31 }
  0x4d   :  { %616 = vmatmul.mubr.bf16.gmra.mrb[20].mxu0 %v1068_v32  ;;  %744 = vmatmul.mubr.bf16.gmra.mrb[20].mxu1 %v1069_v33 }
  0x4e   :  { %980 = vmatprep.mubr.msk.bf16.mxu0 %vm446_vm0, %v1070_v34  ;;  %996 = vmatprep.mubr.msk.bf16.mxu1 %vm446_vm0, %v1072_v35 }
  0x55   :  { %624 = vmatmul.mubr.bf16.gmra.mrb[24].mxu0 %v1074_v36  ;;  %752 = vmatmul.mubr.bf16.gmra.mrb[24].mxu1 %v1075_v37 }
  0x56   :  { %981 = vmatprep.mubr.msk.bf16.mxu0 %vm446_vm0, %v1076_v38  ;;  %997 = vmatprep.mubr.msk.bf16.mxu1 %vm446_vm0, %v1078_v39 }
  0x5d   :  { %632 = vmatmul.mubr.bf16.gmra.mrb[28].mxu0 %v1080_v40  ;;  %760 = vmatmul.mubr.bf16.gmra.mrb[28].mxu1 %v1081_v41 }
  0x5e   :  { %982 = vmatprep.mubr.msk.bf16.mxu0 %vm446_vm0, %v1082_v42  ;;  %998 = vmatprep.mubr.msk.bf16.mxu1 %vm446_vm0, %v1084_v43 }
  0x65   :  { %640 = vmatmul.mubr.bf16.gmra.mrb[32].mxu0 %v1086_v44  ;;  %768 = vmatmul.mubr.bf16.gmra.mrb[32].mxu1 %v1087_v45 }
  0x66   :  { %983 = vmatprep.mubr.msk.bf16.mxu0 %vm446_vm0, %v1088_v46  ;;  %999 = vmatprep.mubr.msk.bf16.mxu1 %vm446_vm0, %v1090_v47 }
  0x6d   :  { %648 = vmatmul.mubr.bf16.gmra.mrb[36].mxu0 %v1092_v48  ;;  %776 = vmatmul.mubr.bf16.gmra.mrb[36].mxu1 %v1093_v49 }
  0x6e   :  { %984 = vmatprep.mubr.msk.bf16.mxu0 %vm446_vm0, %v1094_v50  ;;  %1000 = vmatprep.mubr.msk.bf16.mxu1 %vm446_vm0, %v1096_v51 }
  0x75   :  { %656 = vmatmul.mubr.bf16.gmra.mrb[40].mxu0 %v1098_v52  ;;  %784 = vmatmul.mubr.bf16.gmra.mrb[40].mxu1 %v1099_v53 }
  0x76   :  { %985 = vmatprep.mubr.msk.bf16.mxu0 %vm446_vm0, %v1100_v54  ;;  %1001 = vmatprep.mubr.msk.bf16.mxu1 %vm446_vm0, %v1102_v55 }
  0x7d   :  { %664 = vmatmul.mubr.bf16.gmra.mrb[44].mxu0 %v1104_v56  ;;  %792 = vmatmul.mubr.bf16.gmra.mrb[44].mxu1 %v1105_v57 }
  0x7e   :  { %986 = vmatprep.mubr.msk.bf16.mxu0 %vm446_vm0, %v1106_v58  ;;  %1002 = vmatprep.mubr.msk.bf16.mxu1 %vm446_vm0, %v1108_v59 }
  0x85   :  { %672 = vmatmul.mubr.bf16.gmra.mrb[48].mxu0 %v1110_v60  ;;  %800 = vmatmul.mubr.bf16.gmra.mrb[48].mxu1 %v1111_v61 }
  0x86   :  { %987 = vmatprep.mubr.msk.bf16.mxu0 %vm446_vm0, %v1112_v62  ;;  %1003 = vmatprep.mubr.msk.bf16.mxu1 %vm446_vm0, %v1114_v63 }
  0x8d   :  { %680 = vmatmul.mubr.bf16.gmra.mrb[52].mxu0 %v1116_v0  ;;  %808 = vmatmul.mubr.bf16.gmra.mrb[52].mxu1 %v1117_v1 }
  0x8e   :  { %988 = vmatprep.mubr.msk.bf16.mxu0 %vm446_vm0, %v1118_v2  ;;  %1004 = vmatprep.mubr.msk.bf16.mxu1 %vm446_vm0, %v1120_v3 }
  0x95   :  { %688 = vmatmul.mubr.bf16.gmra.mrb[56].mxu0 %v1122_v4  ;;  %816 = vmatmul.mubr.bf16.gmra.mrb[56].mxu1 %v1123_v5 }
  0x96   :  { %989 = vmatprep.mubr.msk.bf16.mxu0 %vm446_vm0, %v1124_v6  ;;  %1005 = vmatprep.mubr.msk.bf16.mxu1 %vm446_vm0, %v1126_v7 }
  0x9d   :  { %696 = vmatmul.mubr.bf16.gmra.mrb[60].mxu0 %v1128_v8  ;;  %824 = vmatmul.mubr.bf16.gmra.mrb[60].mxu1 %v1129_v9 }
  0xf8   :  { %v577_v11 = vpop.f32.mrb[0].mxu0  ;;  %v705_v12 = vpop.f32.mrb[0].mxu1 }
  0xf9   :  { %v578_v13 = vadd.f32 %v1405_v10, %v577_v11  ;;  %v706_v14 = vadd.f32 %v1405_v10, %v705_v12  ;;  %v579_v15 = vpop.f32.mrb[1].mxu0  ;;  %v707_v16 = vpop.f32.mrb[1].mxu1 }
  0xfa   :  { %v580_v17 = vpop.f32.mrb[2].mxu0  ;;  %v708_v18 = vpop.f32.mrb[2].mxu1 }
  0xfb   :  { %832 = vst [vmem:[%s1666_s3] sm:$0xff] %v578_v13  ;;  %864 = vst [vmem:[%s1666_s3 + $0x100] sm:$0xff] %v706_v14  ;;  %v581_v19 = vadd.f32 %v1405_v10, %v580_v17  ;;  %v709_v20 = vadd.f32 %v1405_v10, %v708_v18  ;;  %v582_v21 = vpop.f32.mrb[3].mxu0  ;;  %v710_v22 = vpop.f32.mrb[3].mxu1 }
  0xfd   :  { %833 = vst [vmem:[%s1666_s3 + $0x8] sm:$0xff] %v581_v19  ;;  %865 = vst [vmem:[%s1666_s3 + $0x108] sm:$0xff] %v709_v20 }
 0x100   :  { %v585_v23 = vpop.f32.mrb[4].mxu0  ;;  %v713_v24 = vpop.f32.mrb[4].mxu1 }
 0x101   :  { %v586_v25 = vadd.f32 %v1405_v10, %v585_v23  ;;  %v714_v26 = vadd.f32 %v1405_v10, %v713_v24  ;;  %v587_v27 = vpop.f32.mrb[5].mxu0  ;;  %v715_v28 = vpop.f32.mrb[5].mxu1 }
 0x102   :  { %v588_v29 = vpop.f32.mrb[6].mxu0  ;;  %v716_v30 = vpop.f32.mrb[6].mxu1 }
 0x103   :  { %834 = vst [vmem:[%s1666_s3 + $0x10] sm:$0xff] %v586_v25  ;;  %866 = vst [vmem:[%s1666_s3 + $0x110] sm:$0xff] %v714_v26  ;;  %v589_v31 = vadd.f32 %v1405_v10, %v588_v29  ;;  %v717_v32 = vadd.f32 %v1405_v10, %v716_v30  ;;  %v590_v33 = vpop.f32.mrb[7].mxu0  ;;  %v718_v34 = vpop.f32.mrb[7].mxu1 }
 0x105   :  { %835 = vst [vmem:[%s1666_s3 + $0x18] sm:$0xff] %v589_v31  ;;  %867 = vst [vmem:[%s1666_s3 + $0x118] sm:$0xff] %v717_v32 }
 0x108   :  { %v593_v35 = vpop.f32.mrb[8].mxu0  ;;  %v721_v36 = vpop.f32.mrb[8].mxu1 }
 0x109   :  { %v594_v37 = vadd.f32 %v1405_v10, %v593_v35  ;;  %v722_v38 = vadd.f32 %v1405_v10, %v721_v36  ;;  %v595_v39 = vpop.f32.mrb[9].mxu0  ;;  %v723_v40 = vpop.f32.mrb[9].mxu1 }
 0x10a   :  { %v596_v41 = vpop.f32.mrb[10].mxu0  ;;  %v724_v42 = vpop.f32.mrb[10].mxu1 }
 0x10b   :  { %836 = vst [vmem:[%s1666_s3 + $0x20] sm:$0xff] %v594_v37  ;;  %868 = vst [vmem:[%s1666_s3 + $0x120] sm:$0xff] %v722_v38  ;;  %v597_v43 = vadd.f32 %v1405_v10, %v596_v41  ;;  %v725_v44 = vadd.f32 %v1405_v10, %v724_v42  ;;  %v598_v45 = vpop.f32.mrb[11].mxu0  ;;  %v726_v46 = vpop.f32.mrb[11].mxu1 }
 0x10d   :  { %837 = vst [vmem:[%s1666_s3 + $0x28] sm:$0xff] %v597_v43  ;;  %869 = vst [vmem:[%s1666_s3 + $0x128] sm:$0xff] %v725_v44 }
 0x110   :  { %v601_v47 = vpop.f32.mrb[12].mxu0  ;;  %v729_v48 = vpop.f32.mrb[12].mxu1 }
 0x111   :  { %v602_v49 = vadd.f32 %v1405_v10, %v601_v47  ;;  %v730_v50 = vadd.f32 %v1405_v10, %v729_v48  ;;  %v603_v51 = vpop.f32.mrb[13].mxu0  ;;  %v731_v52 = vpop.f32.mrb[13].mxu1 }
 0x112   :  { %v604_v53 = vpop.f32.mrb[14].mxu0  ;;  %v732_v54 = vpop.f32.mrb[14].mxu1 }
 0x113   :  { %838 = vst [vmem:[%s1666_s3 + $0x30] sm:$0xff] %v602_v49  ;;  %870 = vst [vmem:[%s1666_s3 + $0x130] sm:$0xff] %v730_v50  ;;  %v605_v55 = vadd.f32 %v1405_v10, %v604_v53  ;;  %v733_v56 = vadd.f32 %v1405_v10, %v732_v54  ;;  %v606_v57 = vpop.f32.mrb[15].mxu0  ;;  %v734_v58 = vpop.f32.mrb[15].mxu1 }
 0x115   :  { %839 = vst [vmem:[%s1666_s3 + $0x38] sm:$0xff] %v605_v55  ;;  %871 = vst [vmem:[%s1666_s3 + $0x138] sm:$0xff] %v733_v56 }
 0x118   :  { %v609_v59 = vpop.f32.mrb[16].mxu0  ;;  %v737_v60 = vpop.f32.mrb[16].mxu1 }
 0x119   :  { %v610_v61 = vadd.f32 %v1405_v10, %v609_v59  ;;  %v738_v62 = vadd.f32 %v1405_v10, %v737_v60  ;;  %v611_v63 = vpop.f32.mrb[17].mxu0  ;;  %v739_v0 = vpop.f32.mrb[17].mxu1 }
 0x11a   :  { %v612_v1 = vpop.f32.mrb[18].mxu0  ;;  %v740_v2 = vpop.f32.mrb[18].mxu1 }
 0x11b   :  { %840 = vst [vmem:[%s1666_s3 + $0x40] sm:$0xff] %v610_v61  ;;  %872 = vst [vmem:[%s1666_s3 + $0x140] sm:$0xff] %v738_v62  ;;  %v613_v3 = vadd.f32 %v1405_v10, %v612_v1  ;;  %v741_v4 = vadd.f32 %v1405_v10, %v740_v2  ;;  %v614_v5 = vpop.f32.mrb[19].mxu0  ;;  %v742_v6 = vpop.f32.mrb[19].mxu1 }
 0x11d   :  { %841 = vst [vmem:[%s1666_s3 + $0x48] sm:$0xff] %v613_v3  ;;  %873 = vst [vmem:[%s1666_s3 + $0x148] sm:$0xff] %v741_v4 }
 0x120   :  { %v617_v7 = vpop.f32.mrb[20].mxu0  ;;  %v745_v8 = vpop.f32.mrb[20].mxu1 }
 0x121   :  { %v618_v9 = vadd.f32 %v1405_v10, %v617_v7  ;;  %v746_v11 = vadd.f32 %v1405_v10, %v745_v8  ;;  %v619_v12 = vpop.f32.mrb[21].mxu0  ;;  %v747_v13 = vpop.f32.mrb[21].mxu1 }
 0x122   :  { %v620_v14 = vpop.f32.mrb[22].mxu0  ;;  %v748_v15 = vpop.f32.mrb[22].mxu1 }
 0x123   :  { %842 = vst [vmem:[%s1666_s3 + $0x50] sm:$0xff] %v618_v9  ;;  %874 = vst [vmem:[%s1666_s3 + $0x150] sm:$0xff] %v746_v11  ;;  %v621_v16 = vadd.f32 %v1405_v10, %v620_v14  ;;  %v749_v17 = vadd.f32 %v1405_v10, %v748_v15  ;;  %v622_v18 = vpop.f32.mrb[23].mxu0  ;;  %v750_v19 = vpop.f32.mrb[23].mxu1 }
 0x125   :  { %843 = vst [vmem:[%s1666_s3 + $0x58] sm:$0xff] %v621_v16  ;;  %875 = vst [vmem:[%s1666_s3 + $0x158] sm:$0xff] %v749_v17 }
 0x128   :  { %v625_v20 = vpop.f32.mrb[24].mxu0  ;;  %v753_v21 = vpop.f32.mrb[24].mxu1 }
 0x129   :  { %v626_v22 = vadd.f32 %v1405_v10, %v625_v20  ;;  %v754_v23 = vadd.f32 %v1405_v10, %v753_v21  ;;  %v627_v24 = vpop.f32.mrb[25].mxu0  ;;  %v755_v25 = vpop.f32.mrb[25].mxu1 }
 0x12a   :  { %v628_v26 = vpop.f32.mrb[26].mxu0  ;;  %v756_v27 = vpop.f32.mrb[26].mxu1 }
 0x12b   :  { %844 = vst [vmem:[%s1666_s3 + $0x60] sm:$0xff] %v626_v22  ;;  %876 = vst [vmem:[%s1666_s3 + $0x160] sm:$0xff] %v754_v23  ;;  %v629_v28 = vadd.f32 %v1405_v10, %v628_v26  ;;  %v757_v29 = vadd.f32 %v1405_v10, %v756_v27  ;;  %v630_v30 = vpop.f32.mrb[27].mxu0  ;;  %v758_v31 = vpop.f32.mrb[27].mxu1 }
 0x12d   :  { %845 = vst [vmem:[%s1666_s3 + $0x68] sm:$0xff] %v629_v28  ;;  %877 = vst [vmem:[%s1666_s3 + $0x168] sm:$0xff] %v757_v29 }
 0x130   :  { %v633_v32 = vpop.f32.mrb[28].mxu0  ;;  %v761_v33 = vpop.f32.mrb[28].mxu1 }
 0x131   :  { %v634_v34 = vadd.f32 %v1405_v10, %v633_v32  ;;  %v762_v35 = vadd.f32 %v1405_v10, %v761_v33  ;;  %v635_v36 = vpop.f32.mrb[29].mxu0  ;;  %v763_v37 = vpop.f32.mrb[29].mxu1 }
 0x132   :  { %v636_v38 = vpop.f32.mrb[30].mxu0  ;;  %v764_v39 = vpop.f32.mrb[30].mxu1 }
 0x133   :  { %846 = vst [vmem:[%s1666_s3 + $0x70] sm:$0xff] %v634_v34  ;;  %878 = vst [vmem:[%s1666_s3 + $0x170] sm:$0xff] %v762_v35  ;;  %v637_v40 = vadd.f32 %v1405_v10, %v636_v38  ;;  %v765_v41 = vadd.f32 %v1405_v10, %v764_v39  ;;  %v638_v42 = vpop.f32.mrb[31].mxu0  ;;  %v766_v43 = vpop.f32.mrb[31].mxu1 }
 0x135   :  { %847 = vst [vmem:[%s1666_s3 + $0x78] sm:$0xff] %v637_v40  ;;  %879 = vst [vmem:[%s1666_s3 + $0x178] sm:$0xff] %v765_v41 }
 0x138   :  { %v641_v44 = vpop.f32.mrb[32].mxu0  ;;  %v769_v45 = vpop.f32.mrb[32].mxu1 }
 0x139   :  { %v642_v46 = vadd.f32 %v1405_v10, %v641_v44  ;;  %v770_v47 = vadd.f32 %v1405_v10, %v769_v45  ;;  %v643_v48 = vpop.f32.mrb[33].mxu0  ;;  %v771_v49 = vpop.f32.mrb[33].mxu1 }
 0x13a   :  { %v644_v50 = vpop.f32.mrb[34].mxu0  ;;  %v772_v51 = vpop.f32.mrb[34].mxu1 }
 0x13b   :  { %848 = vst [vmem:[%s1666_s3 + $0x80] sm:$0xff] %v642_v46  ;;  %880 = vst [vmem:[%s1666_s3 + $0x180] sm:$0xff] %v770_v47  ;;  %v645_v52 = vadd.f32 %v1405_v10, %v644_v50  ;;  %v773_v53 = vadd.f32 %v1405_v10, %v772_v51  ;;  %v646_v54 = vpop.f32.mrb[35].mxu0  ;;  %v774_v55 = vpop.f32.mrb[35].mxu1 }
 0x13d   :  { %849 = vst [vmem:[%s1666_s3 + $0x88] sm:$0xff] %v645_v52  ;;  %881 = vst [vmem:[%s1666_s3 + $0x188] sm:$0xff] %v773_v53 }
 0x140   :  { %v649_v56 = vpop.f32.mrb[36].mxu0  ;;  %v777_v57 = vpop.f32.mrb[36].mxu1 }
 0x141   :  { %v650_v58 = vadd.f32 %v1405_v10, %v649_v56  ;;  %v778_v59 = vadd.f32 %v1405_v10, %v777_v57  ;;  %v651_v60 = vpop.f32.mrb[37].mxu0  ;;  %v779_v61 = vpop.f32.mrb[37].mxu1 }
 0x142   :  { %v652_v62 = vpop.f32.mrb[38].mxu0  ;;  %v780_v63 = vpop.f32.mrb[38].mxu1 }
 0x143   :  { %850 = vst [vmem:[%s1666_s3 + $0x90] sm:$0xff] %v650_v58  ;;  %882 = vst [vmem:[%s1666_s3 + $0x190] sm:$0xff] %v778_v59  ;;  %v653_v0 = vadd.f32 %v1405_v10, %v652_v62  ;;  %v781_v1 = vadd.f32 %v1405_v10, %v780_v63  ;;  %v654_v2 = vpop.f32.mrb[39].mxu0  ;;  %v782_v3 = vpop.f32.mrb[39].mxu1 }
 0x145   :  { %851 = vst [vmem:[%s1666_s3 + $0x98] sm:$0xff] %v653_v0  ;;  %883 = vst [vmem:[%s1666_s3 + $0x198] sm:$0xff] %v781_v1 }
 0x148   :  { %v657_v4 = vpop.f32.mrb[40].mxu0  ;;  %v785_v5 = vpop.f32.mrb[40].mxu1 }
 0x149   :  { %v658_v6 = vadd.f32 %v1405_v10, %v657_v4  ;;  %v786_v7 = vadd.f32 %v1405_v10, %v785_v5  ;;  %v659_v8 = vpop.f32.mrb[41].mxu0  ;;  %v787_v9 = vpop.f32.mrb[41].mxu1 }
 0x14a   :  { %v660_v11 = vpop.f32.mrb[42].mxu0  ;;  %v788_v12 = vpop.f32.mrb[42].mxu1 }
 0x14b   :  { %852 = vst [vmem:[%s1666_s3 + $0xa0] sm:$0xff] %v658_v6  ;;  %884 = vst [vmem:[%s1666_s3 + $0x1a0] sm:$0xff] %v786_v7  ;;  %v661_v13 = vadd.f32 %v1405_v10, %v660_v11  ;;  %v789_v14 = vadd.f32 %v1405_v10, %v788_v12  ;;  %v662_v15 = vpop.f32.mrb[43].mxu0  ;;  %v790_v16 = vpop.f32.mrb[43].mxu1 }
 0x14d   :  { %853 = vst [vmem:[%s1666_s3 + $0xa8] sm:$0xff] %v661_v13  ;;  %885 = vst [vmem:[%s1666_s3 + $0x1a8] sm:$0xff] %v789_v14 }
 0x150   :  { %v665_v17 = vpop.f32.mrb[44].mxu0  ;;  %v793_v18 = vpop.f32.mrb[44].mxu1 }
 0x151   :  { %v666_v19 = vadd.f32 %v1405_v10, %v665_v17  ;;  %v794_v20 = vadd.f32 %v1405_v10, %v793_v18  ;;  %v667_v21 = vpop.f32.mrb[45].mxu0  ;;  %v795_v22 = vpop.f32.mrb[45].mxu1 }
 0x152   :  { %v668_v23 = vpop.f32.mrb[46].mxu0  ;;  %v796_v24 = vpop.f32.mrb[46].mxu1 }
 0x153   :  { %854 = vst [vmem:[%s1666_s3 + $0xb0] sm:$0xff] %v666_v19  ;;  %886 = vst [vmem:[%s1666_s3 + $0x1b0] sm:$0xff] %v794_v20  ;;  %v669_v25 = vadd.f32 %v1405_v10, %v668_v23  ;;  %v797_v26 = vadd.f32 %v1405_v10, %v796_v24  ;;  %v670_v27 = vpop.f32.mrb[47].mxu0  ;;  %v798_v28 = vpop.f32.mrb[47].mxu1 }
 0x155   :  { %855 = vst [vmem:[%s1666_s3 + $0xb8] sm:$0xff] %v669_v25  ;;  %887 = vst [vmem:[%s1666_s3 + $0x1b8] sm:$0xff] %v797_v26 }
 0x158   :  { %v673_v29 = vpop.f32.mrb[48].mxu0  ;;  %v801_v30 = vpop.f32.mrb[48].mxu1 }
 0x159   :  { %v674_v31 = vadd.f32 %v1405_v10, %v673_v29  ;;  %v802_v32 = vadd.f32 %v1405_v10, %v801_v30  ;;  %v675_v33 = vpop.f32.mrb[49].mxu0  ;;  %v803_v34 = vpop.f32.mrb[49].mxu1 }
 0x15a   :  { %v676_v35 = vpop.f32.mrb[50].mxu0  ;;  %v804_v36 = vpop.f32.mrb[50].mxu1 }
 0x15b   :  { %856 = vst [vmem:[%s1666_s3 + $0xc0] sm:$0xff] %v674_v31  ;;  %888 = vst [vmem:[%s1666_s3 + $0x1c0] sm:$0xff] %v802_v32  ;;  %v677_v37 = vadd.f32 %v1405_v10, %v676_v35  ;;  %v805_v38 = vadd.f32 %v1405_v10, %v804_v36  ;;  %v678_v39 = vpop.f32.mrb[51].mxu0  ;;  %v806_v40 = vpop.f32.mrb[51].mxu1 }
 0x15d   :  { %857 = vst [vmem:[%s1666_s3 + $0xc8] sm:$0xff] %v677_v37  ;;  %889 = vst [vmem:[%s1666_s3 + $0x1c8] sm:$0xff] %v805_v38 }
 0x160   :  { %v681_v41 = vpop.f32.mrb[52].mxu0  ;;  %v809_v42 = vpop.f32.mrb[52].mxu1 }
 0x161   :  { %v682_v43 = vadd.f32 %v1405_v10, %v681_v41  ;;  %v810_v44 = vadd.f32 %v1405_v10, %v809_v42  ;;  %v683_v45 = vpop.f32.mrb[53].mxu0  ;;  %v811_v46 = vpop.f32.mrb[53].mxu1 }
 0x162   :  { %v684_v47 = vpop.f32.mrb[54].mxu0  ;;  %v812_v48 = vpop.f32.mrb[54].mxu1 }
 0x163   :  { %858 = vst [vmem:[%s1666_s3 + $0xd0] sm:$0xff] %v682_v43  ;;  %890 = vst [vmem:[%s1666_s3 + $0x1d0] sm:$0xff] %v810_v44  ;;  %v685_v49 = vadd.f32 %v1405_v10, %v684_v47  ;;  %v813_v50 = vadd.f32 %v1405_v10, %v812_v48  ;;  %v686_v51 = vpop.f32.mrb[55].mxu0  ;;  %v814_v52 = vpop.f32.mrb[55].mxu1 }
 0x165   :  { %859 = vst [vmem:[%s1666_s3 + $0xd8] sm:$0xff] %v685_v49  ;;  %891 = vst [vmem:[%s1666_s3 + $0x1d8] sm:$0xff] %v813_v50 }
 0x168   :  { %v689_v53 = vpop.f32.mrb[56].mxu0  ;;  %v817_v54 = vpop.f32.mrb[56].mxu1 }
 0x169   :  { %v690_v55 = vadd.f32 %v1405_v10, %v689_v53  ;;  %v818_v56 = vadd.f32 %v1405_v10, %v817_v54  ;;  %v691_v57 = vpop.f32.mrb[57].mxu0  ;;  %v819_v58 = vpop.f32.mrb[57].mxu1 }
 0x16a   :  { %v692_v59 = vpop.f32.mrb[58].mxu0  ;;  %v820_v60 = vpop.f32.mrb[58].mxu1 }
 0x16b   :  { %860 = vst [vmem:[%s1666_s3 + $0xe0] sm:$0xff] %v690_v55  ;;  %892 = vst [vmem:[%s1666_s3 + $0x1e0] sm:$0xff] %v818_v56  ;;  %v693_v61 = vadd.f32 %v1405_v10, %v692_v59  ;;  %v821_v62 = vadd.f32 %v1405_v10, %v820_v60  ;;  %v694_v63 = vpop.f32.mrb[59].mxu0  ;;  %v822_v0 = vpop.f32.mrb[59].mxu1 }
 0x16d   :  { %861 = vst [vmem:[%s1666_s3 + $0xe8] sm:$0xff] %v693_v61  ;;  %893 = vst [vmem:[%s1666_s3 + $0x1e8] sm:$0xff] %v821_v62 }
 0x170   :  { %v697_v1 = vpop.f32.mrb[60].mxu0  ;;  %v825_v2 = vpop.f32.mrb[60].mxu1 }
 0x171   :  { %v698_v3 = vadd.f32 %v1405_v10, %v697_v1  ;;  %v826_v4 = vadd.f32 %v1405_v10, %v825_v2  ;;  %v699_v5 = vpop.f32.mrb[61].mxu0  ;;  %v827_v6 = vpop.f32.mrb[61].mxu1 }
 0x172   :  { %v700_v7 = vpop.f32.mrb[62].mxu0  ;;  %v828_v8 = vpop.f32.mrb[62].mxu1 }
 0x173   :  { %862 = vst [vmem:[%s1666_s3 + $0xf0] sm:$0xff] %v698_v3  ;;  %894 = vst [vmem:[%s1666_s3 + $0x1f0] sm:$0xff] %v826_v4  ;;  %v701_v9 = vadd.f32 %v1405_v10, %v700_v7  ;;  %v829_v11 = vadd.f32 %v1405_v10, %v828_v8  ;;  %v702_v12 = vpop.f32.mrb[63].mxu0  ;;  %v830_v13 = vpop.f32.mrb[63].mxu1 }
 0x175   :  { %863 = vst [vmem:[%s1666_s3 + $0xf8] sm:$0xff] %v701_v9  ;;  %895 = vst [vmem:[%s1666_s3 + $0x1f8] sm:$0xff] %v829_v11 }

</bundles_post_ra>
